<compile_context>
chip_gen: v7x
topology: tpu7x:2x2x1
jax: 0.10.0
libtpu: 0.0.40
codegen_flags: <defaults>
</compile_context>

<pallas_src>
import functools
import math

import jax
import jax.numpy as jnp
from jax.experimental import pallas as pl
from jax.experimental.pallas import tpu as pltpu

# ----- small config that preserves ViT-B/16 structure (patch=16, cls token, MHA, MLP) -----
PATCH = 16
IMG = 32                      # 32x32 image -> 2x2 = 4 patches
GRID = IMG // PATCH
NUM_PATCHES = GRID * GRID     # 4
HIDDEN = 32                   # hidden_dim (768 in real ViT-B/16)
HEADS = 4                     # num_heads  (12 in real ViT-B/16)
HEAD_DIM = HIDDEN // HEADS
MLP_DIM = 64                  # mlp_dim    (3072 in real ViT-B/16)
LAYERS = 2                    # num_layers (12 in real ViT-B/16)
NUM_CLASSES = 10
SEQ = NUM_PATCHES + 1         # +1 class token
SEQ_PAD = 8                   # tokens padded to one sublane tile per image
HEAD_PAD = 128                # classifier output padded to one full lane tile
LN_EPS = 1e-6                 # torchvision ViT uses LayerNorm(eps=1e-6)
PATCH_DIM = 3 * PATCH * PATCH


# ------------------------------------------------------------------ in-kernel math helpers

def _gelu_tanh(x):
    # tanh-formulation GELU: tanh lowers to the (otherwise idle) EUP slot instead of
    # a ~10-op VALU erf polynomial.  Deviation from exact-erf GELU is <1e-3 and far
    # below the reference tolerance at these activation magnitudes.
    c = math.sqrt(2.0 / math.pi)
    return 0.5 * x * (1.0 + jnp.tanh(c * (x + 0.044715 * x * x * x)))


def _layernorm(x, g, b):
    mean = jnp.mean(x, axis=-1, keepdims=True)
    xc = x - mean
    var = jnp.mean(xc * xc, axis=-1, keepdims=True)
    return xc * jax.lax.rsqrt(var + LN_EPS) * g + b


# ------------------------------------------------------------------ fused forward kernel

def _vit_fused_kernel(
    xin_ref, emb_ref, pw_ref,                     # patch pixels, per-image cls/pos/bias, conv_proj weight
    ln1g_ref, ln1b_ref,                           # (L, 1, D)
    wqkv_ref, bqkv_ref,                           # (L, D, 3D) bf16 (Q cols pre-scaled), (L, 1, 3D) f32
    wo_ref, bo_ref,                               # (L, D, D) bf16, (L, 1, D) f32
    ln2g_ref, ln2b_ref,                           # (L, 1, D)
    w1_ref, b1_ref, w2_ref, b2_ref,               # MLP (weights bf16, biases f32)
    lnfg_ref, lnfb_ref,                           # final LN (1, D)
    headw_ref, headb_ref,                         # (D, 128) bf16, (1, 128) f32 zero-padded classifier
    out_ref,                                      # (batch, 128) lane-dense cls logits
    *, batch):
    f32 = jnp.float32
    bf16 = jnp.bfloat16
    n_tok = batch * SEQ_PAD

    # key-padding additive bias (keys >= SEQ are pad): built once, SEQ_PAD lanes only.
    kidx = jax.lax.broadcasted_iota(jnp.int32, (1, 1, SEQ_PAD), 2)
    mask_bias = jnp.where(kidx < SEQ, 0.0, -1e30).astype(f32)

    # ---- patch embedding: Conv2d(3, D, k=16, s=16) == one matmul (bf16 operands, f32 acc).
    #      cls token / positional embedding / conv bias are added via the per-image slab.
    # TODO(synk): cls + pad rows of xin are zeros (~half the rows at this toy size); run
    # the patch matmul on the NUM_PATCHES real rows only before scaling SEQ up.
    tok = jnp.dot(xin_ref[...].astype(bf16), pw_ref[...],
                  preferred_element_type=f32)                              # (BT, D)
    x = (tok.reshape(batch, SEQ_PAD, HIDDEN) + emb_ref[...]).reshape(n_tok, HIDDEN)

    for l in range(LAYERS):
        # ---------------- multi-head self-attention (per-image, fused QKV) ----------------
        h = _layernorm(x, ln1g_ref[l], ln1b_ref[l])
        qkv = jnp.dot(h.astype(bf16), wqkv_ref[l],
                      preferred_element_type=f32) + bqkv_ref[l]            # (BT, 3D)
        qkv3 = qkv.reshape(batch, SEQ_PAD, 3 * HIDDEN).astype(bf16)        # (B, 8, 3D)

        heads_out = []
        for hd in range(HEADS):
            o0 = hd * HEAD_DIM
            q = qkv3[:, :, o0:o0 + HEAD_DIM]                               # (B, 8, dh)
            k = qkv3[:, :, HIDDEN + o0:HIDDEN + o0 + HEAD_DIM]
            v = qkv3[:, :, 2 * HIDDEN + o0:2 * HIDDEN + o0 + HEAD_DIM]
            # scores are per-image 8x8 blocks; Q was pre-scaled by 1/sqrt(dh) host-side.
            s = jnp.einsum('bqd,bkd->bqk', q, k,
                           preferred_element_type=f32) + mask_bias         # (B, 8, 8)
            s = s - jnp.max(s, axis=-1, keepdims=True)
            p = jnp.exp(s)
            p = p * pl.reciprocal(jnp.sum(p, axis=-1, keepdims=True), approx=True)
            heads_out.append(jnp.einsum('bqk,bkd->bqd', p.astype(bf16), v,
                                        preferred_element_type=f32))       # (B, 8, dh)

        o = jnp.concatenate(heads_out, axis=-1).reshape(n_tok, HIDDEN)     # (BT, D)
        x = x + jnp.dot(o.astype(bf16), wo_ref[l],
                        preferred_element_type=f32) + bo_ref[l]            # residual 1

        # ---------------- MLP ----------------
        h2 = _layernorm(x, ln2g_ref[l], ln2b_ref[l])
        m = jnp.dot(h2.astype(bf16), w1_ref[l], preferred_element_type=f32) + b1_ref[l]
        m = _gelu_tanh(m)
        x = x + jnp.dot(m.astype(bf16), w2_ref[l],
                        preferred_element_type=f32) + b2_ref[l]            # residual 2

    # ---------------- final LayerNorm + classifier head on cls rows only ----------------
    # Gather the B cls rows (rows 0, 8, 16, ...) with a tiny one-hot selection matmul
    # (TPU-idiomatic strided sublane gather); head matmul + HBM writeback shrink 8x.
    ri = jax.lax.broadcasted_iota(jnp.int32, (batch, n_tok), 0)
    ci = jax.lax.broadcasted_iota(jnp.int32, (batch, n_tok), 1)
    sel = (ci == ri * SEQ_PAD).astype(f32)                                 # (B, BT)
    cls = jnp.dot(sel, x, preferred_element_type=f32)                      # (B, D)
    fin = _layernorm(cls, lnfg_ref[...], lnfb_ref[...])
    out_ref[...] = jnp.dot(fin.astype(bf16), headw_ref[...],
                           preferred_element_type=f32) + headb_ref[...]    # (B, 128)


# ------------------------------------------------------------------ parameters

def init_params(key):
    keys = iter(jax.random.split(key, 8 + 16 * LAYERS))

    def nrm(shape, scale=0.02):
        return scale * jax.random.normal(next(keys), shape, dtype=jnp.float32)

    params = {
        "patch_w": nrm((PATCH_DIM, HIDDEN)),   # conv_proj (kernel=stride=16) as matmul
        "patch_b": nrm((HIDDEN,)),
        "cls": nrm((1, 1, HIDDEN)),
        "pos": nrm((1, SEQ, HIDDEN)),
        "ln_g": jnp.ones((HIDDEN,), jnp.float32),
        "ln_b": jnp.zeros((HIDDEN,), jnp.float32),
        "head_w": nrm((HIDDEN, NUM_CLASSES)),
        "head_b": jnp.zeros((NUM_CLASSES,), jnp.float32),
        "layers": [],
    }
    for _ in range(LAYERS):
        params["layers"].append({
            "ln1_g": jnp.ones((HIDDEN,), jnp.float32),
            "ln1_b": jnp.zeros((HIDDEN,), jnp.float32),
            "qkv_w": nrm((HIDDEN, 3 * HIDDEN)),   # MHA in_proj (columns ordered q|k|v, head-major)
            "qkv_b": nrm((3 * HIDDEN,)),
            "out_w": nrm((HIDDEN, HIDDEN)),       # MHA out_proj
            "out_b": nrm((HIDDEN,)),
            "ln2_g": jnp.ones((HIDDEN,), jnp.float32),
            "ln2_b": jnp.zeros((HIDDEN,), jnp.float32),
            "mlp_w1": nrm((HIDDEN, MLP_DIM)),
            "mlp_b1": nrm((MLP_DIM,)),
            "mlp_w2": nrm((MLP_DIM, HIDDEN)),
            "mlp_b2": nrm((HIDDEN,)),
        })
    return params


def pack_params(params):
    """Stack per-layer weights along a leading L axis, keep the fused q|k|v projection
    as one matrix (Q columns pre-scaled by 1/sqrt(head_dim)), and store matmul weights
    in bf16 (MXU-native operands; accumulation stays f32 in-kernel)."""
    L = LAYERS
    bf16 = jnp.bfloat16

    def stack(name):
        return jnp.stack([lyr[name] for lyr in params["layers"]], axis=0)

    # pre-scale Q columns so the kernel never multiplies scores by 1/sqrt(dh)
    qscale = jnp.concatenate(
        [jnp.full((HIDDEN,), 1.0 / math.sqrt(HEAD_DIM), jnp.float32),
         jnp.ones((2 * HIDDEN,), jnp.float32)])
    wqkv = stack("qkv_w") * qscale            # (L, D, 3D)
    bqkv = stack("qkv_b") * qscale            # (L, 3D)

    return {
        "patch_w": params["patch_w"].astype(bf16),
        "patch_b": params["patch_b"].reshape(1, HIDDEN),
        "cls": params["cls"].reshape(1, HIDDEN),
        "pos": params["pos"].reshape(SEQ, HIDDEN),
        "ln1_g": stack("ln1_g").reshape(L, 1, HIDDEN),
        "ln1_b": stack("ln1_b").reshape(L, 1, HIDDEN),
        "wqkv": wqkv.astype(bf16),
        "bqkv": bqkv.reshape(L, 1, 3 * HIDDEN),
        "wo": stack("out_w").astype(bf16),                      # (L, D, D)
        "bo": stack("out_b").reshape(L, 1, HIDDEN),
        "ln2_g": stack("ln2_g").reshape(L, 1, HIDDEN),
        "ln2_b": stack("ln2_b").reshape(L, 1, HIDDEN),
        "w1": stack("mlp_w1").astype(bf16),
        "b1": stack("mlp_b1").reshape(L, 1, MLP_DIM),
        "w2": stack("mlp_w2").astype(bf16),
        "b2": stack("mlp_b2").reshape(L, 1, HIDDEN),
        "lnf_g": params["ln_g"].reshape(1, HIDDEN),
        "lnf_b": params["ln_b"].reshape(1, HIDDEN),
        "head_w": jnp.pad(params["head_w"],
                          ((0, 0), (0, HEAD_PAD - NUM_CLASSES))).astype(bf16),
        "head_b": jnp.pad(params["head_b"], (0, HEAD_PAD - NUM_CLASSES)).reshape(1, HEAD_PAD),
    }


# ------------------------------------------------------------------ forward (single pallas_call)

def vit_forward(packed, x, pos_emb_flag=True, batch_tile=None):
    """x: NCHW float32 (B, 3, IMG, IMG) -> logits (B, NUM_CLASSES).

    batch_tile: images per grid step.  Default = B (grid of 1; best on single-TC
    v5e/v6e at this toy size).  On v7x set batch_tile = B // 2 so the "parallel"
    batch grid spreads across both TensorCores."""
    B = x.shape[0]
    if batch_tile is None:
        batch_tile = B
    assert B % batch_tile == 0
    num_tiles = B // batch_tile

    # --- patch extraction (layout prep only): (B, 3, H, W) -> (B, NP, 3*16*16) ---
    patches = (x.reshape(B, 3, GRID, PATCH, GRID, PATCH)
                 .transpose(0, 2, 4, 1, 3, 5)
                 .reshape(B, NUM_PATCHES, PATCH_DIM))
    # zero row for the cls token plus SEQ_PAD-SEQ zero pad rows -> sublane-tile aligned slab
    x_in = jnp.pad(patches, ((0, 0), (1, SEQ_PAD - SEQ), (0, 0))).reshape(B * SEQ_PAD, PATCH_DIM)

    # Fold conv bias / cls token / positional embedding into one per-image (SEQ_PAD, D)
    # additive slab; broadcast across the batch happens inside the kernel (no HBM tiling).
    if pos_emb_flag:
        cls_add = packed["cls"] + packed["pos"][0:1]
        patch_add = packed["patch_b"] + packed["pos"][1:SEQ]
    else:
        cls_add = packed["cls"]
        patch_add = jnp.broadcast_to(packed["patch_b"], (NUM_PATCHES, HIDDEN))
    emb = jnp.concatenate(
        [cls_add, patch_add, jnp.zeros((SEQ_PAD - SEQ, HIDDEN), jnp.float32)], axis=0)

    operands = (
        x_in, emb, packed["patch_w"],
        packed["ln1_g"], packed["ln1_b"],
        packed["wqkv"], packed["bqkv"],
        packed["wo"], packed["bo"],
        packed["ln2_g"], packed["ln2_b"],
        packed["w1"], packed["b1"], packed["w2"], packed["b2"],
        packed["lnf_g"], packed["lnf_b"],
        packed["head_w"], packed["head_b"],
    )

    def full(shape):
        nd = len(shape)
        return pl.BlockSpec(shape, lambda i: (0,) * nd)   # constant map: DMA'd once

    in_specs = [pl.BlockSpec((batch_tile * SEQ_PAD, PATCH_DIM), lambda i: (i, 0))]
    in_specs += [full(op.shape) for op in operands[1:]]

    out = pl.pallas_call(
        functools.partial(_vit_fused_kernel, batch=batch_tile),
        out_shape=jax.ShapeDtypeStruct((num_tiles, batch_tile, HEAD_PAD), jnp.float32),
        grid_spec=pltpu.PrefetchScalarGridSpec(
            num_scalar_prefetch=0,
            grid=(num_tiles,),
            in_specs=in_specs,
            out_specs=pl.BlockSpec((None, batch_tile, HEAD_PAD), lambda i: (i, 0, 0)),
        ),
        compiler_params=pltpu.CompilerParams(dimension_semantics=("parallel",)),
    )(*operands)

    # lane-dense (B, 128) slab -> (B, NUM_CLASSES)
    return out.reshape(B, HEAD_PAD)[:, :NUM_CLASSES]


# ------------------------------------------------------------------ pure-JAX reference (for checking)

def vit_reference(params, x, pos_emb_flag=True):
    B = x.shape[0]
    patches = (x.reshape(B, 3, GRID, PATCH, GRID, PATCH)
                 .transpose(0, 2, 4, 1, 3, 5)
                 .reshape(B * NUM_PATCHES, PATCH_DIM))
    tok = (patches @ params["patch_w"] + params["patch_b"]).reshape(B, NUM_PATCHES, HIDDEN)
    cls = jnp.broadcast_to(params["cls"], (B, 1, HIDDEN))
    seq = jnp.concatenate([cls, tok], axis=1)
    if pos_emb_flag:
        seq = seq + params["pos"]

    def ln(z, g, b):
        mu = jnp.mean(z, -1, keepdims=True)
        zc = z - mu
        v = jnp.mean(zc * zc, -1, keepdims=True)
        return zc * jax.lax.rsqrt(v + LN_EPS) * g + b

    for lyr in params["layers"]:
        h = ln(seq, lyr["ln1_g"], lyr["ln1_b"])
        qkv = (h @ lyr["qkv_w"] + lyr["qkv_b"]).reshape(B, SEQ, 3, HEADS, HEAD_DIM)
        q = qkv[:, :, 0].transpose(0, 2, 1, 3)
        k = qkv[:, :, 1].transpose(0, 2, 1, 3)
        v = qkv[:, :, 2].transpose(0, 2, 1, 3)
        s = jnp.einsum("bhqd,bhkd->bhqk", q, k) / math.sqrt(HEAD_DIM)
        p = jax.nn.softmax(s, axis=-1)
        o = jnp.einsum("bhqk,bhkd->bhqd", p, v).transpose(0, 2, 1, 3).reshape(B, SEQ, HIDDEN)
        seq = seq + (o @ lyr["out_w"] + lyr["out_b"])
        h2 = ln(seq, lyr["ln2_g"], lyr["ln2_b"])
        m = jax.nn.gelu(h2 @ lyr["mlp_w1"] + lyr["mlp_b1"], approximate=False)
        seq = seq + (m @ lyr["mlp_w2"] + lyr["mlp_b2"])

    fin = ln(seq, params["ln_g"], params["ln_b"])
    return fin[:, 0] @ params["head_w"] + params["head_b"]


# ------------------------------------------------------------------ main

if __name__ == "__main__":
    key = jax.random.PRNGKey(0)
    pkey, xkey = jax.random.split(key)
    params = init_params(pkey)
    packed = pack_params(params)
    x = jax.random.normal(xkey, (2, 3, IMG, IMG), dtype=jnp.float32)  # NCHW, like PyTorch

    fwd = jax.jit(functools.partial(vit_forward, pos_emb_flag=True))
    logits = fwd(packed, x)
    jax.block_until_ready(logits)

    assert logits.shape == (2, NUM_CLASSES) and logits.dtype == jnp.float32
    assert bool(jnp.all(jnp.isfinite(logits)))

    # sanity-check the fused kernel against a straightforward jnp (exact-erf GELU) reference
    ref = vit_reference(params, x, pos_emb_flag=True)
    assert bool(jnp.allclose(logits, ref, atol=2e-2, rtol=2e-2)), \
        float(jnp.max(jnp.abs(logits - ref)))

    print("KERNEL_OK")
</pallas_src>

<mosaic_0001>
module attributes {stable_mosaic.version = 11 : i64} {
  func.func @_vit_fused_kernel(%arg0: i32, %arg1: memref<16x768xf32, #tpu.memory_space<vmem>>, %arg2: memref<8x32xf32, #tpu.memory_space<vmem>>, %arg3: memref<768x32xbf16, #tpu.memory_space<vmem>>, %arg4: memref<2x1x32xf32, #tpu.memory_space<vmem>>, %arg5: memref<2x1x32xf32, #tpu.memory_space<vmem>>, %arg6: memref<2x32x96xbf16, #tpu.memory_space<vmem>>, %arg7: memref<2x1x96xf32, #tpu.memory_space<vmem>>, %arg8: memref<2x32x32xbf16, #tpu.memory_space<vmem>>, %arg9: memref<2x1x32xf32, #tpu.memory_space<vmem>>, %arg10: memref<2x1x32xf32, #tpu.memory_space<vmem>>, %arg11: memref<2x1x32xf32, #tpu.memory_space<vmem>>, %arg12: memref<2x32x64xbf16, #tpu.memory_space<vmem>>, %arg13: memref<2x1x64xf32, #tpu.memory_space<vmem>>, %arg14: memref<2x64x32xbf16, #tpu.memory_space<vmem>>, %arg15: memref<2x1x32xf32, #tpu.memory_space<vmem>>, %arg16: memref<1x32xf32, #tpu.memory_space<vmem>>, %arg17: memref<1x32xf32, #tpu.memory_space<vmem>>, %arg18: memref<32x128xbf16, #tpu.memory_space<vmem>>, %arg19: memref<1x128xf32, #tpu.memory_space<vmem>>, %arg20: memref<1x2x128xf32, #tpu.memory_space<vmem>>) attributes {dimension_semantics = [#tpu.dimension_semantics<parallel>], iteration_bounds = array<i64: 1>, scalar_prefetch = 0 : i64, scratch_operands = 0 : i64, tpu.core_type = #tpu.core_type<tc>, window_params = [{transform_indices = @transform_0, window_bounds = array<i64: 16, 768>}, {pipeline_mode = #tpu.pipeline_mode<synchronous>, transform_indices = @transform_1, window_bounds = array<i64: 8, 32>}, {pipeline_mode = #tpu.pipeline_mode<synchronous>, transform_indices = @transform_2, window_bounds = array<i64: 768, 32>}, {pipeline_mode = #tpu.pipeline_mode<synchronous>, transform_indices = @transform_3, window_bounds = array<i64: 2, 1, 32>}, {pipeline_mode = #tpu.pipeline_mode<synchronous>, transform_indices = @transform_4, window_bounds = array<i64: 2, 1, 32>}, {pipeline_mode = #tpu.pipeline_mode<synchronous>, transform_indices = @transform_5, window_bounds = array<i64: 2, 32, 96>}, {pipeline_mode = #tpu.pipeline_mode<synchronous>, transform_indices = @transform_6, window_bounds = array<i64: 2, 1, 96>}, {pipeline_mode = #tpu.pipeline_mode<synchronous>, transform_indices = @transform_7, window_bounds = array<i64: 2, 32, 32>}, {pipeline_mode = #tpu.pipeline_mode<synchronous>, transform_indices = @transform_8, window_bounds = array<i64: 2, 1, 32>}, {pipeline_mode = #tpu.pipeline_mode<synchronous>, transform_indices = @transform_9, window_bounds = array<i64: 2, 1, 32>}, {pipeline_mode = #tpu.pipeline_mode<synchronous>, transform_indices = @transform_10, window_bounds = array<i64: 2, 1, 32>}, {pipeline_mode = #tpu.pipeline_mode<synchronous>, transform_indices = @transform_11, window_bounds = array<i64: 2, 32, 64>}, {pipeline_mode = #tpu.pipeline_mode<synchronous>, transform_indices = @transform_12, window_bounds = array<i64: 2, 1, 64>}, {pipeline_mode = #tpu.pipeline_mode<synchronous>, transform_indices = @transform_13, window_bounds = array<i64: 2, 64, 32>}, {pipeline_mode = #tpu.pipeline_mode<synchronous>, transform_indices = @transform_14, window_bounds = array<i64: 2, 1, 32>}, {pipeline_mode = #tpu.pipeline_mode<synchronous>, transform_indices = @transform_15, window_bounds = array<i64: 1, 32>}, {pipeline_mode = #tpu.pipeline_mode<synchronous>, transform_indices = @transform_16, window_bounds = array<i64: 1, 32>}, {pipeline_mode = #tpu.pipeline_mode<synchronous>, transform_indices = @transform_17, window_bounds = array<i64: 32, 128>}, {pipeline_mode = #tpu.pipeline_mode<synchronous>, transform_indices = @transform_18, window_bounds = array<i64: 1, 128>}, {transform_indices = @transform_19, window_bounds = array<i64: 1, 2, 128>}]} {
    %0 = tpu.iota {dimensions = array<i32: 2>} : vector<1x1x8xi32>
    %c5_i32 = arith.constant 5 : i32
    %1 = vector.broadcast %c5_i32 : i32 to vector<1x1x8xi32>
    %2 = arith.cmpi slt, %0, %1 : vector<1x1x8xi32>
    %cst = arith.constant 0.000000e+00 : f32
    %cst_0 = arith.constant -1.000000e+30 : f32
    %3 = vector.broadcast %cst : f32 to vector<1x1x8xf32>
    %4 = vector.broadcast %cst_0 : f32 to vector<1x1x8xf32>
    %5 = arith.select %2, %3, %4 : vector<1x1x8xi1>, vector<1x1x8xf32>
    %c0 = arith.constant 0 : index
    %c0_1 = arith.constant 0 : index
    %6 = vector.load %arg1[%c0, %c0_1] : memref<16x768xf32, #tpu.memory_space<vmem>>, vector<16x768xf32>
    %7 = arith.truncf %6 : vector<16x768xf32> to vector<16x768xbf16>
    %c0_2 = arith.constant 0 : index
    %c0_3 = arith.constant 0 : index
    %8 = vector.load %arg3[%c0_2, %c0_3] : memref<768x32xbf16, #tpu.memory_space<vmem>>, vector<768x32xbf16>
    %cst_4 = arith.constant dense<0.000000e+00> : vector<16x32xf32>
    %9 = tpu.matmul %7, %8, %cst_4 {dimension_numbers = #tpu.dot_dimension_numbers<[1], [0], [0], [1], [0, 0, 1, 1], [], []>} : vector<16x768xbf16>, vector<768x32xbf16>, vector<16x32xf32> -> vector<16x32xf32>
    %10 = vector.shape_cast %9 : vector<16x32xf32> to vector<2x8x32xf32>
    %c0_5 = arith.constant 0 : index
    %c0_6 = arith.constant 0 : index
    %11 = vector.load %arg2[%c0_5, %c0_6] : memref<8x32xf32, #tpu.memory_space<vmem>>, vector<8x32xf32>
    %12 = vector.shape_cast %11 : vector<8x32xf32> to vector<1x8x32xf32>
    %13 = vector.broadcast %12 : vector<1x8x32xf32> to vector<2x8x32xf32>
    %14 = arith.addf %10, %13 : vector<2x8x32xf32>
    %15 = vector.shape_cast %14 : vector<2x8x32xf32> to vector<16x32xf32>
    %c0_7 = arith.constant 0 : index
    %c0_8 = arith.constant 0 : index
    %c0_9 = arith.constant 0 : index
    %16 = vector.load %arg4[%c0_7, %c0_8, %c0_9] : memref<2x1x32xf32, #tpu.memory_space<vmem>>, vector<1x1x32xf32>
    %17 = vector.shape_cast %16 : vector<1x1x32xf32> to vector<1x32xf32>
    %c0_10 = arith.constant 0 : index
    %c0_11 = arith.constant 0 : index
    %c0_12 = arith.constant 0 : index
    %18 = vector.load %arg5[%c0_10, %c0_11, %c0_12] : memref<2x1x32xf32, #tpu.memory_space<vmem>>, vector<1x1x32xf32>
    %19 = vector.shape_cast %18 : vector<1x1x32xf32> to vector<1x32xf32>
    %cst_13 = arith.constant dense<0.000000e+00> : vector<16xf32>
    %20 = vector.multi_reduction <add>, %15, %cst_13 [1] : vector<16x32xf32> to vector<16xf32>
    %21 = vector.shape_cast %20 : vector<16xf32> to vector<16x1xf32>
    %cst_14 = arith.constant 3.200000e+01 : f32
    %22 = vector.broadcast %cst_14 : f32 to vector<16x1xf32>
    %23 = arith.divf %21, %22 : vector<16x1xf32>
    %24 = vector.broadcast %23 : vector<16x1xf32> to vector<16x32xf32>
    %25 = arith.subf %15, %24 : vector<16x32xf32>
    %26 = arith.mulf %25, %25 : vector<16x32xf32>
    %cst_15 = arith.constant dense<0.000000e+00> : vector<16xf32>
    %27 = vector.multi_reduction <add>, %26, %cst_15 [1] : vector<16x32xf32> to vector<16xf32>
    %28 = vector.shape_cast %27 : vector<16xf32> to vector<16x1xf32>
    %cst_16 = arith.constant 3.200000e+01 : f32
    %29 = vector.broadcast %cst_16 : f32 to vector<16x1xf32>
    %30 = arith.divf %28, %29 : vector<16x1xf32>
    %cst_17 = arith.constant 9.99999997E-7 : f32
    %31 = vector.broadcast %cst_17 : f32 to vector<16x1xf32>
    %32 = arith.addf %30, %31 : vector<16x1xf32>
    %33 = math.rsqrt %32 : vector<16x1xf32>
    %34 = vector.broadcast %33 : vector<16x1xf32> to vector<16x32xf32>
    %35 = arith.mulf %25, %34 : vector<16x32xf32>
    %36 = vector.broadcast %17 : vector<1x32xf32> to vector<16x32xf32>
    %37 = arith.mulf %35, %36 : vector<16x32xf32>
    %38 = vector.broadcast %19 : vector<1x32xf32> to vector<16x32xf32>
    %39 = arith.addf %37, %38 : vector<16x32xf32>
    %40 = arith.truncf %39 : vector<16x32xf32> to vector<16x32xbf16>
    %c0_18 = arith.constant 0 : index
    %c0_19 = arith.constant 0 : index
    %c0_20 = arith.constant 0 : index
    %41 = vector.load %arg6[%c0_18, %c0_19, %c0_20] : memref<2x32x96xbf16, #tpu.memory_space<vmem>>, vector<1x32x96xbf16>
    %42 = vector.shape_cast %41 : vector<1x32x96xbf16> to vector<32x96xbf16>
    %cst_21 = arith.constant dense<0.000000e+00> : vector<16x96xf32>
    %43 = tpu.matmul %40, %42, %cst_21 {dimension_numbers = #tpu.dot_dimension_numbers<[1], [0], [0], [1], [0, 0, 1, 1], [], []>} : vector<16x32xbf16>, vector<32x96xbf16>, vector<16x96xf32> -> vector<16x96xf32>
    %c0_22 = arith.constant 0 : index
    %c0_23 = arith.constant 0 : index
    %c0_24 = arith.constant 0 : index
    %44 = vector.load %arg7[%c0_22, %c0_23, %c0_24] : memref<2x1x96xf32, #tpu.memory_space<vmem>>, vector<1x1x96xf32>
    %45 = vector.shape_cast %44 : vector<1x1x96xf32> to vector<1x96xf32>
    %46 = vector.broadcast %45 : vector<1x96xf32> to vector<16x96xf32>
    %47 = arith.addf %43, %46 : vector<16x96xf32>
    %48 = vector.shape_cast %47 : vector<16x96xf32> to vector<2x8x96xf32>
    %49 = arith.truncf %48 : vector<2x8x96xf32> to vector<2x8x96xbf16>
    %50 = vector.extract_strided_slice %49 {offsets = [0, 0, 0], sizes = [2, 8, 8], strides = [1, 1, 1]} : vector<2x8x96xbf16> to vector<2x8x8xbf16>
    %51 = vector.extract_strided_slice %49 {offsets = [0, 0, 32], sizes = [2, 8, 8], strides = [1, 1, 1]} : vector<2x8x96xbf16> to vector<2x8x8xbf16>
    %52 = vector.extract_strided_slice %49 {offsets = [0, 0, 64], sizes = [2, 8, 8], strides = [1, 1, 1]} : vector<2x8x96xbf16> to vector<2x8x8xbf16>
    "tpu.trace_start"() <{level = 10 : i32, message = "bqd,bkd->bqk"}> : () -> ()
    %cst_25 = arith.constant dense<0.000000e+00> : vector<2x8x8xf32>
    %53 = tpu.matmul %50, %51, %cst_25 {dimension_numbers = #tpu.dot_dimension_numbers<[2], [2], [1], [1], [0, 0, 0, 1, 1, 1], [0], [0]>} : vector<2x8x8xbf16>, vector<2x8x8xbf16>, vector<2x8x8xf32> -> vector<2x8x8xf32>
    "tpu.trace_stop"() : () -> ()
    %54 = vector.broadcast %5 : vector<1x1x8xf32> to vector<2x8x8xf32>
    %55 = arith.addf %53, %54 : vector<2x8x8xf32>
    %cst_26 = arith.constant dense<0xFF800000> : vector<2x8xf32>
    %56 = vector.multi_reduction <maximumf>, %55, %cst_26 [2] : vector<2x8x8xf32> to vector<2x8xf32>
    %57 = vector.shape_cast %56 : vector<2x8xf32> to vector<2x8x1xf32>
    %58 = vector.broadcast %57 : vector<2x8x1xf32> to vector<2x8x8xf32>
    %59 = arith.subf %55, %58 : vector<2x8x8xf32>
    %60 = math.exp %59 : vector<2x8x8xf32>
    %cst_27 = arith.constant dense<0.000000e+00> : vector<2x8xf32>
    %61 = vector.multi_reduction <add>, %60, %cst_27 [2] : vector<2x8x8xf32> to vector<2x8xf32>
    %62 = vector.shape_cast %61 : vector<2x8xf32> to vector<2x8x1xf32>
    %63 = tpu.reciprocal %62 {approx = true} : vector<2x8x1xf32> -> vector<2x8x1xf32>
    %64 = vector.broadcast %63 : vector<2x8x1xf32> to vector<2x8x8xf32>
    %65 = arith.mulf %60, %64 : vector<2x8x8xf32>
    %66 = arith.truncf %65 : vector<2x8x8xf32> to vector<2x8x8xbf16>
    "tpu.trace_start"() <{level = 10 : i32, message = "bqk,bkd->bqd"}> : () -> ()
    %cst_28 = arith.constant dense<0.000000e+00> : vector<2x8x8xf32>
    %67 = tpu.matmul %66, %52, %cst_28 {dimension_numbers = #tpu.dot_dimension_numbers<[2], [1], [1], [2], [0, 0, 0, 1, 1, 2], [0], [0]>} : vector<2x8x8xbf16>, vector<2x8x8xbf16>, vector<2x8x8xf32> -> vector<2x8x8xf32>
    "tpu.trace_stop"() : () -> ()
    %68 = vector.extract_strided_slice %49 {offsets = [0, 0, 8], sizes = [2, 8, 8], strides = [1, 1, 1]} : vector<2x8x96xbf16> to vector<2x8x8xbf16>
    %69 = vector.extract_strided_slice %49 {offsets = [0, 0, 40], sizes = [2, 8, 8], strides = [1, 1, 1]} : vector<2x8x96xbf16> to vector<2x8x8xbf16>
    %70 = vector.extract_strided_slice %49 {offsets = [0, 0, 72], sizes = [2, 8, 8], strides = [1, 1, 1]} : vector<2x8x96xbf16> to vector<2x8x8xbf16>
    "tpu.trace_start"() <{level = 10 : i32, message = "bqd,bkd->bqk"}> : () -> ()
    %cst_29 = arith.constant dense<0.000000e+00> : vector<2x8x8xf32>
    %71 = tpu.matmul %68, %69, %cst_29 {dimension_numbers = #tpu.dot_dimension_numbers<[2], [2], [1], [1], [0, 0, 0, 1, 1, 1], [0], [0]>} : vector<2x8x8xbf16>, vector<2x8x8xbf16>, vector<2x8x8xf32> -> vector<2x8x8xf32>
    "tpu.trace_stop"() : () -> ()
    %72 = vector.broadcast %5 : vector<1x1x8xf32> to vector<2x8x8xf32>
    %73 = arith.addf %71, %72 : vector<2x8x8xf32>
    %cst_30 = arith.constant dense<0xFF800000> : vector<2x8xf32>
    %74 = vector.multi_reduction <maximumf>, %73, %cst_30 [2] : vector<2x8x8xf32> to vector<2x8xf32>
    %75 = vector.shape_cast %74 : vector<2x8xf32> to vector<2x8x1xf32>
    %76 = vector.broadcast %75 : vector<2x8x1xf32> to vector<2x8x8xf32>
    %77 = arith.subf %73, %76 : vector<2x8x8xf32>
    %78 = math.exp %77 : vector<2x8x8xf32>
    %cst_31 = arith.constant dense<0.000000e+00> : vector<2x8xf32>
    %79 = vector.multi_reduction <add>, %78, %cst_31 [2] : vector<2x8x8xf32> to vector<2x8xf32>
    %80 = vector.shape_cast %79 : vector<2x8xf32> to vector<2x8x1xf32>
    %81 = tpu.reciprocal %80 {approx = true} : vector<2x8x1xf32> -> vector<2x8x1xf32>
    %82 = vector.broadcast %81 : vector<2x8x1xf32> to vector<2x8x8xf32>
    %83 = arith.mulf %78, %82 : vector<2x8x8xf32>
    %84 = arith.truncf %83 : vector<2x8x8xf32> to vector<2x8x8xbf16>
    "tpu.trace_start"() <{level = 10 : i32, message = "bqk,bkd->bqd"}> : () -> ()
    %cst_32 = arith.constant dense<0.000000e+00> : vector<2x8x8xf32>
    %85 = tpu.matmul %84, %70, %cst_32 {dimension_numbers = #tpu.dot_dimension_numbers<[2], [1], [1], [2], [0, 0, 0, 1, 1, 2], [0], [0]>} : vector<2x8x8xbf16>, vector<2x8x8xbf16>, vector<2x8x8xf32> -> vector<2x8x8xf32>
    "tpu.trace_stop"() : () -> ()
    %86 = vector.extract_strided_slice %49 {offsets = [0, 0, 16], sizes = [2, 8, 8], strides = [1, 1, 1]} : vector<2x8x96xbf16> to vector<2x8x8xbf16>
    %87 = vector.extract_strided_slice %49 {offsets = [0, 0, 48], sizes = [2, 8, 8], strides = [1, 1, 1]} : vector<2x8x96xbf16> to vector<2x8x8xbf16>
    %88 = vector.extract_strided_slice %49 {offsets = [0, 0, 80], sizes = [2, 8, 8], strides = [1, 1, 1]} : vector<2x8x96xbf16> to vector<2x8x8xbf16>
    "tpu.trace_start"() <{level = 10 : i32, message = "bqd,bkd->bqk"}> : () -> ()
    %cst_33 = arith.constant dense<0.000000e+00> : vector<2x8x8xf32>
    %89 = tpu.matmul %86, %87, %cst_33 {dimension_numbers = #tpu.dot_dimension_numbers<[2], [2], [1], [1], [0, 0, 0, 1, 1, 1], [0], [0]>} : vector<2x8x8xbf16>, vector<2x8x8xbf16>, vector<2x8x8xf32> -> vector<2x8x8xf32>
    "tpu.trace_stop"() : () -> ()
    %90 = vector.broadcast %5 : vector<1x1x8xf32> to vector<2x8x8xf32>
    %91 = arith.addf %89, %90 : vector<2x8x8xf32>
    %cst_34 = arith.constant dense<0xFF800000> : vector<2x8xf32>
    %92 = vector.multi_reduction <maximumf>, %91, %cst_34 [2] : vector<2x8x8xf32> to vector<2x8xf32>
    %93 = vector.shape_cast %92 : vector<2x8xf32> to vector<2x8x1xf32>
    %94 = vector.broadcast %93 : vector<2x8x1xf32> to vector<2x8x8xf32>
    %95 = arith.subf %91, %94 : vector<2x8x8xf32>
    %96 = math.exp %95 : vector<2x8x8xf32>
    %cst_35 = arith.constant dense<0.000000e+00> : vector<2x8xf32>
    %97 = vector.multi_reduction <add>, %96, %cst_35 [2] : vector<2x8x8xf32> to vector<2x8xf32>
    %98 = vector.shape_cast %97 : vector<2x8xf32> to vector<2x8x1xf32>
    %99 = tpu.reciprocal %98 {approx = true} : vector<2x8x1xf32> -> vector<2x8x1xf32>
    %100 = vector.broadcast %99 : vector<2x8x1xf32> to vector<2x8x8xf32>
    %101 = arith.mulf %96, %100 : vector<2x8x8xf32>
    %102 = arith.truncf %101 : vector<2x8x8xf32> to vector<2x8x8xbf16>
    "tpu.trace_start"() <{level = 10 : i32, message = "bqk,bkd->bqd"}> : () -> ()
    %cst_36 = arith.constant dense<0.000000e+00> : vector<2x8x8xf32>
    %103 = tpu.matmul %102, %88, %cst_36 {dimension_numbers = #tpu.dot_dimension_numbers<[2], [1], [1], [2], [0, 0, 0, 1, 1, 2], [0], [0]>} : vector<2x8x8xbf16>, vector<2x8x8xbf16>, vector<2x8x8xf32> -> vector<2x8x8xf32>
    "tpu.trace_stop"() : () -> ()
    %104 = vector.extract_strided_slice %49 {offsets = [0, 0, 24], sizes = [2, 8, 8], strides = [1, 1, 1]} : vector<2x8x96xbf16> to vector<2x8x8xbf16>
    %105 = vector.extract_strided_slice %49 {offsets = [0, 0, 56], sizes = [2, 8, 8], strides = [1, 1, 1]} : vector<2x8x96xbf16> to vector<2x8x8xbf16>
    %106 = vector.extract_strided_slice %49 {offsets = [0, 0, 88], sizes = [2, 8, 8], strides = [1, 1, 1]} : vector<2x8x96xbf16> to vector<2x8x8xbf16>
    "tpu.trace_start"() <{level = 10 : i32, message = "bqd,bkd->bqk"}> : () -> ()
    %cst_37 = arith.constant dense<0.000000e+00> : vector<2x8x8xf32>
    %107 = tpu.matmul %104, %105, %cst_37 {dimension_numbers = #tpu.dot_dimension_numbers<[2], [2], [1], [1], [0, 0, 0, 1, 1, 1], [0], [0]>} : vector<2x8x8xbf16>, vector<2x8x8xbf16>, vector<2x8x8xf32> -> vector<2x8x8xf32>
    "tpu.trace_stop"() : () -> ()
    %108 = vector.broadcast %5 : vector<1x1x8xf32> to vector<2x8x8xf32>
    %109 = arith.addf %107, %108 : vector<2x8x8xf32>
    %cst_38 = arith.constant dense<0xFF800000> : vector<2x8xf32>
    %110 = vector.multi_reduction <maximumf>, %109, %cst_38 [2] : vector<2x8x8xf32> to vector<2x8xf32>
    %111 = vector.shape_cast %110 : vector<2x8xf32> to vector<2x8x1xf32>
    %112 = vector.broadcast %111 : vector<2x8x1xf32> to vector<2x8x8xf32>
    %113 = arith.subf %109, %112 : vector<2x8x8xf32>
    %114 = math.exp %113 : vector<2x8x8xf32>
    %cst_39 = arith.constant dense<0.000000e+00> : vector<2x8xf32>
    %115 = vector.multi_reduction <add>, %114, %cst_39 [2] : vector<2x8x8xf32> to vector<2x8xf32>
    %116 = vector.shape_cast %115 : vector<2x8xf32> to vector<2x8x1xf32>
    %117 = tpu.reciprocal %116 {approx = true} : vector<2x8x1xf32> -> vector<2x8x1xf32>
    %118 = vector.broadcast %117 : vector<2x8x1xf32> to vector<2x8x8xf32>
    %119 = arith.mulf %114, %118 : vector<2x8x8xf32>
    %120 = arith.truncf %119 : vector<2x8x8xf32> to vector<2x8x8xbf16>
    "tpu.trace_start"() <{level = 10 : i32, message = "bqk,bkd->bqd"}> : () -> ()
    %cst_40 = arith.constant dense<0.000000e+00> : vector<2x8x8xf32>
    %121 = tpu.matmul %120, %106, %cst_40 {dimension_numbers = #tpu.dot_dimension_numbers<[2], [1], [1], [2], [0, 0, 0, 1, 1, 2], [0], [0]>} : vector<2x8x8xbf16>, vector<2x8x8xbf16>, vector<2x8x8xf32> -> vector<2x8x8xf32>
    "tpu.trace_stop"() : () -> ()
    %122 = tpu.concatenate %67, %85, %103, %121 in 2 : vector<2x8x8xf32>, vector<2x8x8xf32>, vector<2x8x8xf32>, vector<2x8x8xf32> -> vector<2x8x32xf32>
    %123 = vector.shape_cast %122 : vector<2x8x32xf32> to vector<16x32xf32>
    %124 = arith.truncf %123 : vector<16x32xf32> to vector<16x32xbf16>
    %c0_41 = arith.constant 0 : index
    %c0_42 = arith.constant 0 : index
    %c0_43 = arith.constant 0 : index
    %125 = vector.load %arg8[%c0_41, %c0_42, %c0_43] : memref<2x32x32xbf16, #tpu.memory_space<vmem>>, vector<1x32x32xbf16>
    %126 = vector.shape_cast %125 : vector<1x32x32xbf16> to vector<32x32xbf16>
    %cst_44 = arith.constant dense<0.000000e+00> : vector<16x32xf32>
    %127 = tpu.matmul %124, %126, %cst_44 {dimension_numbers = #tpu.dot_dimension_numbers<[1], [0], [0], [1], [0, 0, 1, 1], [], []>} : vector<16x32xbf16>, vector<32x32xbf16>, vector<16x32xf32> -> vector<16x32xf32>
    %128 = arith.addf %15, %127 : vector<16x32xf32>
    %c0_45 = arith.constant 0 : index
    %c0_46 = arith.constant 0 : index
    %c0_47 = arith.constant 0 : index
    %129 = vector.load %arg9[%c0_45, %c0_46, %c0_47] : memref<2x1x32xf32, #tpu.memory_space<vmem>>, vector<1x1x32xf32>
    %130 = vector.shape_cast %129 : vector<1x1x32xf32> to vector<1x32xf32>
    %131 = vector.broadcast %130 : vector<1x32xf32> to vector<16x32xf32>
    %132 = arith.addf %128, %131 : vector<16x32xf32>
    %c0_48 = arith.constant 0 : index
    %c0_49 = arith.constant 0 : index
    %c0_50 = arith.constant 0 : index
    %133 = vector.load %arg10[%c0_48, %c0_49, %c0_50] : memref<2x1x32xf32, #tpu.memory_space<vmem>>, vector<1x1x32xf32>
    %134 = vector.shape_cast %133 : vector<1x1x32xf32> to vector<1x32xf32>
    %c0_51 = arith.constant 0 : index
    %c0_52 = arith.constant 0 : index
    %c0_53 = arith.constant 0 : index
    %135 = vector.load %arg11[%c0_51, %c0_52, %c0_53] : memref<2x1x32xf32, #tpu.memory_space<vmem>>, vector<1x1x32xf32>
    %136 = vector.shape_cast %135 : vector<1x1x32xf32> to vector<1x32xf32>
    %cst_54 = arith.constant dense<0.000000e+00> : vector<16xf32>
    %137 = vector.multi_reduction <add>, %132, %cst_54 [1] : vector<16x32xf32> to vector<16xf32>
    %138 = vector.shape_cast %137 : vector<16xf32> to vector<16x1xf32>
    %cst_55 = arith.constant 3.200000e+01 : f32
    %139 = vector.broadcast %cst_55 : f32 to vector<16x1xf32>
    %140 = arith.divf %138, %139 : vector<16x1xf32>
    %141 = vector.broadcast %140 : vector<16x1xf32> to vector<16x32xf32>
    %142 = arith.subf %132, %141 : vector<16x32xf32>
    %143 = arith.mulf %142, %142 : vector<16x32xf32>
    %cst_56 = arith.constant dense<0.000000e+00> : vector<16xf32>
    %144 = vector.multi_reduction <add>, %143, %cst_56 [1] : vector<16x32xf32> to vector<16xf32>
    %145 = vector.shape_cast %144 : vector<16xf32> to vector<16x1xf32>
    %cst_57 = arith.constant 3.200000e+01 : f32
    %146 = vector.broadcast %cst_57 : f32 to vector<16x1xf32>
    %147 = arith.divf %145, %146 : vector<16x1xf32>
    %cst_58 = arith.constant 9.99999997E-7 : f32
    %148 = vector.broadcast %cst_58 : f32 to vector<16x1xf32>
    %149 = arith.addf %147, %148 : vector<16x1xf32>
    %150 = math.rsqrt %149 : vector<16x1xf32>
    %151 = vector.broadcast %150 : vector<16x1xf32> to vector<16x32xf32>
    %152 = arith.mulf %142, %151 : vector<16x32xf32>
    %153 = vector.broadcast %134 : vector<1x32xf32> to vector<16x32xf32>
    %154 = arith.mulf %152, %153 : vector<16x32xf32>
    %155 = vector.broadcast %136 : vector<1x32xf32> to vector<16x32xf32>
    %156 = arith.addf %154, %155 : vector<16x32xf32>
    %157 = arith.truncf %156 : vector<16x32xf32> to vector<16x32xbf16>
    %c0_59 = arith.constant 0 : index
    %c0_60 = arith.constant 0 : index
    %c0_61 = arith.constant 0 : index
    %158 = vector.load %arg12[%c0_59, %c0_60, %c0_61] : memref<2x32x64xbf16, #tpu.memory_space<vmem>>, vector<1x32x64xbf16>
    %159 = vector.shape_cast %158 : vector<1x32x64xbf16> to vector<32x64xbf16>
    %cst_62 = arith.constant dense<0.000000e+00> : vector<16x64xf32>
    %160 = tpu.matmul %157, %159, %cst_62 {dimension_numbers = #tpu.dot_dimension_numbers<[1], [0], [0], [1], [0, 0, 1, 1], [], []>} : vector<16x32xbf16>, vector<32x64xbf16>, vector<16x64xf32> -> vector<16x64xf32>
    %c0_63 = arith.constant 0 : index
    %c0_64 = arith.constant 0 : index
    %c0_65 = arith.constant 0 : index
    %161 = vector.load %arg13[%c0_63, %c0_64, %c0_65] : memref<2x1x64xf32, #tpu.memory_space<vmem>>, vector<1x1x64xf32>
    %162 = vector.shape_cast %161 : vector<1x1x64xf32> to vector<1x64xf32>
    %163 = vector.broadcast %162 : vector<1x64xf32> to vector<16x64xf32>
    %164 = arith.addf %160, %163 : vector<16x64xf32>
    %cst_66 = arith.constant 5.000000e-01 : f32
    %165 = vector.broadcast %cst_66 : f32 to vector<16x64xf32>
    %166 = arith.mulf %165, %164 : vector<16x64xf32>
    %cst_67 = arith.constant 4.471500e-02 : f32
    %167 = vector.broadcast %cst_67 : f32 to vector<16x64xf32>
    %168 = arith.mulf %167, %164 : vector<16x64xf32>
    %169 = arith.mulf %168, %164 : vector<16x64xf32>
    %170 = arith.mulf %169, %164 : vector<16x64xf32>
    %171 = arith.addf %164, %170 : vector<16x64xf32>
    %cst_68 = arith.constant 0.797884583 : f32
    %172 = vector.broadcast %cst_68 : f32 to vector<16x64xf32>
    %173 = arith.mulf %172, %171 : vector<16x64xf32>
    %174 = math.tanh %173 : vector<16x64xf32>
    %cst_69 = arith.constant 1.000000e+00 : f32
    %175 = vector.broadcast %cst_69 : f32 to vector<16x64xf32>
    %176 = arith.addf %175, %174 : vector<16x64xf32>
    %177 = arith.mulf %166, %176 : vector<16x64xf32>
    %178 = arith.truncf %177 : vector<16x64xf32> to vector<16x64xbf16>
    %c0_70 = arith.constant 0 : index
    %c0_71 = arith.constant 0 : index
    %c0_72 = arith.constant 0 : index
    %179 = vector.load %arg14[%c0_70, %c0_71, %c0_72] : memref<2x64x32xbf16, #tpu.memory_space<vmem>>, vector<1x64x32xbf16>
    %180 = vector.shape_cast %179 : vector<1x64x32xbf16> to vector<64x32xbf16>
    %cst_73 = arith.constant dense<0.000000e+00> : vector<16x32xf32>
    %181 = tpu.matmul %178, %180, %cst_73 {dimension_numbers = #tpu.dot_dimension_numbers<[1], [0], [0], [1], [0, 0, 1, 1], [], []>} : vector<16x64xbf16>, vector<64x32xbf16>, vector<16x32xf32> -> vector<16x32xf32>
    %182 = arith.addf %132, %181 : vector<16x32xf32>
    %c0_74 = arith.constant 0 : index
    %c0_75 = arith.constant 0 : index
    %c0_76 = arith.constant 0 : index
    %183 = vector.load %arg15[%c0_74, %c0_75, %c0_76] : memref<2x1x32xf32, #tpu.memory_space<vmem>>, vector<1x1x32xf32>
    %184 = vector.shape_cast %183 : vector<1x1x32xf32> to vector<1x32xf32>
    %185 = vector.broadcast %184 : vector<1x32xf32> to vector<16x32xf32>
    %186 = arith.addf %182, %185 : vector<16x32xf32>
    %c1 = arith.constant 1 : index
    %c0_77 = arith.constant 0 : index
    %c0_78 = arith.constant 0 : index
    %187 = vector.load %arg4[%c1, %c0_77, %c0_78] : memref<2x1x32xf32, #tpu.memory_space<vmem>>, vector<1x1x32xf32>
    %188 = vector.shape_cast %187 : vector<1x1x32xf32> to vector<1x32xf32>
    %c1_79 = arith.constant 1 : index
    %c0_80 = arith.constant 0 : index
    %c0_81 = arith.constant 0 : index
    %189 = vector.load %arg5[%c1_79, %c0_80, %c0_81] : memref<2x1x32xf32, #tpu.memory_space<vmem>>, vector<1x1x32xf32>
    %190 = vector.shape_cast %189 : vector<1x1x32xf32> to vector<1x32xf32>
    %cst_82 = arith.constant dense<0.000000e+00> : vector<16xf32>
    %191 = vector.multi_reduction <add>, %186, %cst_82 [1] : vector<16x32xf32> to vector<16xf32>
    %192 = vector.shape_cast %191 : vector<16xf32> to vector<16x1xf32>
    %cst_83 = arith.constant 3.200000e+01 : f32
    %193 = vector.broadcast %cst_83 : f32 to vector<16x1xf32>
    %194 = arith.divf %192, %193 : vector<16x1xf32>
    %195 = vector.broadcast %194 : vector<16x1xf32> to vector<16x32xf32>
    %196 = arith.subf %186, %195 : vector<16x32xf32>
    %197 = arith.mulf %196, %196 : vector<16x32xf32>
    %cst_84 = arith.constant dense<0.000000e+00> : vector<16xf32>
    %198 = vector.multi_reduction <add>, %197, %cst_84 [1] : vector<16x32xf32> to vector<16xf32>
    %199 = vector.shape_cast %198 : vector<16xf32> to vector<16x1xf32>
    %cst_85 = arith.constant 3.200000e+01 : f32
    %200 = vector.broadcast %cst_85 : f32 to vector<16x1xf32>
    %201 = arith.divf %199, %200 : vector<16x1xf32>
    %cst_86 = arith.constant 9.99999997E-7 : f32
    %202 = vector.broadcast %cst_86 : f32 to vector<16x1xf32>
    %203 = arith.addf %201, %202 : vector<16x1xf32>
    %204 = math.rsqrt %203 : vector<16x1xf32>
    %205 = vector.broadcast %204 : vector<16x1xf32> to vector<16x32xf32>
    %206 = arith.mulf %196, %205 : vector<16x32xf32>
    %207 = vector.broadcast %188 : vector<1x32xf32> to vector<16x32xf32>
    %208 = arith.mulf %206, %207 : vector<16x32xf32>
    %209 = vector.broadcast %190 : vector<1x32xf32> to vector<16x32xf32>
    %210 = arith.addf %208, %209 : vector<16x32xf32>
    %211 = arith.truncf %210 : vector<16x32xf32> to vector<16x32xbf16>
    %c1_87 = arith.constant 1 : index
    %c0_88 = arith.constant 0 : index
    %c0_89 = arith.constant 0 : index
    %212 = vector.load %arg6[%c1_87, %c0_88, %c0_89] : memref<2x32x96xbf16, #tpu.memory_space<vmem>>, vector<1x32x96xbf16>
    %213 = vector.shape_cast %212 : vector<1x32x96xbf16> to vector<32x96xbf16>
    %cst_90 = arith.constant dense<0.000000e+00> : vector<16x96xf32>
    %214 = tpu.matmul %211, %213, %cst_90 {dimension_numbers = #tpu.dot_dimension_numbers<[1], [0], [0], [1], [0, 0, 1, 1], [], []>} : vector<16x32xbf16>, vector<32x96xbf16>, vector<16x96xf32> -> vector<16x96xf32>
    %c1_91 = arith.constant 1 : index
    %c0_92 = arith.constant 0 : index
    %c0_93 = arith.constant 0 : index
    %215 = vector.load %arg7[%c1_91, %c0_92, %c0_93] : memref<2x1x96xf32, #tpu.memory_space<vmem>>, vector<1x1x96xf32>
    %216 = vector.shape_cast %215 : vector<1x1x96xf32> to vector<1x96xf32>
    %217 = vector.broadcast %216 : vector<1x96xf32> to vector<16x96xf32>
    %218 = arith.addf %214, %217 : vector<16x96xf32>
    %219 = vector.shape_cast %218 : vector<16x96xf32> to vector<2x8x96xf32>
    %220 = arith.truncf %219 : vector<2x8x96xf32> to vector<2x8x96xbf16>
    %221 = vector.extract_strided_slice %220 {offsets = [0, 0, 0], sizes = [2, 8, 8], strides = [1, 1, 1]} : vector<2x8x96xbf16> to vector<2x8x8xbf16>
    %222 = vector.extract_strided_slice %220 {offsets = [0, 0, 32], sizes = [2, 8, 8], strides = [1, 1, 1]} : vector<2x8x96xbf16> to vector<2x8x8xbf16>
    %223 = vector.extract_strided_slice %220 {offsets = [0, 0, 64], sizes = [2, 8, 8], strides = [1, 1, 1]} : vector<2x8x96xbf16> to vector<2x8x8xbf16>
    "tpu.trace_start"() <{level = 10 : i32, message = "bqd,bkd->bqk"}> : () -> ()
    %cst_94 = arith.constant dense<0.000000e+00> : vector<2x8x8xf32>
    %224 = tpu.matmul %221, %222, %cst_94 {dimension_numbers = #tpu.dot_dimension_numbers<[2], [2], [1], [1], [0, 0, 0, 1, 1, 1], [0], [0]>} : vector<2x8x8xbf16>, vector<2x8x8xbf16>, vector<2x8x8xf32> -> vector<2x8x8xf32>
    "tpu.trace_stop"() : () -> ()
    %225 = vector.broadcast %5 : vector<1x1x8xf32> to vector<2x8x8xf32>
    %226 = arith.addf %224, %225 : vector<2x8x8xf32>
    %cst_95 = arith.constant dense<0xFF800000> : vector<2x8xf32>
    %227 = vector.multi_reduction <maximumf>, %226, %cst_95 [2] : vector<2x8x8xf32> to vector<2x8xf32>
    %228 = vector.shape_cast %227 : vector<2x8xf32> to vector<2x8x1xf32>
    %229 = vector.broadcast %228 : vector<2x8x1xf32> to vector<2x8x8xf32>
    %230 = arith.subf %226, %229 : vector<2x8x8xf32>
    %231 = math.exp %230 : vector<2x8x8xf32>
    %cst_96 = arith.constant dense<0.000000e+00> : vector<2x8xf32>
    %232 = vector.multi_reduction <add>, %231, %cst_96 [2] : vector<2x8x8xf32> to vector<2x8xf32>
    %233 = vector.shape_cast %232 : vector<2x8xf32> to vector<2x8x1xf32>
    %234 = tpu.reciprocal %233 {approx = true} : vector<2x8x1xf32> -> vector<2x8x1xf32>
    %235 = vector.broadcast %234 : vector<2x8x1xf32> to vector<2x8x8xf32>
    %236 = arith.mulf %231, %235 : vector<2x8x8xf32>
    %237 = arith.truncf %236 : vector<2x8x8xf32> to vector<2x8x8xbf16>
    "tpu.trace_start"() <{level = 10 : i32, message = "bqk,bkd->bqd"}> : () -> ()
    %cst_97 = arith.constant dense<0.000000e+00> : vector<2x8x8xf32>
    %238 = tpu.matmul %237, %223, %cst_97 {dimension_numbers = #tpu.dot_dimension_numbers<[2], [1], [1], [2], [0, 0, 0, 1, 1, 2], [0], [0]>} : vector<2x8x8xbf16>, vector<2x8x8xbf16>, vector<2x8x8xf32> -> vector<2x8x8xf32>
    "tpu.trace_stop"() : () -> ()
    %239 = vector.extract_strided_slice %220 {offsets = [0, 0, 8], sizes = [2, 8, 8], strides = [1, 1, 1]} : vector<2x8x96xbf16> to vector<2x8x8xbf16>
    %240 = vector.extract_strided_slice %220 {offsets = [0, 0, 40], sizes = [2, 8, 8], strides = [1, 1, 1]} : vector<2x8x96xbf16> to vector<2x8x8xbf16>
    %241 = vector.extract_strided_slice %220 {offsets = [0, 0, 72], sizes = [2, 8, 8], strides = [1, 1, 1]} : vector<2x8x96xbf16> to vector<2x8x8xbf16>
    "tpu.trace_start"() <{level = 10 : i32, message = "bqd,bkd->bqk"}> : () -> ()
    %cst_98 = arith.constant dense<0.000000e+00> : vector<2x8x8xf32>
    %242 = tpu.matmul %239, %240, %cst_98 {dimension_numbers = #tpu.dot_dimension_numbers<[2], [2], [1], [1], [0, 0, 0, 1, 1, 1], [0], [0]>} : vector<2x8x8xbf16>, vector<2x8x8xbf16>, vector<2x8x8xf32> -> vector<2x8x8xf32>
    "tpu.trace_stop"() : () -> ()
    %243 = vector.broadcast %5 : vector<1x1x8xf32> to vector<2x8x8xf32>
    %244 = arith.addf %242, %243 : vector<2x8x8xf32>
    %cst_99 = arith.constant dense<0xFF800000> : vector<2x8xf32>
    %245 = vector.multi_reduction <maximumf>, %244, %cst_99 [2] : vector<2x8x8xf32> to vector<2x8xf32>
    %246 = vector.shape_cast %245 : vector<2x8xf32> to vector<2x8x1xf32>
    %247 = vector.broadcast %246 : vector<2x8x1xf32> to vector<2x8x8xf32>
    %248 = arith.subf %244, %247 : vector<2x8x8xf32>
    %249 = math.exp %248 : vector<2x8x8xf32>
    %cst_100 = arith.constant dense<0.000000e+00> : vector<2x8xf32>
    %250 = vector.multi_reduction <add>, %249, %cst_100 [2] : vector<2x8x8xf32> to vector<2x8xf32>
    %251 = vector.shape_cast %250 : vector<2x8xf32> to vector<2x8x1xf32>
    %252 = tpu.reciprocal %251 {approx = true} : vector<2x8x1xf32> -> vector<2x8x1xf32>
    %253 = vector.broadcast %252 : vector<2x8x1xf32> to vector<2x8x8xf32>
    %254 = arith.mulf %249, %253 : vector<2x8x8xf32>
    %255 = arith.truncf %254 : vector<2x8x8xf32> to vector<2x8x8xbf16>
    "tpu.trace_start"() <{level = 10 : i32, message = "bqk,bkd->bqd"}> : () -> ()
    %cst_101 = arith.constant dense<0.000000e+00> : vector<2x8x8xf32>
    %256 = tpu.matmul %255, %241, %cst_101 {dimension_numbers = #tpu.dot_dimension_numbers<[2], [1], [1], [2], [0, 0, 0, 1, 1, 2], [0], [0]>} : vector<2x8x8xbf16>, vector<2x8x8xbf16>, vector<2x8x8xf32> -> vector<2x8x8xf32>
    "tpu.trace_stop"() : () -> ()
    %257 = vector.extract_strided_slice %220 {offsets = [0, 0, 16], sizes = [2, 8, 8], strides = [1, 1, 1]} : vector<2x8x96xbf16> to vector<2x8x8xbf16>
    %258 = vector.extract_strided_slice %220 {offsets = [0, 0, 48], sizes = [2, 8, 8], strides = [1, 1, 1]} : vector<2x8x96xbf16> to vector<2x8x8xbf16>
    %259 = vector.extract_strided_slice %220 {offsets = [0, 0, 80], sizes = [2, 8, 8], strides = [1, 1, 1]} : vector<2x8x96xbf16> to vector<2x8x8xbf16>
    "tpu.trace_start"() <{level = 10 : i32, message = "bqd,bkd->bqk"}> : () -> ()
    %cst_102 = arith.constant dense<0.000000e+00> : vector<2x8x8xf32>
    %260 = tpu.matmul %257, %258, %cst_102 {dimension_numbers = #tpu.dot_dimension_numbers<[2], [2], [1], [1], [0, 0, 0, 1, 1, 1], [0], [0]>} : vector<2x8x8xbf16>, vector<2x8x8xbf16>, vector<2x8x8xf32> -> vector<2x8x8xf32>
    "tpu.trace_stop"() : () -> ()
    %261 = vector.broadcast %5 : vector<1x1x8xf32> to vector<2x8x8xf32>
    %262 = arith.addf %260, %261 : vector<2x8x8xf32>
    %cst_103 = arith.constant dense<0xFF800000> : vector<2x8xf32>
    %263 = vector.multi_reduction <maximumf>, %262, %cst_103 [2] : vector<2x8x8xf32> to vector<2x8xf32>
    %264 = vector.shape_cast %263 : vector<2x8xf32> to vector<2x8x1xf32>
    %265 = vector.broadcast %264 : vector<2x8x1xf32> to vector<2x8x8xf32>
    %266 = arith.subf %262, %265 : vector<2x8x8xf32>
    %267 = math.exp %266 : vector<2x8x8xf32>
    %cst_104 = arith.constant dense<0.000000e+00> : vector<2x8xf32>
    %268 = vector.multi_reduction <add>, %267, %cst_104 [2] : vector<2x8x8xf32> to vector<2x8xf32>
    %269 = vector.shape_cast %268 : vector<2x8xf32> to vector<2x8x1xf32>
    %270 = tpu.reciprocal %269 {approx = true} : vector<2x8x1xf32> -> vector<2x8x1xf32>
    %271 = vector.broadcast %270 : vector<2x8x1xf32> to vector<2x8x8xf32>
    %272 = arith.mulf %267, %271 : vector<2x8x8xf32>
    %273 = arith.truncf %272 : vector<2x8x8xf32> to vector<2x8x8xbf16>
    "tpu.trace_start"() <{level = 10 : i32, message = "bqk,bkd->bqd"}> : () -> ()
    %cst_105 = arith.constant dense<0.000000e+00> : vector<2x8x8xf32>
    %274 = tpu.matmul %273, %259, %cst_105 {dimension_numbers = #tpu.dot_dimension_numbers<[2], [1], [1], [2], [0, 0, 0, 1, 1, 2], [0], [0]>} : vector<2x8x8xbf16>, vector<2x8x8xbf16>, vector<2x8x8xf32> -> vector<2x8x8xf32>
    "tpu.trace_stop"() : () -> ()
    %275 = vector.extract_strided_slice %220 {offsets = [0, 0, 24], sizes = [2, 8, 8], strides = [1, 1, 1]} : vector<2x8x96xbf16> to vector<2x8x8xbf16>
    %276 = vector.extract_strided_slice %220 {offsets = [0, 0, 56], sizes = [2, 8, 8], strides = [1, 1, 1]} : vector<2x8x96xbf16> to vector<2x8x8xbf16>
    %277 = vector.extract_strided_slice %220 {offsets = [0, 0, 88], sizes = [2, 8, 8], strides = [1, 1, 1]} : vector<2x8x96xbf16> to vector<2x8x8xbf16>
    "tpu.trace_start"() <{level = 10 : i32, message = "bqd,bkd->bqk"}> : () -> ()
    %cst_106 = arith.constant dense<0.000000e+00> : vector<2x8x8xf32>
    %278 = tpu.matmul %275, %276, %cst_106 {dimension_numbers = #tpu.dot_dimension_numbers<[2], [2], [1], [1], [0, 0, 0, 1, 1, 1], [0], [0]>} : vector<2x8x8xbf16>, vector<2x8x8xbf16>, vector<2x8x8xf32> -> vector<2x8x8xf32>
    "tpu.trace_stop"() : () -> ()
    %279 = vector.broadcast %5 : vector<1x1x8xf32> to vector<2x8x8xf32>
    %280 = arith.addf %278, %279 : vector<2x8x8xf32>
    %cst_107 = arith.constant dense<0xFF800000> : vector<2x8xf32>
    %281 = vector.multi_reduction <maximumf>, %280, %cst_107 [2] : vector<2x8x8xf32> to vector<2x8xf32>
    %282 = vector.shape_cast %281 : vector<2x8xf32> to vector<2x8x1xf32>
    %283 = vector.broadcast %282 : vector<2x8x1xf32> to vector<2x8x8xf32>
    %284 = arith.subf %280, %283 : vector<2x8x8xf32>
    %285 = math.exp %284 : vector<2x8x8xf32>
    %cst_108 = arith.constant dense<0.000000e+00> : vector<2x8xf32>
    %286 = vector.multi_reduction <add>, %285, %cst_108 [2] : vector<2x8x8xf32> to vector<2x8xf32>
    %287 = vector.shape_cast %286 : vector<2x8xf32> to vector<2x8x1xf32>
    %288 = tpu.reciprocal %287 {approx = true} : vector<2x8x1xf32> -> vector<2x8x1xf32>
    %289 = vector.broadcast %288 : vector<2x8x1xf32> to vector<2x8x8xf32>
    %290 = arith.mulf %285, %289 : vector<2x8x8xf32>
    %291 = arith.truncf %290 : vector<2x8x8xf32> to vector<2x8x8xbf16>
    "tpu.trace_start"() <{level = 10 : i32, message = "bqk,bkd->bqd"}> : () -> ()
    %cst_109 = arith.constant dense<0.000000e+00> : vector<2x8x8xf32>
    %292 = tpu.matmul %291, %277, %cst_109 {dimension_numbers = #tpu.dot_dimension_numbers<[2], [1], [1], [2], [0, 0, 0, 1, 1, 2], [0], [0]>} : vector<2x8x8xbf16>, vector<2x8x8xbf16>, vector<2x8x8xf32> -> vector<2x8x8xf32>
    "tpu.trace_stop"() : () -> ()
    %293 = tpu.concatenate %238, %256, %274, %292 in 2 : vector<2x8x8xf32>, vector<2x8x8xf32>, vector<2x8x8xf32>, vector<2x8x8xf32> -> vector<2x8x32xf32>
    %294 = vector.shape_cast %293 : vector<2x8x32xf32> to vector<16x32xf32>
    %295 = arith.truncf %294 : vector<16x32xf32> to vector<16x32xbf16>
    %c1_110 = arith.constant 1 : index
    %c0_111 = arith.constant 0 : index
    %c0_112 = arith.constant 0 : index
    %296 = vector.load %arg8[%c1_110, %c0_111, %c0_112] : memref<2x32x32xbf16, #tpu.memory_space<vmem>>, vector<1x32x32xbf16>
    %297 = vector.shape_cast %296 : vector<1x32x32xbf16> to vector<32x32xbf16>
    %cst_113 = arith.constant dense<0.000000e+00> : vector<16x32xf32>
    %298 = tpu.matmul %295, %297, %cst_113 {dimension_numbers = #tpu.dot_dimension_numbers<[1], [0], [0], [1], [0, 0, 1, 1], [], []>} : vector<16x32xbf16>, vector<32x32xbf16>, vector<16x32xf32> -> vector<16x32xf32>
    %299 = arith.addf %186, %298 : vector<16x32xf32>
    %c1_114 = arith.constant 1 : index
    %c0_115 = arith.constant 0 : index
    %c0_116 = arith.constant 0 : index
    %300 = vector.load %arg9[%c1_114, %c0_115, %c0_116] : memref<2x1x32xf32, #tpu.memory_space<vmem>>, vector<1x1x32xf32>
    %301 = vector.shape_cast %300 : vector<1x1x32xf32> to vector<1x32xf32>
    %302 = vector.broadcast %301 : vector<1x32xf32> to vector<16x32xf32>
    %303 = arith.addf %299, %302 : vector<16x32xf32>
    %c1_117 = arith.constant 1 : index
    %c0_118 = arith.constant 0 : index
    %c0_119 = arith.constant 0 : index
    %304 = vector.load %arg10[%c1_117, %c0_118, %c0_119] : memref<2x1x32xf32, #tpu.memory_space<vmem>>, vector<1x1x32xf32>
    %305 = vector.shape_cast %304 : vector<1x1x32xf32> to vector<1x32xf32>
    %c1_120 = arith.constant 1 : index
    %c0_121 = arith.constant 0 : index
    %c0_122 = arith.constant 0 : index
    %306 = vector.load %arg11[%c1_120, %c0_121, %c0_122] : memref<2x1x32xf32, #tpu.memory_space<vmem>>, vector<1x1x32xf32>
    %307 = vector.shape_cast %306 : vector<1x1x32xf32> to vector<1x32xf32>
    %cst_123 = arith.constant dense<0.000000e+00> : vector<16xf32>
    %308 = vector.multi_reduction <add>, %303, %cst_123 [1] : vector<16x32xf32> to vector<16xf32>
    %309 = vector.shape_cast %308 : vector<16xf32> to vector<16x1xf32>
    %cst_124 = arith.constant 3.200000e+01 : f32
    %310 = vector.broadcast %cst_124 : f32 to vector<16x1xf32>
    %311 = arith.divf %309, %310 : vector<16x1xf32>
    %312 = vector.broadcast %311 : vector<16x1xf32> to vector<16x32xf32>
    %313 = arith.subf %303, %312 : vector<16x32xf32>
    %314 = arith.mulf %313, %313 : vector<16x32xf32>
    %cst_125 = arith.constant dense<0.000000e+00> : vector<16xf32>
    %315 = vector.multi_reduction <add>, %314, %cst_125 [1] : vector<16x32xf32> to vector<16xf32>
    %316 = vector.shape_cast %315 : vector<16xf32> to vector<16x1xf32>
    %cst_126 = arith.constant 3.200000e+01 : f32
    %317 = vector.broadcast %cst_126 : f32 to vector<16x1xf32>
    %318 = arith.divf %316, %317 : vector<16x1xf32>
    %cst_127 = arith.constant 9.99999997E-7 : f32
    %319 = vector.broadcast %cst_127 : f32 to vector<16x1xf32>
    %320 = arith.addf %318, %319 : vector<16x1xf32>
    %321 = math.rsqrt %320 : vector<16x1xf32>
    %322 = vector.broadcast %321 : vector<16x1xf32> to vector<16x32xf32>
    %323 = arith.mulf %313, %322 : vector<16x32xf32>
    %324 = vector.broadcast %305 : vector<1x32xf32> to vector<16x32xf32>
    %325 = arith.mulf %323, %324 : vector<16x32xf32>
    %326 = vector.broadcast %307 : vector<1x32xf32> to vector<16x32xf32>
    %327 = arith.addf %325, %326 : vector<16x32xf32>
    %328 = arith.truncf %327 : vector<16x32xf32> to vector<16x32xbf16>
    %c1_128 = arith.constant 1 : index
    %c0_129 = arith.constant 0 : index
    %c0_130 = arith.constant 0 : index
    %329 = vector.load %arg12[%c1_128, %c0_129, %c0_130] : memref<2x32x64xbf16, #tpu.memory_space<vmem>>, vector<1x32x64xbf16>
    %330 = vector.shape_cast %329 : vector<1x32x64xbf16> to vector<32x64xbf16>
    %cst_131 = arith.constant dense<0.000000e+00> : vector<16x64xf32>
    %331 = tpu.matmul %328, %330, %cst_131 {dimension_numbers = #tpu.dot_dimension_numbers<[1], [0], [0], [1], [0, 0, 1, 1], [], []>} : vector<16x32xbf16>, vector<32x64xbf16>, vector<16x64xf32> -> vector<16x64xf32>
    %c1_132 = arith.constant 1 : index
    %c0_133 = arith.constant 0 : index
    %c0_134 = arith.constant 0 : index
    %332 = vector.load %arg13[%c1_132, %c0_133, %c0_134] : memref<2x1x64xf32, #tpu.memory_space<vmem>>, vector<1x1x64xf32>
    %333 = vector.shape_cast %332 : vector<1x1x64xf32> to vector<1x64xf32>
    %334 = vector.broadcast %333 : vector<1x64xf32> to vector<16x64xf32>
    %335 = arith.addf %331, %334 : vector<16x64xf32>
    %cst_135 = arith.constant 5.000000e-01 : f32
    %336 = vector.broadcast %cst_135 : f32 to vector<16x64xf32>
    %337 = arith.mulf %336, %335 : vector<16x64xf32>
    %cst_136 = arith.constant 4.471500e-02 : f32
    %338 = vector.broadcast %cst_136 : f32 to vector<16x64xf32>
    %339 = arith.mulf %338, %335 : vector<16x64xf32>
    %340 = arith.mulf %339, %335 : vector<16x64xf32>
    %341 = arith.mulf %340, %335 : vector<16x64xf32>
    %342 = arith.addf %335, %341 : vector<16x64xf32>
    %cst_137 = arith.constant 0.797884583 : f32
    %343 = vector.broadcast %cst_137 : f32 to vector<16x64xf32>
    %344 = arith.mulf %343, %342 : vector<16x64xf32>
    %345 = math.tanh %344 : vector<16x64xf32>
    %cst_138 = arith.constant 1.000000e+00 : f32
    %346 = vector.broadcast %cst_138 : f32 to vector<16x64xf32>
    %347 = arith.addf %346, %345 : vector<16x64xf32>
    %348 = arith.mulf %337, %347 : vector<16x64xf32>
    %349 = arith.truncf %348 : vector<16x64xf32> to vector<16x64xbf16>
    %c1_139 = arith.constant 1 : index
    %c0_140 = arith.constant 0 : index
    %c0_141 = arith.constant 0 : index
    %350 = vector.load %arg14[%c1_139, %c0_140, %c0_141] : memref<2x64x32xbf16, #tpu.memory_space<vmem>>, vector<1x64x32xbf16>
    %351 = vector.shape_cast %350 : vector<1x64x32xbf16> to vector<64x32xbf16>
    %cst_142 = arith.constant dense<0.000000e+00> : vector<16x32xf32>
    %352 = tpu.matmul %349, %351, %cst_142 {dimension_numbers = #tpu.dot_dimension_numbers<[1], [0], [0], [1], [0, 0, 1, 1], [], []>} : vector<16x64xbf16>, vector<64x32xbf16>, vector<16x32xf32> -> vector<16x32xf32>
    %353 = arith.addf %303, %352 : vector<16x32xf32>
    %c1_143 = arith.constant 1 : index
    %c0_144 = arith.constant 0 : index
    %c0_145 = arith.constant 0 : index
    %354 = vector.load %arg15[%c1_143, %c0_144, %c0_145] : memref<2x1x32xf32, #tpu.memory_space<vmem>>, vector<1x1x32xf32>
    %355 = vector.shape_cast %354 : vector<1x1x32xf32> to vector<1x32xf32>
    %356 = vector.broadcast %355 : vector<1x32xf32> to vector<16x32xf32>
    %357 = arith.addf %353, %356 : vector<16x32xf32>
    %358 = tpu.iota {dimensions = array<i32: 0>} : vector<2x16xi32>
    %359 = tpu.iota {dimensions = array<i32: 1>} : vector<2x16xi32>
    %c8_i32 = arith.constant 8 : i32
    %360 = vector.broadcast %c8_i32 : i32 to vector<2x16xi32>
    %361 = arith.muli %358, %360 : vector<2x16xi32>
    %362 = arith.cmpi eq, %359, %361 : vector<2x16xi32>
    %363 = arith.extui %362 : vector<2x16xi1> to vector<2x16xi32>
    %364 = arith.sitofp %363 : vector<2x16xi32> to vector<2x16xf32>
    %cst_146 = arith.constant dense<0.000000e+00> : vector<2x32xf32>
    %365 = tpu.matmul %364, %357, %cst_146 {dimension_numbers = #tpu.dot_dimension_numbers<[1], [0], [0], [1], [0, 0, 1, 1], [], []>} : vector<2x16xf32>, vector<16x32xf32>, vector<2x32xf32> -> vector<2x32xf32>
    %c0_147 = arith.constant 0 : index
    %c0_148 = arith.constant 0 : index
    %366 = vector.load %arg16[%c0_147, %c0_148] : memref<1x32xf32, #tpu.memory_space<vmem>>, vector<1x32xf32>
    %c0_149 = arith.constant 0 : index
    %c0_150 = arith.constant 0 : index
    %367 = vector.load %arg17[%c0_149, %c0_150] : memref<1x32xf32, #tpu.memory_space<vmem>>, vector<1x32xf32>
    %cst_151 = arith.constant dense<0.000000e+00> : vector<2xf32>
    %368 = vector.multi_reduction <add>, %365, %cst_151 [1] : vector<2x32xf32> to vector<2xf32>
    %369 = vector.shape_cast %368 : vector<2xf32> to vector<2x1xf32>
    %cst_152 = arith.constant 3.200000e+01 : f32
    %370 = vector.broadcast %cst_152 : f32 to vector<2x1xf32>
    %371 = arith.divf %369, %370 : vector<2x1xf32>
    %372 = vector.broadcast %371 : vector<2x1xf32> to vector<2x32xf32>
    %373 = arith.subf %365, %372 : vector<2x32xf32>
    %374 = arith.mulf %373, %373 : vector<2x32xf32>
    %cst_153 = arith.constant dense<0.000000e+00> : vector<2xf32>
    %375 = vector.multi_reduction <add>, %374, %cst_153 [1] : vector<2x32xf32> to vector<2xf32>
    %376 = vector.shape_cast %375 : vector<2xf32> to vector<2x1xf32>
    %cst_154 = arith.constant 3.200000e+01 : f32
    %377 = vector.broadcast %cst_154 : f32 to vector<2x1xf32>
    %378 = arith.divf %376, %377 : vector<2x1xf32>
    %cst_155 = arith.constant 9.99999997E-7 : f32
    %379 = vector.broadcast %cst_155 : f32 to vector<2x1xf32>
    %380 = arith.addf %378, %379 : vector<2x1xf32>
    %381 = math.rsqrt %380 : vector<2x1xf32>
    %382 = vector.broadcast %381 : vector<2x1xf32> to vector<2x32xf32>
    %383 = arith.mulf %373, %382 : vector<2x32xf32>
    %384 = vector.broadcast %366 : vector<1x32xf32> to vector<2x32xf32>
    %385 = arith.mulf %383, %384 : vector<2x32xf32>
    %386 = vector.broadcast %367 : vector<1x32xf32> to vector<2x32xf32>
    %387 = arith.addf %385, %386 : vector<2x32xf32>
    %388 = arith.truncf %387 : vector<2x32xf32> to vector<2x32xbf16>
    %c0_156 = arith.constant 0 : index
    %c0_157 = arith.constant 0 : index
    %389 = vector.load %arg18[%c0_156, %c0_157] : memref<32x128xbf16, #tpu.memory_space<vmem>>, vector<32x128xbf16>
    %cst_158 = arith.constant dense<0.000000e+00> : vector<2x128xf32>
    %390 = tpu.matmul %388, %389, %cst_158 {dimension_numbers = #tpu.dot_dimension_numbers<[1], [0], [0], [1], [0, 0, 1, 1], [], []>} : vector<2x32xbf16>, vector<32x128xbf16>, vector<2x128xf32> -> vector<2x128xf32>
    %c0_159 = arith.constant 0 : index
    %c0_160 = arith.constant 0 : index
    %391 = vector.load %arg19[%c0_159, %c0_160] : memref<1x128xf32, #tpu.memory_space<vmem>>, vector<1x128xf32>
    %392 = vector.broadcast %391 : vector<1x128xf32> to vector<2x128xf32>
    %393 = arith.addf %390, %392 : vector<2x128xf32>
    %c0_161 = arith.constant 0 : index
    %c0_162 = arith.constant 0 : index
    %c0_163 = arith.constant 0 : index
    %394 = vector.load %arg20[%c0_161, %c0_162, %c0_163] : memref<1x2x128xf32, #tpu.memory_space<vmem>>, vector<1x2x128xf32>
    %395 = vector.shape_cast %394 : vector<1x2x128xf32> to vector<2x128xf32>
    %396 = vector.shape_cast %393 : vector<2x128xf32> to vector<1x2x128xf32>
    tpu.vector_store %arg20[%c0_161, %c0_162, %c0_163], %396 {strides = array<i32>} : memref<1x2x128xf32, #tpu.memory_space<vmem>>, vector<1x2x128xf32>,
    return
  }
  func.func @transform_0(%arg0: i32) -> (i32, i32) {
    %c0_i32 = arith.constant 0 : i32
    %c0_i32_0 = arith.constant 0 : i32
    return %arg0, %c0_i32 : i32, i32
  }
  func.func @transform_1(%arg0: i32) -> (i32, i32) {
    %c0_i32 = arith.constant 0 : i32
    %c0_i32_0 = arith.constant 0 : i32
    %c0_i32_1 = arith.constant 0 : i32
    return %c0_i32, %c0_i32_0 : i32, i32
  }
  func.func @transform_2(%arg0: i32) -> (i32, i32) {
    %c0_i32 = arith.constant 0 : i32
    %c0_i32_0 = arith.constant 0 : i32
    %c0_i32_1 = arith.constant 0 : i32
    return %c0_i32, %c0_i32_0 : i32, i32
  }
  func.func @transform_3(%arg0: i32) -> (i32, i32, i32) {
    %c0_i32 = arith.constant 0 : i32
    %c0_i32_0 = arith.constant 0 : i32
    %c0_i32_1 = arith.constant 0 : i32
    %c0_i32_2 = arith.constant 0 : i32
    return %c0_i32, %c0_i32_0, %c0_i32_1 : i32, i32, i32
  }
  func.func @transform_4(%arg0: i32) -> (i32, i32, i32) {
    %c0_i32 = arith.constant 0 : i32
    %c0_i32_0 = arith.constant 0 : i32
    %c0_i32_1 = arith.constant 0 : i32
    %c0_i32_2 = arith.constant 0 : i32
    return %c0_i32, %c0_i32_0, %c0_i32_1 : i32, i32, i32
  }
  func.func @transform_5(%arg0: i32) -> (i32, i32, i32) {
    %c0_i32 = arith.constant 0 : i32
    %c0_i32_0 = arith.constant 0 : i32
    %c0_i32_1 = arith.constant 0 : i32
    %c0_i32_2 = arith.constant 0 : i32
    return %c0_i32, %c0_i32_0, %c0_i32_1 : i32, i32, i32
  }
  func.func @transform_6(%arg0: i32) -> (i32, i32, i32) {
    %c0_i32 = arith.constant 0 : i32
    %c0_i32_0 = arith.constant 0 : i32
    %c0_i32_1 = arith.constant 0 : i32
    %c0_i32_2 = arith.constant 0 : i32
    return %c0_i32, %c0_i32_0, %c0_i32_1 : i32, i32, i32
  }
  func.func @transform_7(%arg0: i32) -> (i32, i32, i32) {
    %c0_i32 = arith.constant 0 : i32
    %c0_i32_0 = arith.constant 0 : i32
    %c0_i32_1 = arith.constant 0 : i32
    %c0_i32_2 = arith.constant 0 : i32
    return %c0_i32, %c0_i32_0, %c0_i32_1 : i32, i32, i32
  }
  func.func @transform_8(%arg0: i32) -> (i32, i32, i32) {
    %c0_i32 = arith.constant 0 : i32
    %c0_i32_0 = arith.constant 0 : i32
    %c0_i32_1 = arith.constant 0 : i32
    %c0_i32_2 = arith.constant 0 : i32
    return %c0_i32, %c0_i32_0, %c0_i32_1 : i32, i32, i32
  }
  func.func @transform_9(%arg0: i32) -> (i32, i32, i32) {
    %c0_i32 = arith.constant 0 : i32
    %c0_i32_0 = arith.constant 0 : i32
    %c0_i32_1 = arith.constant 0 : i32
    %c0_i32_2 = arith.constant 0 : i32
    return %c0_i32, %c0_i32_0, %c0_i32_1 : i32, i32, i32
  }
  func.func @transform_10(%arg0: i32) -> (i32, i32, i32) {
    %c0_i32 = arith.constant 0 : i32
    %c0_i32_0 = arith.constant 0 : i32
    %c0_i32_1 = arith.constant 0 : i32
    %c0_i32_2 = arith.constant 0 : i32
    return %c0_i32, %c0_i32_0, %c0_i32_1 : i32, i32, i32
  }
  func.func @transform_11(%arg0: i32) -> (i32, i32, i32) {
    %c0_i32 = arith.constant 0 : i32
    %c0_i32_0 = arith.constant 0 : i32
    %c0_i32_1 = arith.constant 0 : i32
    %c0_i32_2 = arith.constant 0 : i32
    return %c0_i32, %c0_i32_0, %c0_i32_1 : i32, i32, i32
  }
  func.func @transform_12(%arg0: i32) -> (i32, i32, i32) {
    %c0_i32 = arith.constant 0 : i32
    %c0_i32_0 = arith.constant 0 : i32
    %c0_i32_1 = arith.constant 0 : i32
    %c0_i32_2 = arith.constant 0 : i32
    return %c0_i32, %c0_i32_0, %c0_i32_1 : i32, i32, i32
  }
  func.func @transform_13(%arg0: i32) -> (i32, i32, i32) {
    %c0_i32 = arith.constant 0 : i32
    %c0_i32_0 = arith.constant 0 : i32
    %c0_i32_1 = arith.constant 0 : i32
    %c0_i32_2 = arith.constant 0 : i32
    return %c0_i32, %c0_i32_0, %c0_i32_1 : i32, i32, i32
  }
  func.func @transform_14(%arg0: i32) -> (i32, i32, i32) {
    %c0_i32 = arith.constant 0 : i32
    %c0_i32_0 = arith.constant 0 : i32
    %c0_i32_1 = arith.constant 0 : i32
    %c0_i32_2 = arith.constant 0 : i32
    return %c0_i32, %c0_i32_0, %c0_i32_1 : i32, i32, i32
  }
  func.func @transform_15(%arg0: i32) -> (i32, i32) {
    %c0_i32 = arith.constant 0 : i32
    %c0_i32_0 = arith.constant 0 : i32
    %c0_i32_1 = arith.constant 0 : i32
    return %c0_i32, %c0_i32_0 : i32, i32
  }
  func.func @transform_16(%arg0: i32) -> (i32, i32) {
    %c0_i32 = arith.constant 0 : i32
    %c0_i32_0 = arith.constant 0 : i32
    %c0_i32_1 = arith.constant 0 : i32
    return %c0_i32, %c0_i32_0 : i32, i32
  }
  func.func @transform_17(%arg0: i32) -> (i32, i32) {
    %c0_i32 = arith.constant 0 : i32
    %c0_i32_0 = arith.constant 0 : i32
    %c0_i32_1 = arith.constant 0 : i32
    return %c0_i32, %c0_i32_0 : i32, i32
  }
  func.func @transform_18(%arg0: i32) -> (i32, i32) {
    %c0_i32 = arith.constant 0 : i32
    %c0_i32_0 = arith.constant 0 : i32
    %c0_i32_1 = arith.constant 0 : i32
    return %c0_i32, %c0_i32_0 : i32, i32
  }
  func.func @transform_19(%arg0: i32) -> (i32, i32, i32) {
    %c0_i32 = arith.constant 0 : i32
    %c0_i32_0 = arith.constant 0 : i32
    %c0_i32_1 = arith.constant 0 : i32
    return %arg0, %c0_i32, %c0_i32_0 : i32, i32, i32
  }
}

</mosaic_0001>

<bundles_post_ra>
// kernel: vit_forward.1
= control target key start
LH: loop header
LB: loop body
LE: loop exit
PB: predicated region body
PF: predicated region fallthrough
CT: control target
= control target key end

     0   :  { %s5179_s0 = inlined_call_operand.vmem [shape: f32[16,768], index: 0, kind: input, shape index: {}]   ;;  %s5180_s1 = inlined_call_operand.vmem [shape: f32[8,32], index: 1, kind: input, shape index: {}]   ;;  %s5181_s2 = inlined_call_operand.vmem [shape: bf16[768,32], index: 2, kind: input, shape index: {}]   ;;  %s5182_s3 = inlined_call_operand.vmem [shape: f32[2,1,32], index: 3, kind: input, shape index: {}]   ;;  %s5183_s4 = inlined_call_operand.vmem [shape: f32[2,1,32], index: 4, kind: input, shape index: {}]   ;;  %s5184_s5 = inlined_call_operand.vmem [shape: bf16[2,32,96], index: 5, kind: input, shape index: {}]   ;;  %s5185_s6 = inlined_call_operand.vmem [shape: f32[2,1,96], index: 6, kind: input, shape index: {}]   ;;  %s5186_s7 = inlined_call_operand.vmem [shape: bf16[2,32,32], index: 7, kind: input, shape index: {}]   ;;  %s5187_s8 = inlined_call_operand.vmem [shape: f32[2,1,32], index: 8, kind: input, shape index: {}]   ;;  %s5188_s9 = inlined_call_operand.vmem [shape: f32[2,1,32], index: 9, kind: input, shape index: {}]   ;;  %s5189_s10 = inlined_call_operand.vmem [shape: f32[2,1,32], index: 10, kind: input, shape index: {}]   ;;  %s5190_s11 = inlined_call_operand.vmem [shape: bf16[2,32,64], index: 11, kind: input, shape index: {}]   ;;  %s5191_s12 = inlined_call_operand.vmem [shape: f32[2,1,64], index: 12, kind: input, shape index: {}]   ;;  %s5192_s13 = inlined_call_operand.vmem [shape: bf16[2,64,32], index: 13, kind: input, shape index: {}]   ;;  %s5193_s14 = inlined_call_operand.vmem [shape: f32[2,1,32], index: 14, kind: input, shape index: {}]   ;;  %s5194_s15 = inlined_call_operand.vmem [shape: f32[1,32], index: 15, kind: input, shape index: {}]   ;;  %s5195_s16 = inlined_call_operand.vmem [shape: f32[1,32], index: 16, kind: input, shape index: {}]   ;;  %s5196_s17 = inlined_call_operand.vmem [shape: bf16[32,128], index: 17, kind: input, shape index: {}]   ;;  %s5197_s18 = inlined_call_operand.vmem [shape: f32[1,128], index: 18, kind: input, shape index: {}]   ;;  %s5198_s19 = inlined_call_operand.hbm [shape: f32[1,2,128], index: 19, kind: output, shape index: {}]  }
   0x1   :  { %5215 = sst [smem:[#allocation5_spill]] %s5179_s0 }
   0x2   :  { %5216 = sst [smem:[#allocation6_spill]] %s5180_s1 }
   0x3   :  { %5217 = sst [smem:[#allocation7_spill]] %s5181_s2 }
   0x4   :  { %5218 = sst [smem:[#allocation8_spill]] %s5182_s3 }
   0x5   :  { %s5219_s20 = sld [smem:[#allocation7_spill]]  ;;  %s5220_s26 = sld [smem:[#allocation5_spill]] }
   0xb   :  { %v4085_v0 = vld [vmem:[%s5219_s20 + $0x40] sm:$0xff]   ;;  %v4089_v4 = vld [vmem:[%s5219_s20 + $0x48] sm:$0xff]   ;;  %v4093_v8 = vld [vmem:[%s5219_s20 + $0x50] sm:$0xff]  }
   0xc   :  { %v4086_v1 = vld [vmem:[%s5219_s20 + $0xc0] sm:$0xff]   ;;  %3590 = vmatprep.subr.bf16.mxu0 %v4085_v0  ;;  %v4090_v5 = vld [vmem:[%s5219_s20 + $0xc8] sm:$0xff]   ;;  %v4094_v9 = vld [vmem:[%s5219_s20 + $0xd0] sm:$0xff]  }
   0xd   :  { %v4087_v2 = vld [vmem:[%s5219_s20] sm:$0xff]   ;;  %3612 = vmatprep.subr.bf16.mxu1 %v4086_v1  ;;  %v4091_v6 = vld [vmem:[%s5219_s20 + $0x8] sm:$0xff]   ;;  %v4095_v10 = vld [vmem:[%s5219_s20 + $0x10] sm:$0xff]  }
   0xe   :  { %v4088_v3 = vld [vmem:[%s5219_s20 + $0x80] sm:$0xff]   ;;  %3591 = vmatpush3.bf16.msra.mxu0 %v4087_v2  ;;  %v4092_v7 = vld [vmem:[%s5219_s20 + $0x88] sm:$0xff]   ;;  %v4096_v11 = vld [vmem:[%s5219_s20 + $0x90] sm:$0xff]  }
   0xf   :  { %3613 = vmatpush3.bf16.msra.mxu1 %v4088_v3  ;;  %3592 = vmatprep.subr.bf16.mxu0 %v4089_v4  ;;  %v4097_v12 = vld [vmem:[%s5219_s20 + $0x58] sm:$0xff]   ;;  %v4101_v16 = vld [vmem:[%s5219_s20 + $0x60] sm:$0xff]   ;;  %v4105_v20 = vld [vmem:[%s5219_s20 + $0x68] sm:$0xff]  }
  0x10   :  { %3614 = vmatprep.subr.bf16.mxu1 %v4090_v5  ;;  %v4098_v13 = vld [vmem:[%s5219_s20 + $0xd8] sm:$0xff]   ;;  %v4102_v17 = vld [vmem:[%s5219_s20 + $0xe0] sm:$0xff]   ;;  %v4106_v21 = vld [vmem:[%s5219_s20 + $0xe8] sm:$0xff]  }
  0x11   :  { %v4099_v14 = vld [vmem:[%s5219_s20 + $0x18] sm:$0xff]   ;;  %v4103_v18 = vld [vmem:[%s5219_s20 + $0x20] sm:$0xff]   ;;  %v4107_v22 = vld [vmem:[%s5219_s20 + $0x28] sm:$0xff]  }
  0x12   :  { %3593 = vmatpush3.bf16.msra.mxu0 %v4091_v6  ;;  %v4100_v15 = vld [vmem:[%s5219_s20 + $0x98] sm:$0xff]   ;;  %v4104_v19 = vld [vmem:[%s5219_s20 + $0xa0] sm:$0xff]   ;;  %v4108_v23 = vld [vmem:[%s5219_s20 + $0xa8] sm:$0xff]  }
  0x13   :  { %3615 = vmatpush3.bf16.msra.mxu1 %v4092_v7  ;;  %3594 = vmatprep.subr.bf16.mxu0 %v4093_v8  ;;  %v4109_v24 = vld [vmem:[%s5219_s20 + $0x70] sm:$0xff]   ;;  %v4113_v28 = vld [vmem:[%s5219_s20 + $0x78] sm:$0xff]   ;;  %v69_v32 = vld [vmem:[%s5220_s26 + $0x8] sm:$0xff] }
  0x14   :  { %3616 = vmatprep.subr.bf16.mxu1 %v4094_v9  ;;  %v4110_v25 = vld [vmem:[%s5219_s20 + $0xf0] sm:$0xff]   ;;  %v4114_v29 = vld [vmem:[%s5219_s20 + $0xf8] sm:$0xff]   ;;  %v77_v36 = vld [vmem:[%s5220_s26 + $0x48] sm:$0xff] }
  0x15   :  { %v4111_v26 = vld [vmem:[%s5219_s20 + $0x30] sm:$0xff]   ;;  %v4115_v30 = vld [vmem:[%s5219_s20 + $0x38] sm:$0xff]   ;;  %v68_v37 = vld [vmem:[%s5220_s26] sm:$0xff] }
  0x16   :  { %3595 = vmatpush3.bf16.msra.mxu0 %v4095_v10  ;;  %v4112_v27 = vld [vmem:[%s5219_s20 + $0xb0] sm:$0xff]   ;;  %v4116_v31 = vld [vmem:[%s5219_s20 + $0xb8] sm:$0xff]   ;;  %v76_v42 = vld [vmem:[%s5220_s26 + $0x40] sm:$0xff] }
  0x17   :  { %3617 = vmatpush3.bf16.msra.mxu1 %v4096_v11  ;;  %3596 = vmatprep.subr.bf16.mxu0 %v4097_v12  ;;  %v75_v33 = vld [vmem:[%s5220_s26 + $0x38] sm:$0xff]  ;;  %v74_v38 = vld [vmem:[%s5220_s26 + $0x30] sm:$0xff]  ;;  %v4117_v44 = vld [vmem:[%s5219_s20 + $0x140] sm:$0xff]  }
  0x18   :  { %3618 = vmatprep.subr.bf16.mxu1 %v4098_v13  ;;  %v71_v34 = vld [vmem:[%s5220_s26 + $0x18] sm:$0xff]  ;;  %v81_v35 = vpack.c.bf16 %v75_v33, %v69_v32  ;;  %v80_v40 = vpack.c.bf16 %v74_v38, %v68_v37  ;;  %v70_v41 = vld [vmem:[%s5220_s26 + $0x10] sm:$0xff]  ;;  %v4118_v45 = vld [vmem:[%s5219_s20 + $0x100] sm:$0xff]  }
  0x19   :  { %v83_v39 = vpack.c.bf16 %v77_v36, %v71_v34  ;;  %v82_v43 = vpack.c.bf16 %v76_v42, %v70_v41  ;;  %v4119_v46 = vld [vmem:[%s5219_s20 + $0x148] sm:$0xff]   ;;  %v4121_v48 = vld [vmem:[%s5219_s20 + $0x150] sm:$0xff]   ;;  %v4123_v50 = vld [vmem:[%s5219_s20 + $0x158] sm:$0xff]  }
  0x1a   :  { %3597 = vmatpush3.bf16.msra.mxu0 %v4099_v14  ;;  %502 = vmatprep.mubr.bf16.mxu0 %v81_v35  ;;  %v4120_v47 = vld [vmem:[%s5219_s20 + $0x108] sm:$0xff]   ;;  %v4122_v49 = vld [vmem:[%s5219_s20 + $0x110] sm:$0xff]   ;;  %v4124_v51 = vld [vmem:[%s5219_s20 + $0x118] sm:$0xff]  }
  0x1b   :  { %3619 = vmatpush3.bf16.msra.mxu1 %v4100_v15  ;;  %3598 = vmatprep.subr.bf16.mxu0 %v4101_v16  ;;  %v4125_v52 = vld [vmem:[%s5219_s20 + $0x160] sm:$0xff]   ;;  %v73_v54 = vld [vmem:[%s5220_s26 + $0x28] sm:$0xff]  ;;  %v79_v56 = vld [vmem:[%s5220_s26 + $0x58] sm:$0xff] }
  0x1c   :  { %3620 = vmatprep.subr.bf16.mxu1 %v4102_v17  ;;  %543 = vmatprep.mubr.bf16.mxu1 %v83_v39  ;;  %v4126_v53 = vld [vmem:[%s5219_s20 + $0x120] sm:$0xff]   ;;  %v4127_v55 = vld [vmem:[%s5219_s20 + $0x168] sm:$0xff]   ;;  %v85_v58 = vpack.c.bf16 %v79_v56, %v73_v54  ;;  %v4129_v59 = vld [vmem:[%s5219_s20 + $0x170] sm:$0xff]  }
  0x1d   :  { %v4128_v57 = vld [vmem:[%s5219_s20 + $0x128] sm:$0xff]   ;;  %v4130_v60 = vld [vmem:[%s5219_s20 + $0x130] sm:$0xff]   ;;  %v4131_v61 = vld [vmem:[%s5219_s20 + $0x178] sm:$0xff]  }
  0x1e   :  { %3599 = vmatpush3.bf16.msra.mxu0 %v4103_v18  ;;  %v4132_v62 = vld [vmem:[%s5219_s20 + $0x138] sm:$0xff]   ;;  %v72_v63 = vld [vmem:[%s5220_s26 + $0x20] sm:$0xff]  ;;  %v78_v0 = vld [vmem:[%s5220_s26 + $0x50] sm:$0xff] }
  0x1f   :  { %3621 = vmatpush3.bf16.msra.mxu1 %v4104_v19  ;;  %3600 = vmatprep.subr.bf16.mxu0 %v4105_v20  ;;  %v84_v1 = vpack.c.bf16 %v78_v0, %v72_v63 }
  0x20   :  { %3622 = vmatprep.subr.bf16.mxu1 %v4106_v21 }
  0x22   :  { %3601 = vmatpush3.bf16.msra.mxu0 %v4107_v22 }
  0x23   :  { %3623 = vmatpush3.bf16.msra.mxu1 %v4108_v23  ;;  %3602 = vmatprep.subr.bf16.mxu0 %v4109_v24 }
  0x24   :  { %3624 = vmatprep.subr.bf16.mxu1 %v4110_v25 }
  0x26   :  { %3603 = vmatpush3.bf16.msra.mxu0 %v4111_v26 }
  0x27   :  { %3625 = vmatpush3.bf16.msra.mxu1 %v4112_v27  ;;  %3604 = vmatprep.subr.bf16.mxu0 %v4113_v28 }
  0x28   :  { %3626 = vmatprep.subr.bf16.mxu1 %v4114_v29 }
  0x2a   :  { %3605 = vmatpush3.bf16.msra.mxu0 %v4115_v30 }
  0x2b   :  { %3627 = vmatpush3.bf16.msra.mxu1 %v4116_v31  ;;  %3634 = vmatprep.subr.bf16.mxu0 %v4117_v44 }
  0x2d   :  { %503 = vmatmul.mubr.bf16.vlgmr.msra.gmra.mrb[0].mxu0 %v80_v40 }
  0x2e   :  { %544 = vmatmul.mubr.bf16.vlgmr.msra.gmra.mrb[0].mxu1 %v82_v43  ;;  %3635 = vmatpush3.bf16.msra.mxu0 %v4118_v45 }
  0x2f   :  { %3636 = vmatprep.subr.bf16.mxu0 %v4119_v46  ;;  %584 = vmatprep.mubr.bf16.mxu0 %v85_v58 }
  0x32   :  { %3637 = vmatpush3.bf16.msra.mxu0 %v4120_v47 }
  0x33   :  { %3638 = vmatprep.subr.bf16.mxu0 %v4121_v48 }
  0x36   :  { %3639 = vmatpush3.bf16.msra.mxu0 %v4122_v49 }
  0x37   :  { %3640 = vmatprep.subr.bf16.mxu0 %v4123_v50 }
  0x3a   :  { %3641 = vmatpush3.bf16.msra.mxu0 %v4124_v51 }
  0x3b   :  { %3642 = vmatprep.subr.bf16.mxu0 %v4125_v52 }
  0x3e   :  { %3643 = vmatpush3.bf16.msra.mxu0 %v4126_v53 }
  0x3f   :  { %3644 = vmatprep.subr.bf16.mxu0 %v4127_v55 }
  0x42   :  { %3645 = vmatpush3.bf16.msra.mxu0 %v4128_v57 }
  0x43   :  { %3646 = vmatprep.subr.bf16.mxu0 %v4129_v59 }
  0x46   :  { %3647 = vmatpush3.bf16.msra.mxu0 %v4130_v60 }
  0x47   :  { %3648 = vmatprep.subr.bf16.mxu0 %v4131_v61 }
  0x4a   :  { %3649 = vmatpush3.bf16.msra.mxu0 %v4132_v62 }
  0x4b   :  { %24 = vsyncpa [#allocation3], 0  ;;  %s5221_s29 = sld [smem:[#allocation6_spill]]  ;;  %vm598_vm0 = vcmask 261120   ;;  %v4133_v39 = vld [vmem:[%s5184_s5] sm:$0xff]   ;;  %v4269_v40 = vmov 0.0  }
  0x4c   :  { %3754 = vmatprep.subr.bf16.mxu1 %v4269_v40  ;;  %3780 = vmatprep.subr.bf16.mxu0 %v4269_v40  ;;  %v4134_v41 = vld [vmem:[%s5184_s5 + $0x8] sm:$0xff]   ;;  %vm4270_vm1 = vmmov 0   ;;  %s5222_s23 = sld [smem:[#allocation8_spill]]  ;;  %v3479_v54 = vld [vmem:[%s5183_s4] ss:$0 sm:$0xff]  ;;  %s4271_s28 = smov 96  }
  0x4d   :  { %585 = vmatmul.mubr.bf16.vlgmr.msra.gmra.mrb[4].mxu0 %v84_v1  ;;  %3755 = vmatpush3.bf16.msra.mxu1 %v4133_v39  ;;  %v3480_v59 = vld [vmem:[%s5185_s6] ss:$0 sm:$0xff]  ;;  %vm715_vm2 = vcmask 64512   ;;  %s4273_s20 = smov 64   ;;  %s4274_s26 = smov 88   ;;  %vm840_vm4 = vcmask 1043456  }
  0x4e   :  { %3756 = vmatprep.subr.bf16.mxu1 %v4269_v40  ;;  %3758 = vmatprep.mubr.msk.bf16.mxu1 %vm4270_vm1, %v4269_v40  ;;  %s4276_s0 = smov 56   ;;  %s4277_s30 = smov 80   ;;  %vm1618_vm5 = vcmask 130048   ;;  %vm1621_vm6 = vcmask 195584   ;;  %vm1859_vm7 = vcmask 523264   ;;  %vm3320_vm9 = vcmask 254976  }
  0x4f   :  { %3782 = vmatprep.mubr.msk.bf16.mxu0 %vm4270_vm1, %v4269_v40  ;;  %s5213_s21 = smov 112   ;;  %s5211_s1 = smov 48  }
  0x50   :  { %s5209_s22 = smov 72   ;;  %s5207_s2 = smov 104  }
  0x51   :  { %v593_v21 = vld [vmem:[%s5221_s29] sm:$0xff]  ;;  %3757 = vmatpush3.bf16.msra.mxu1 %v4134_v41  ;;  %s4275_s29 = smov 120   ;;  %s5204_s24 = smov 40  }
  0x52   :  { %3762 = vmatprep.subr.bf16.mxu1 %v4269_v40  ;;  %v3478_v50 = vld [vmem:[%s5222_s23] ss:$0 sm:$0xff]  ;;  %s5203_s25 = smov 8   ;;  %s5202_s3 = smov 16  }
 0x100   :  { %v3606_v2 = vpop.f32.mrb[0].mxu0 }
 0x101   :  { %v3628_v3 = vpop.f32.mrb[0].mxu1  ;;  %v3607_v4 = vpop.f32.mrb[1].mxu0 }
 0x102   :  { %v3608_v5 = vadd.f32 %v3607_v4, %v3606_v2  ;;  %v3629_v6 = vpop.f32.mrb[1].mxu1  ;;  %v3609_v7 = vpop.f32.mrb[2].mxu0 }
 0x103   :  { %v3630_v8 = vadd.f32 %v3629_v6, %v3628_v3  ;;  %v3631_v9 = vpop.f32.mrb[2].mxu1  ;;  %v3610_v10 = vpop.f32.mrb[3].mxu0 }
 0x104   :  { %v3611_v11 = vadd.f32 %v3610_v10, %v3609_v7  ;;  %v3632_v12 = vpop.f32.mrb[3].mxu1  ;;  %v4272_v10 = vmov -1e+30  }
 0x105   :  { %v546_v13 = vadd.f32 %v3630_v8, %v3608_v5  ;;  %v3633_v14 = vadd.f32 %v3632_v12, %v3631_v9  ;;  %v64_v8 = vlaneseq }
 0x107   :  { %v549_v15 = vadd.f32 %v3633_v14, %v3611_v11  ;;  %v4630_v9 = vand.u32 127, %v64_v8 }
 0x109   :  { %vm66_vm3 = vcmp.lt.s32.totalorder %v4630_v9, 5 }
 0x10a   :  { %v4633_v11 = vsel %vm66_vm3, 0.0, %v4272_v10 }
 0x120   :  { %v3650_v16 = vpop.f32.mrb[4].mxu0 }
 0x121   :  { %v3651_v17 = vpop.f32.mrb[5].mxu0 }
 0x122   :  { %v3652_v18 = vadd.f32 %v3651_v17, %v3650_v16  ;;  %v3653_v19 = vpop.f32.mrb[6].mxu0 }
 0x123   :  { %v3654_v20 = vpop.f32.mrb[7].mxu0 }
 0x124   :  { %v587_v22 = vadd.f32 %v3652_v18, %v546_v13  ;;  %v3655_v23 = vadd.f32 %v3654_v20, %v3653_v19 }
 0x126   :  { %v590_v24 = vadd.f32 %v3655_v23, %v549_v15  ;;  %v4571_v25 = vadd.f32 %v593_v21, %v587_v22 }
 0x128   :  { %v4573_v26 = vadd.f32 %v593_v21, %v590_v24  ;;  %v599_v27 = vsel %vm598_vm0, %v4571_v25, 0.0 }
 0x129   :  { %600 = vadd.xlane.f32.xlu0 %v599_v27 }
 0x12a   :  { %v602_v28 = vsel %vm598_vm0, %v4573_v26, 0.0 }
 0x12d   :  { %603 = vadd.xlane.f32.xlu0 %v602_v28 }
 0x1b6   :  { %v601_v29 = vpop.xlane.xlu0 %600 }
 0x1b7   :  { %v606_v30 = vmul.f32 0.03125, %v601_v29 }
 0x1b9   :  { %v608_v31 = vsub.f32 %v4571_v25, %v606_v30 }
 0x1ba   :  { %v604_v32 = vpop.xlane.xlu0 %603 }
 0x1bb   :  { %v607_v33 = vmul.f32 0.03125, %v604_v32  ;;  %v610_v34 = vmul.f32 %v608_v31, %v608_v31 }
 0x1bd   :  { %v609_v35 = vsub.f32 %v4573_v26, %v607_v33  ;;  %v612_v36 = vsel %vm598_vm0, %v610_v34, 0.0 }
 0x1be   :  { %613 = vadd.xlane.f32.xlu1 %v612_v36 }
 0x1bf   :  { %v611_v37 = vmul.f32 %v609_v35, %v609_v35 }
 0x1c1   :  { %v615_v38 = vsel %vm598_vm0, %v611_v37, 0.0 }
 0x1c2   :  { %616 = vadd.xlane.f32.xlu1 %v615_v38 }
 0x24b   :  { %v614_v42 = vpop.xlane.xlu1 %613 }
 0x24c   :  { %v618_v43 = vmul.f32 0.03125, %v614_v42 }
 0x24e   :  { %v620_v44 = vadd.f32 1e-06, %v618_v43 }
 0x24f   :  { %v617_v45 = vpop.xlane.xlu1 %616 }
 0x250   :  { %4155 = vrsqrt.f32 %v620_v44  ;;  %v619_v46 = vmul.f32 0.03125, %v617_v45 }
 0x252   :  { %v621_v47 = vadd.f32 1e-06, %v619_v46 }
 0x254   :  { %4157 = vrsqrt.f32 %v621_v47 }
 0x25a   :  { %v4156_v48 = vpop.eup %4155 }
 0x25b   :  { %v624_v49 = vmul.f32 %v4156_v48, %v608_v31 }
 0x25d   :  { %v632_v53 = vmul.f32 %v3478_v50, %v624_v49 }
 0x25e   :  { %v4158_v51 = vpop.eup %4157 }
 0x25f   :  { %v625_v52 = vmul.f32 %v4158_v51, %v609_v35  ;;  %v640_v56 = vadd.f32 %v3479_v54, %v632_v53 }
 0x261   :  { %v633_v55 = vmul.f32 %v3478_v50, %v625_v52 }
 0x263   :  { %v641_v57 = vadd.f32 %v3479_v54, %v633_v55 }
 0x265   :  { %v642_v58 = vpack.c.bf16 %v641_v57, %v640_v56 }
 0x267   :  { %3759 = vmatmul.mubr.msk.bf16.vlgmr.msra.gmra.mrb[4].mxu1 %vm598_vm0, %v642_v58 }
 0x268   :  { %3764 = vmatprep.mubr.msk.bf16.mxu1 %vm4270_vm1, %v4269_v40 }
 0x33a   :  { %v703_v60 = vpop.f32.mrb[4].mxu1 }
 0x33b   :  { %v704_v61 = vadd.f32 %v3480_v59, %v703_v60  ;;  %v3760_v62 = vpop.f32.mrb[5].mxu1 }
 0x33c   :  { %v706_v63 = vpop.f32.mrb[6].mxu1 }
 0x33d   :  { %v4609_v0 = vpack.c.bf16 %v704_v61, %v704_v61  ;;  %v707_v1 = vadd.f32 %v3480_v59, %v706_v63  ;;  %v3761_v2 = vpop.f32.mrb[7].mxu1 }
 0x33f   :  { %v4611_v3 = vpack.c.bf16 %v707_v1, %v707_v1  ;;  %713 = vrot.lane.b32.xlu0 %v4609_v0, %s4271_s28 }
 0x341   :  { %763 = vrot.lane.b32.xlu1 %v4611_v3, %s4271_s28 }
 0x3b1   :  { %v714_v4 = vpop.permute.xlu0 %713 }
 0x3b2   :  { %v720_v5 = vsel %vm715_vm2, %v714_v4, 0 }
 0x3b3   :  { %3763 = vmatpush3.bf16.xpose.msra.mxu1 %v720_v5  ;;  %v764_v6 = vpop.permute.xlu1 %763 }
 0x3b4   :  { %3768 = vmatprep.subr.bf16.mxu1 %v4269_v40  ;;  %v769_v7 = vsel %vm715_vm2, %v764_v6, 0 }
 0x3ba   :  { %3765 = vmatmul.mubr.msk.bf16.vlgmr.msra.gmra.mrb[8].mxu1 %vm715_vm2, %v4609_v0 }
 0x3bb   :  { %3769 = vmatpush3.bf16.xpose.msra.mxu1 %v769_v7  ;;  %3770 = vmatprep.mubr.msk.bf16.mxu1 %vm4270_vm1, %v4269_v40 }
 0x3bc   :  { %3774 = vmatprep.subr.bf16.mxu1 %v4269_v40 }
 0x3c2   :  { %3771 = vmatmul.mubr.msk.bf16.vlgmr.msra.gmra.mrb[12].mxu1 %vm715_vm2, %v4611_v3 }
 0x3c3   :  { %3776 = vmatprep.mubr.msk.bf16.mxu1 %vm4270_vm1, %v4269_v40 }
 0x48d   :  { %v756_v12 = vpop.f32.mrb[8].mxu1 }
 0x48e   :  { %v757_v13 = vadd.f32 %v756_v12, %v4633_v11  ;;  %v3766_v14 = vpop.f32.mrb[9].mxu1 }
 0x48f   :  { %v759_v15 = vpop.f32.mrb[10].mxu1 }
 0x490   :  { %v3767_v16 = vpop.f32.mrb[11].mxu1  ;;  %v811_v17 = vsel %vm715_vm2, %v757_v13, -inf }
 0x491   :  { %812 = vmax.xlane.f32.xlu1 %v811_v17 }
 0x495   :  { %v805_v18 = vpop.f32.mrb[12].mxu1 }
 0x496   :  { %v806_v19 = vadd.f32 %v805_v18, %v4633_v11  ;;  %v3772_v20 = vpop.f32.mrb[13].mxu1 }
 0x497   :  { %v808_v21 = vpop.f32.mrb[14].mxu1 }
 0x498   :  { %v3773_v22 = vpop.f32.mrb[15].mxu1  ;;  %v814_v23 = vsel %vm715_vm2, %v806_v19, -inf }
 0x499   :  { %815 = vmax.xlane.f32.xlu0 %v814_v23 }
 0x4a2   :  { %884 = vrot.lane.b32.xlu1 %v4611_v3, %s4273_s20 }
 0x4a6   :  { %934 = vrot.lane.b32.xlu1 %v4609_v0, %s4274_s26 }
 0x51e   :  { %v813_v24 = vpop.xlane.xlu1 %812 }
 0x51f   :  { %v817_v27 = vsub.f32 %v757_v13, %v813_v24 }
 0x521   :  { %v819_v28 = vmul.f32 1.442695, %v817_v27 }
 0x522   :  { %v885_v29 = vpop.permute.xlu1 %884 }
 0x523   :  { %4159 = vpow2.f32 %v819_v28  ;;  %v890_v30 = vsel %vm840_vm4, %v885_v29, 0 }
 0x524   :  { %3781 = vmatpush3.bf16.msra.mxu0 %v890_v30 }
 0x525   :  { %3792 = vmatprep.subr.bf16.mxu0 %v4269_v40 }
 0x526   :  { %v816_v31 = vpop.xlane.xlu0 %815  ;;  %v935_v39 = vpop.permute.xlu1 %934 }
 0x527   :  { %v818_v32 = vsub.f32 %v806_v19, %v816_v31  ;;  %v940_v47 = vsel %vm715_vm2, %v935_v39, 0 }
 0x529   :  { %v821_v33 = vmul.f32 1.442695, %v818_v32 }
 0x52b   :  { %4161 = vpow2.f32 %v821_v33 }
 0x52d   :  { %v4160_v34 = vpop.eup %4159 }
 0x52e   :  { %v823_v35 = vsel %vm715_vm2, %v4160_v34, 0.0 }
 0x52f   :  { %824 = vadd.xlane.f32.xlu0 %v823_v35 }
 0x535   :  { %v4162_v36 = vpop.eup %4161 }
 0x536   :  { %v826_v37 = vsel %vm715_vm2, %v4162_v36, 0.0 }
 0x537   :  { %827 = vadd.xlane.f32.xlu1 %v826_v37 }
 0x545   :  { %835 = vrot.lane.b32.xlu0 %v4609_v0, %s4273_s20 }
 0x548   :  { %984 = vrot.lane.b32.xlu1 %v4611_v3, %s4274_s26 }
 0x549   :  { %932 = vrot.lane.b32.xlu0 %v4609_v0, %s4275_s29 }
 0x54c   :  { %982 = vrot.lane.b32.xlu1 %v4611_v3, %s4275_s29 }
 0x5bc   :  { %v825_v38 = vpop.xlane.xlu0 %824 }
 0x5bd   :  { %4163 = vrcp.f32 %v825_v38 }
 0x5c0   :  { %v836_v41 = vpop.permute.xlu0 %835 }
 0x5c1   :  { %v842_v42 = vsel %vm840_vm4, %v836_v41, 0 }
 0x5c2   :  { %3775 = vmatpush3.bf16.msra.mxu1 %v842_v42 }
 0x5c3   :  { %3786 = vmatprep.subr.bf16.mxu1 %v4269_v40 }
 0x5c4   :  { %v828_v43 = vpop.xlane.xlu1 %827  ;;  %v933_v52 = vpop.permute.xlu0 %932 }
 0x5c5   :  { %4165 = vrcp.f32 %v828_v43 }
 0x5c7   :  { %v4164_v44 = vpop.eup %4163 }
 0x5c8   :  { %v831_v45 = vmul.f32 %v4164_v44, %v4160_v34  ;;  %v985_v50 = vpop.permute.xlu1 %984 }
 0x5c9   :  { %v990_v53 = vsel %vm715_vm2, %v985_v50, 0 }
 0x5ca   :  { %v833_v46 = vpack.c.bf16 %v831_v45, %v831_v45 }
 0x5cc   :  { %3777 = vmatmul.mubr.msk.bf16.vlgmr.msra.gmra.mrb[16].mxu1 %vm715_vm2, %v833_v46  ;;  %v983_v54 = vpop.permute.xlu1 %982 }
 0x5cd   :  { %3787 = vmatpush3.bf16.xpose.msra.mxu1 %v940_v47  ;;  %3788 = vmatprep.mubr.msk.bf16.mxu1 %vm4270_vm1, %v4269_v40 }
 0x5ce   :  { %3798 = vmatprep.subr.bf16.mxu1 %v4269_v40 }
 0x5cf   :  { %v4166_v48 = vpop.eup %4165 }
 0x5d0   :  { %v832_v49 = vmul.f32 %v4166_v48, %v4162_v36 }
 0x5d2   :  { %v834_v51 = vpack.c.bf16 %v832_v49, %v832_v49 }
 0x5d4   :  { %3783 = vmatmul.mubr.msk.bf16.vlgmr.msra.gmra.mrb[8].mxu0 %vm715_vm2, %v834_v51  ;;  %3789 = vmatmul.mubr.msk.bf16.vlgmr.msra.gmra.mrb[20].mxu1 %vm715_vm2, %v933_v52 }
 0x5d5   :  { %3793 = vmatpush3.bf16.xpose.msra.mxu0 %v990_v53  ;;  %3794 = vmatprep.mubr.msk.bf16.mxu0 %vm4270_vm1, %v4269_v40 }
 0x5d6   :  { %3804 = vmatprep.subr.bf16.mxu0 %v4269_v40  ;;  %3800 = vmatprep.mubr.msk.bf16.mxu1 %vm4270_vm1, %v4269_v40 }
 0x5dc   :  { %3795 = vmatmul.mubr.msk.bf16.vlgmr.msra.gmra.mrb[12].mxu0 %vm715_vm2, %v983_v54 }
 0x5dd   :  { %3806 = vmatprep.mubr.msk.bf16.mxu0 %vm4270_vm1, %v4269_v40 }
 0x69f   :  { %v4673_v55 = vpop.f32.mrb[16].mxu1 }
 0x6a0   :  { %v3778_v56 = vpop.f32.mrb[17].mxu1 }
 0x6a1   :  { %v881_v57 = vpop.f32.mrb[18].mxu1 }
 0x6a2   :  { %v3779_v58 = vpop.f32.mrb[19].mxu1 }
 0x6a7   :  { %v4675_v59 = vpop.f32.mrb[8].mxu0  ;;  %v976_v60 = vpop.f32.mrb[20].mxu1 }
 0x6a8   :  { %v977_v61 = vadd.f32 %v976_v60, %v4633_v11  ;;  %v3784_v62 = vpop.f32.mrb[9].mxu0  ;;  %v3790_v63 = vpop.f32.mrb[21].mxu1 }
 0x6a9   :  { %v929_v1 = vpop.f32.mrb[10].mxu0  ;;  %v979_v2 = vpop.f32.mrb[22].mxu1 }
 0x6aa   :  { %v3785_v4 = vpop.f32.mrb[11].mxu0  ;;  %v3791_v5 = vpop.f32.mrb[23].mxu1  ;;  %v1032_v6 = vsel %vm715_vm2, %v977_v61, -inf }
 0x6ab   :  { %1033 = vmax.xlane.f32.xlu0 %v1032_v6 }
 0x6af   :  { %v1026_v7 = vpop.f32.mrb[12].mxu0 }
 0x6b0   :  { %v1027_v10 = vadd.f32 %v1026_v7, %v4633_v11  ;;  %v3796_v12 = vpop.f32.mrb[13].mxu0 }
 0x6b1   :  { %v1029_v13 = vpop.f32.mrb[14].mxu0 }
 0x6b2   :  { %v3797_v14 = vpop.f32.mrb[15].mxu0  ;;  %v1035_v15 = vsel %vm715_vm2, %v1027_v10, -inf }
 0x6b3   :  { %1036 = vmax.xlane.f32.xlu1 %v1035_v15 }
 0x6c4   :  { %1104 = vrot.lane.b32.xlu1 %v4611_v3, %s4276_s0 }
 0x6c8   :  { %1154 = vrot.lane.b32.xlu1 %v4609_v0, %s4277_s30 }
 0x6cc   :  { %1204 = vrot.lane.b32.xlu1 %v4611_v3, %s4277_s30 }
 0x6d0   :  { %1202 = vrot.lane.b32.xlu1 %v4611_v3, %s5213_s21 }
 0x738   :  { %v1034_v16 = vpop.xlane.xlu0 %1033 }
 0x739   :  { %v1038_v17 = vsub.f32 %v977_v61, %v1034_v16 }
 0x73b   :  { %v1040_v18 = vmul.f32 1.442695, %v1038_v17 }
 0x73d   :  { %4167 = vpow2.f32 %v1040_v18 }
 0x740   :  { %v1037_v19 = vpop.xlane.xlu1 %1036 }
 0x741   :  { %v1039_v20 = vsub.f32 %v1027_v10, %v1037_v19 }
 0x743   :  { %v1042_v21 = vmul.f32 1.442695, %v1039_v20 }
 0x744   :  { %v1105_v22 = vpop.permute.xlu1 %1104 }
 0x745   :  { %4169 = vpow2.f32 %v1042_v21  ;;  %v1110_v23 = vsel %vm840_vm4, %v1105_v22, 0 }
 0x746   :  { %3805 = vmatpush3.bf16.msra.mxu0 %v1110_v23 }
 0x747   :  { %v4168_v24 = vpop.eup %4167  ;;  %3816 = vmatprep.subr.bf16.mxu0 %v4269_v40 }
 0x748   :  { %v1044_v27 = vsel %vm715_vm2, %v4168_v24, 0.0  ;;  %v1155_v37 = vpop.permute.xlu1 %1154 }
 0x749   :  { %1045 = vadd.xlane.f32.xlu0 %v1044_v27  ;;  %v1160_v42 = vsel %vm715_vm2, %v1155_v37, 0 }
 0x74c   :  { %v1205_v41 = vpop.permute.xlu1 %1204 }
 0x74d   :  { %v1210_v44 = vsel %vm715_vm2, %v1205_v41, 0 }
 0x74f   :  { %v4170_v28 = vpop.eup %4169 }
 0x750   :  { %v1047_v29 = vsel %vm715_vm2, %v4170_v28, 0.0  ;;  %v1203_v46 = vpop.permute.xlu1 %1202 }
 0x751   :  { %1048 = vadd.xlane.f32.xlu0 %v1047_v29 }
 0x767   :  { %1056 = vrot.lane.b32.xlu0 %v4609_v0, %s4276_s0 }
 0x76b   :  { %1152 = vrot.lane.b32.xlu0 %v4609_v0, %s5213_s21  ;;  %s4287_s21 = smov [#allocation2]  }
 0x7d6   :  { %v1046_v30 = vpop.xlane.xlu0 %1045 }
 0x7d7   :  { %4171 = vrcp.f32 %v1046_v30 }
 0x7de   :  { %v1049_v31 = vpop.xlane.xlu0 %1048 }
 0x7df   :  { %4173 = vrcp.f32 %v1049_v31 }
 0x7e1   :  { %v4172_v32 = vpop.eup %4171 }
 0x7e2   :  { %v1052_v33 = vmul.f32 %v4172_v32, %v4168_v24  ;;  %v1057_v34 = vpop.permute.xlu0 %1056 }
 0x7e3   :  { %v1062_v35 = vsel %vm840_vm4, %v1057_v34, 0 }
 0x7e4   :  { %3799 = vmatpush3.bf16.msra.mxu1 %v1062_v35  ;;  %v1054_v36 = vpack.c.bf16 %v1052_v33, %v1052_v33 }
 0x7e5   :  { %3810 = vmatprep.subr.bf16.mxu1 %v4269_v40 }
 0x7e6   :  { %v1153_v45 = vpop.permute.xlu0 %1152 }
 0x7e7   :  { %3801 = vmatmul.mubr.msk.bf16.vlgmr.msra.gmra.mrb[24].mxu1 %vm715_vm2, %v1054_v36 }
 0x7e8   :  { %3812 = vmatprep.mubr.msk.bf16.mxu1 %vm4270_vm1, %v4269_v40 }
 0x7e9   :  { %v4174_v38 = vpop.eup %4173 }
 0x7ea   :  { %v1053_v39 = vmul.f32 %v4174_v38, %v4170_v28 }
 0x7ec   :  { %v1055_v43 = vpack.c.bf16 %v1053_v39, %v1053_v39 }
 0x7ed   :  { %3811 = vmatpush3.bf16.xpose.msra.mxu1 %v1160_v42 }
 0x7ee   :  { %3807 = vmatmul.mubr.msk.bf16.vlgmr.msra.gmra.mrb[16].mxu0 %vm715_vm2, %v1055_v43  ;;  %3822 = vmatprep.subr.bf16.mxu1 %v4269_v40 }
 0x7ef   :  { %3817 = vmatpush3.bf16.xpose.msra.mxu0 %v1210_v44  ;;  %3818 = vmatprep.mubr.msk.bf16.mxu0 %vm4270_vm1, %v4269_v40 }
 0x7f0   :  { %3828 = vmatprep.subr.bf16.mxu0 %v4269_v40 }
 0x7f4   :  { %3813 = vmatmul.mubr.msk.bf16.vlgmr.msra.gmra.mrb[28].mxu1 %vm715_vm2, %v1153_v45 }
 0x7f5   :  { %3824 = vmatprep.mubr.msk.bf16.mxu1 %vm4270_vm1, %v4269_v40 }
 0x7f6   :  { %3819 = vmatmul.mubr.msk.bf16.vlgmr.msra.gmra.mrb[20].mxu0 %vm715_vm2, %v1203_v46 }
 0x7f7   :  { %3830 = vmatprep.mubr.msk.bf16.mxu0 %vm4270_vm1, %v4269_v40 }
 0x8ba   :  { %v4715_v47 = vpop.f32.mrb[24].mxu1 }
 0x8bb   :  { %v3802_v48 = vpop.f32.mrb[25].mxu1 }
 0x8bc   :  { %v1101_v49 = vpop.f32.mrb[26].mxu1 }
 0x8bd   :  { %v3803_v50 = vpop.f32.mrb[27].mxu1 }
 0x8c1   :  { %v4717_v51 = vpop.f32.mrb[16].mxu0 }
 0x8c2   :  { %v4055_v52 = vpack.i.bf16 %v4717_v51, %v4715_v47  ;;  %v3808_v53 = vpop.f32.mrb[17].mxu0 }
 0x8c3   :  { %v1149_v54 = vpop.f32.mrb[18].mxu0 }
 0x8c4   :  { %v3809_v56 = vpop.f32.mrb[19].mxu0 }
 0x8c7   :  { %v1196_v57 = vpop.f32.mrb[28].mxu1 }
 0x8c8   :  { %v1197_v58 = vadd.f32 %v1196_v57, %v4633_v11  ;;  %v3814_v60 = vpop.f32.mrb[29].mxu1 }
 0x8c9   :  { %v1199_v61 = vpop.f32.mrb[30].mxu1  ;;  %v1246_v62 = vpop.f32.mrb[20].mxu0 }
 0x8ca   :  { %v1247_v63 = vadd.f32 %v1246_v62, %v4633_v11  ;;  %v3815_v1 = vpop.f32.mrb[31].mxu1  ;;  %v3820_v2 = vpop.f32.mrb[21].mxu0  ;;  %v1252_v4 = vsel %vm715_vm2, %v1197_v58, -inf }
 0x8cb   :  { %1253 = vmax.xlane.f32.xlu0 %v1252_v4  ;;  %v1249_v5 = vpop.f32.mrb[22].mxu0 }
 0x8cc   :  { %v3821_v6 = vpop.f32.mrb[23].mxu0  ;;  %v1255_v7 = vsel %vm715_vm2, %v1247_v63, -inf }
 0x8cd   :  { %1256 = vmax.xlane.f32.xlu1 %v1255_v7 }
 0x8de   :  { %1324 = vrot.lane.b32.xlu1 %v4611_v3, %s5211_s1 }
 0x8e2   :  { %1374 = vrot.lane.b32.xlu1 %v4609_v0, %s5209_s22 }
 0x8e6   :  { %1424 = vrot.lane.b32.xlu1 %v4611_v3, %s5209_s22 }
 0x8ea   :  { %1422 = vrot.lane.b32.xlu1 %v4611_v3, %s5207_s2 }
 0x958   :  { %v1254_v10 = vpop.xlane.xlu0 %1253 }
 0x959   :  { %v1258_v12 = vsub.f32 %v1197_v58, %v1254_v10 }
 0x95a   :  { %v1257_v13 = vpop.xlane.xlu1 %1256 }
 0x95b   :  { %v1260_v14 = vmul.f32 1.442695, %v1258_v12  ;;  %v1259_v15 = vsub.f32 %v1247_v63, %v1257_v13 }
 0x95d   :  { %4175 = vpow2.f32 %v1260_v14  ;;  %v1262_v16 = vmul.f32 1.442695, %v1259_v15 }
 0x95e   :  { %v1325_v17 = vpop.permute.xlu1 %1324 }
 0x95f   :  { %4177 = vpow2.f32 %v1262_v16  ;;  %v1330_v18 = vsel %vm840_vm4, %v1325_v17, 0 }
 0x960   :  { %3829 = vmatpush3.bf16.msra.mxu0 %v1330_v18 }
 0x961   :  { %3840 = vmatprep.subr.bf16.mxu0 %v4269_v40 }
 0x962   :  { %v1375_v30 = vpop.permute.xlu1 %1374 }
 0x963   :  { %v1380_v36 = vsel %vm715_vm2, %v1375_v30, 0 }
 0x966   :  { %v1425_v35 = vpop.permute.xlu1 %1424 }
 0x967   :  { %v4176_v19 = vpop.eup %4175  ;;  %v1430_v38 = vsel %vm715_vm2, %v1425_v35, 0 }
 0x968   :  { %v1264_v20 = vsel %vm715_vm2, %v4176_v19, 0.0 }
 0x969   :  { %v4178_v21 = vpop.eup %4177  ;;  %1265 = vadd.xlane.f32.xlu0 %v1264_v20 }
 0x96a   :  { %v1267_v22 = vsel %vm715_vm2, %v4178_v21, 0.0  ;;  %v1423_v41 = vpop.permute.xlu1 %1422 }
 0x96d   :  { %1268 = vadd.xlane.f32.xlu0 %v1267_v22 }
 0x983   :  { %1276 = vrot.lane.b32.xlu0 %v4609_v0, %s5211_s1  ;;  %s3422_s1 = sshll.u32 %s4287_s21, 4  ;;  %s3423_s1 = int_to_ptr.vmem [resolvable:$true] %s3422_s1 }
 0x984   :  { %p4250_p1 = scmp.lt.s32.totalorder %s3423_s1, %s3423_s1 }
 0x987   :  { %1372 = vrot.lane.b32.xlu0 %v4609_v0, %s5207_s2 }
 0x9f6   :  { %v1266_v23 = vpop.xlane.xlu0 %1265 }
 0x9f7   :  { %4179 = vrcp.f32 %v1266_v23 }
 0x9fa   :  { %v1269_v24 = vpop.xlane.xlu0 %1268 }
 0x9fb   :  { %4181 = vrcp.f32 %v1269_v24 }
 0x9fe   :  { %v1277_v27 = vpop.permute.xlu0 %1276 }
 0x9ff   :  { %v1282_v28 = vsel %vm840_vm4, %v1277_v27, 0 }
 0xa00   :  { %3823 = vmatpush3.bf16.msra.mxu1 %v1282_v28  ;;  %v4135_v28 = vld [vmem:[%s5186_s7] sm:$0xff]  }
 0xa01   :  { %v4180_v29 = vpop.eup %4179  ;;  %3834 = vmatprep.subr.bf16.mxu1 %v4269_v40 }
 0xa02   :  { %v1272_v31 = vmul.f32 %v4180_v29, %v4176_v19  ;;  %v1373_v39 = vpop.permute.xlu0 %1372  ;;  %v4136_v29 = vld [vmem:[%s5186_s7 + $0x8] sm:$0xff]  }
 0xa04   :  { %v1274_v32 = vpack.c.bf16 %v1272_v31, %v1272_v31 }
 0xa05   :  { %v4182_v33 = vpop.eup %4181 }
 0xa06   :  { %v1273_v34 = vmul.f32 %v4182_v33, %v4178_v21  ;;  %3825 = vmatmul.mubr.msk.bf16.vlgmr.msra.gmra.mrb[32].mxu1 %vm715_vm2, %v1274_v32 }
 0xa07   :  { %3836 = vmatprep.mubr.msk.bf16.mxu1 %vm4270_vm1, %v4269_v40 }
 0xa08   :  { %v1275_v37 = vpack.c.bf16 %v1273_v34, %v1273_v34 }
 0xa09   :  { %3835 = vmatpush3.bf16.xpose.msra.mxu1 %v1380_v36 }
 0xa0a   :  { %3831 = vmatmul.mubr.msk.bf16.vlgmr.msra.gmra.mrb[24].mxu0 %vm715_vm2, %v1275_v37  ;;  %3846 = vmatprep.subr.bf16.mxu1 %v4269_v40 }
 0xa0b   :  { %3841 = vmatpush3.bf16.xpose.msra.mxu0 %v1430_v38  ;;  %3842 = vmatprep.mubr.msk.bf16.mxu0 %vm4270_vm1, %v4269_v40 }
 0xa0c   :  { %3852 = vmatprep.subr.bf16.mxu0 %v4269_v40 }
 0xa10   :  { %3837 = vmatmul.mubr.msk.bf16.vlgmr.msra.gmra.mrb[36].mxu1 %vm715_vm2, %v1373_v39 }
 0xa11   :  { %3848 = vmatprep.mubr.msk.bf16.mxu1 %vm4270_vm1, %v4269_v40 }
 0xa12   :  { %3843 = vmatmul.mubr.msk.bf16.vlgmr.msra.gmra.mrb[28].mxu0 %vm715_vm2, %v1423_v41 }
 0xa13   :  { %3854 = vmatprep.mubr.msk.bf16.mxu0 %vm4270_vm1, %v4269_v40 }
 0xad9   :  { %v1318_v42 = vpop.f32.mrb[32].mxu1 }
 0xada   :  { %v3826_v43 = vpop.f32.mrb[33].mxu1 }
 0xadb   :  { %v1321_v44 = vpop.f32.mrb[34].mxu1 }
 0xadc   :  { %v3827_v45 = vpop.f32.mrb[35].mxu1 }
 0xadd   :  { %v1366_v46 = vpop.f32.mrb[24].mxu0 }
 0xade   :  { %v4060_v48 = vpack.i.bf16 %v1366_v46, %v1318_v42  ;;  %v3832_v49 = vpop.f32.mrb[25].mxu0 }
 0xadf   :  { %v1369_v50 = vpop.f32.mrb[26].mxu0 }
 0xae0   :  { %v3833_v53 = vpop.f32.mrb[27].mxu0 }
 0xae3   :  { %v1416_v54 = vpop.f32.mrb[36].mxu1 }
 0xae4   :  { %v1417_v56 = vadd.f32 %v1416_v54, %v4633_v11  ;;  %v3838_v57 = vpop.f32.mrb[37].mxu1 }
 0xae5   :  { %v1419_v58 = vpop.f32.mrb[38].mxu1  ;;  %v1466_v60 = vpop.f32.mrb[28].mxu0 }
 0xae6   :  { %v1467_v61 = vadd.f32 %v1466_v60, %v4633_v11  ;;  %v3839_v62 = vpop.f32.mrb[39].mxu1  ;;  %v3844_v63 = vpop.f32.mrb[29].mxu0  ;;  %v1472_v1 = vsel %vm715_vm2, %v1417_v56, -inf }
 0xae7   :  { %1473 = vmax.xlane.f32.xlu0 %v1472_v1  ;;  %v1469_v2 = vpop.f32.mrb[30].mxu0 }
 0xae8   :  { %v3845_v4 = vpop.f32.mrb[31].mxu0  ;;  %v1475_v5 = vsel %vm715_vm2, %v1467_v61, -inf }
 0xae9   :  { %1476 = vmax.xlane.f32.xlu1 %v1475_v5 }
 0xafa   :  { %1544 = vrot.lane.b32.xlu1 %v4611_v3, %s5204_s24 }
 0xafe   :  { %4056 = vrot.lane.b32.xlu1 %v4055_v52, %s5203_s25  ;;  %s5230_s25 = smov 24  }
 0xb02   :  { %4061 = vrot.lane.b32.xlu1 %v4060_v48, %s5202_s3  ;;  %s5206_s3 = smov 24  }
 0xb74   :  { %v1474_v6 = vpop.xlane.xlu0 %1473 }
 0xb75   :  { %v1478_v7 = vsub.f32 %v1417_v56, %v1474_v6 }
 0xb76   :  { %v1477_v10 = vpop.xlane.xlu1 %1476 }
 0xb77   :  { %v1480_v12 = vmul.f32 1.442695, %v1478_v7  ;;  %v1479_v13 = vsub.f32 %v1467_v61, %v1477_v10 }
 0xb79   :  { %4183 = vpow2.f32 %v1480_v12  ;;  %v1482_v14 = vmul.f32 1.442695, %v1479_v13 }
 0xb7a   :  { %v1545_v15 = vpop.permute.xlu1 %1544 }
 0xb7b   :  { %4185 = vpow2.f32 %v1482_v14  ;;  %v1550_v3 = vsel %vm840_vm4, %v1545_v15, 0 }
 0xb7c   :  { %3853 = vmatpush3.bf16.msra.mxu0 %v1550_v3 }
 0xb7d   :  { %3866 = vmatprep.subr.bf16.mxu0 %v4269_v40 }
 0xb7e   :  { %v4057_v39 = vpop.permute.xlu1 %4056 }
 0xb7f   :  { %v4059_v42 = vunpack.i.h.bf16 %v4057_v39  ;;  %v4058_v43 = vunpack.i.l.bf16 %v4057_v39  ;;  %v3506_v39 = vld [vmem:[%s5191_s12] ss:$0 sm:$0xff] }
 0xb81   :  { %v1617_v48 = vsel %vm715_vm2, %v4675_v59, %v4059_v42  ;;  %v1616_v49 = vsel %vm715_vm2, %v4673_v55, %v4058_v43  ;;  %v3503_v55 = vld [vmem:[%s5187_s8] ss:$0 sm:$0xff] }
 0xb82   :  { %v4062_v41 = vpop.permute.xlu1 %4061 }
 0xb83   :  { %v4184_v16 = vpop.eup %4183  ;;  %v4064_v44 = vunpack.i.h.bf16 %v4062_v41  ;;  %v4063_v45 = vunpack.i.l.bf16 %v4062_v41 }
 0xb84   :  { %v1484_v47 = vsel %vm715_vm2, %v4184_v16, 0.0 }
 0xb85   :  { %v4186_v51 = vpop.eup %4185  ;;  %1485 = vadd.xlane.f32.xlu0 %v1484_v47  ;;  %v1619_v54 = vsel %vm1618_vm5, %v1616_v49, %v4063_v45  ;;  %v1620_v56 = vsel %vm1618_vm5, %v1617_v48, %v4064_v44 }
 0xb86   :  { %v1487_v52 = vsel %vm715_vm2, %v4186_v51, 0.0 }
 0xb89   :  { %1488 = vadd.xlane.f32.xlu0 %v1487_v52  ;;  %v4138_v52 = vld [vmem:[%s5190_s11 + $0x8] sm:$0xff]  }
 0xb9f   :  { %1496 = vrot.lane.b32.xlu0 %v4609_v0, %s5204_s24 }
 0xc12   :  { %v1486_v17 = vpop.xlane.xlu0 %1485 }
 0xc13   :  { %4187 = vrcp.f32 %v1486_v17 }
 0xc16   :  { %v1489_v18 = vpop.xlane.xlu0 %1488 }
 0xc17   :  { %4189 = vrcp.f32 %v1489_v18 }
 0xc1a   :  { %v1497_v19 = vpop.permute.xlu0 %1496 }
 0xc1b   :  { %v1502_v20 = vsel %vm840_vm4, %v1497_v19, 0 }
 0xc1c   :  { %3847 = vmatpush3.bf16.msra.mxu1 %v1502_v20 }
 0xc1d   :  { %v4188_v21 = vpop.eup %4187  ;;  %3858 = vmatprep.subr.bf16.mxu1 %v4269_v40 }
 0xc1e   :  { %v1492_v22 = vmul.f32 %v4188_v21, %v4184_v16 }
 0xc20   :  { %v1494_v23 = vpack.c.bf16 %v1492_v22, %v1492_v22 }
 0xc21   :  { %v4190_v24 = vpop.eup %4189 }
 0xc22   :  { %v1493_v27 = vmul.f32 %v4190_v24, %v4186_v51  ;;  %3849 = vmatmul.mubr.msk.bf16.vlgmr.msra.gmra.mrb[40].mxu1 %vm715_vm2, %v1494_v23  ;;  %v4137_v51 = vld [vmem:[%s5190_s11] sm:$0xff]  }
 0xc23   :  { %3862 = vmatprep.mubr.msk.bf16.mxu1 %vm4270_vm1, %v4269_v40  ;;  %3859 = vmatpush3.bf16.msra.mxu1 %v4135_v28 }
 0xc24   :  { %v1495_v0 = vpack.c.bf16 %v1493_v27, %v1493_v27  ;;  %3860 = vmatprep.subr.bf16.mxu1 %v4269_v40  ;;  %v3504_v27 = vld [vmem:[%s5188_s9] ss:$0 sm:$0xff] }
 0xc26   :  { %3855 = vmatmul.mubr.msk.bf16.vlgmr.msra.gmra.mrb[32].mxu0 %vm715_vm2, %v1495_v0 }
 0xc27   :  { %3870 = vmatprep.mubr.msk.bf16.mxu0 %vm4270_vm1, %v4269_v40  ;;  %3861 = vmatpush3.bf16.msra.mxu1 %v4136_v29 }
 0xc28   :  { %3874 = vmatprep.subr.bf16.mxu1 %v4269_v40  ;;  %3867 = vmatpush3.bf16.msra.mxu0 %v4137_v51 }
 0xc29   :  { %3868 = vmatprep.subr.bf16.mxu0 %v4269_v40 }
 0xc2c   :  { %3869 = vmatpush3.bf16.msra.mxu0 %v4138_v52 }
 0xc2d   :  { %3886 = vmatprep.subr.bf16.mxu0 %v4269_v40 }
 0xcf5   :  { %v1538_v30 = vpop.f32.mrb[40].mxu1 }
 0xcf6   :  { %v3850_v31 = vpop.f32.mrb[41].mxu1 }
 0xcf7   :  { %v1541_v32 = vpop.f32.mrb[42].mxu1 }
 0xcf8   :  { %v3851_v33 = vpop.f32.mrb[43].mxu1 }
 0xcf9   :  { %v1586_v34 = vpop.f32.mrb[32].mxu0 }
 0xcfa   :  { %v4065_v35 = vpack.i.bf16 %v1586_v34, %v1538_v30  ;;  %v3856_v36 = vpop.f32.mrb[33].mxu0  ;;  %v3505_v30 = vld [vmem:[%s5189_s10] ss:$0 sm:$0xff] }
 0xcfb   :  { %v1589_v37 = vpop.f32.mrb[34].mxu0  ;;  %v4140_v36 = vld [vmem:[%s5192_s13 + $0x8] sm:$0xff]  }
 0xcfc   :  { %4066 = vrot.lane.b32.xlu0 %v4065_v35, %s5206_s3  ;;  %v3857_v38 = vpop.f32.mrb[35].mxu0  ;;  %v4139_v35 = vld [vmem:[%s5192_s13] sm:$0xff]   ;;  %v4141_v37 = vld [vmem:[%s5192_s13 + $0x10] sm:$0xff]  }
 0xcfd   :  { %v4142_v38 = vld [vmem:[%s5192_s13 + $0x18] sm:$0xff]  }
 0xd6e   :  { %v4067_v46 = vpop.permute.xlu0 %4066 }
 0xd6f   :  { %v4069_v50 = vunpack.i.h.bf16 %v4067_v46  ;;  %v4068_v53 = vunpack.i.l.bf16 %v4067_v46 }
 0xd71   :  { %v1623_v57 = vsel %vm1621_vm6, %v1620_v56, %v4069_v50  ;;  %v1622_v58 = vsel %vm1621_vm6, %v1619_v54, %v4068_v53 }
 0xd72   :  { %v1624_v60 = vpack.c.bf16 %v1623_v57, %v1622_v58 }
 0xd74   :  { %3863 = vmatmul.mubr.msk.bf16.vlgmr.msra.gmra.mrb[44].mxu1 %vm598_vm0, %v1624_v60 }
 0xd75   :  { %3882 = vmatprep.mubr.msk.bf16.mxu1 %vm4270_vm1, %v4269_v40  ;;  %3875 = vmatpush3.bf16.msra.mxu1 %v4139_v35  ;;  %v3518_v35 = vld [vmem:[%s5222_s23 + $0x1] ss:$0 sm:$0xff]  ;;  %s5225_s23 = smov 72  }
 0xd76   :  { %3876 = vmatprep.subr.bf16.mxu1 %v4269_v40 }
 0xd79   :  { %3877 = vmatpush3.bf16.msra.mxu1 %v4140_v36 }
 0xd7a   :  { %3878 = vmatprep.subr.bf16.mxu1 %v4269_v40 }
 0xd7d   :  { %3879 = vmatpush3.bf16.msra.mxu1 %v4141_v37 }
 0xd7e   :  { %3880 = vmatprep.subr.bf16.mxu1 %v4269_v40 }
 0xd81   :  { %3881 = vmatpush3.bf16.msra.mxu1 %v4142_v38 }
 0xd82   :  { %3900 = vmatprep.subr.bf16.mxu1 %v4269_v40 }
 0xe47   :  { %v1678_v59 = vpop.f32.mrb[44].mxu1 }
 0xe48   :  { %v1685_v61 = vadd.f32 %v1678_v59, %v4571_v25  ;;  %v3864_v62 = vpop.f32.mrb[45].mxu1 }
 0xe49   :  { %v1681_v63 = vpop.f32.mrb[46].mxu1 }
 0xe4a   :  { %v4808_v1 = vadd.f32 %v3503_v55, %v1685_v61  ;;  %v1686_v2 = vadd.f32 %v1681_v63, %v4573_v26  ;;  %v3865_v4 = vpop.f32.mrb[47].mxu1 }
 0xe4c   :  { %v4811_v5 = vadd.f32 %v3503_v55, %v1686_v2  ;;  %v1698_v6 = vsel %vm598_vm0, %v4808_v1, 0.0 }
 0xe4d   :  { %1699 = vadd.xlane.f32.xlu1 %v1698_v6 }
 0xe4e   :  { %v1701_v7 = vsel %vm598_vm0, %v4811_v5, 0.0 }
 0xe4f   :  { %1702 = vadd.xlane.f32.xlu0 %v1701_v7 }
 0xeda   :  { %v1700_v10 = vpop.xlane.xlu1 %1699 }
 0xedb   :  { %v1704_v12 = vmul.f32 0.03125, %v1700_v10 }
 0xedc   :  { %v1703_v25 = vpop.xlane.xlu0 %1702 }
 0xedd   :  { %v1706_v13 = vsub.f32 %v4808_v1, %v1704_v12  ;;  %v1705_v14 = vmul.f32 0.03125, %v1703_v25  ;;  %v3515_v25 = vld [vmem:[%s5193_s14] ss:$0 sm:$0xff] }
 0xedf   :  { %v1707_v15 = vsub.f32 %v4811_v5, %v1705_v14  ;;  %v1708_v26 = vmul.f32 %v1706_v13, %v1706_v13 }
 0xee1   :  { %v1710_v3 = vsel %vm598_vm0, %v1708_v26, 0.0  ;;  %v1709_v16 = vmul.f32 %v1707_v15, %v1707_v15 }
 0xee2   :  { %1711 = vadd.xlane.f32.xlu0 %v1710_v3 }
 0xee3   :  { %v1713_v47 = vsel %vm598_vm0, %v1709_v16, 0.0 }
 0xee6   :  { %1714 = vadd.xlane.f32.xlu0 %v1713_v47 }
 0xf6f   :  { %v1712_v17 = vpop.xlane.xlu0 %1711 }
 0xf70   :  { %v1716_v18 = vmul.f32 0.03125, %v1712_v17 }
 0xf72   :  { %v1718_v19 = vadd.f32 1e-06, %v1716_v18 }
 0xf73   :  { %v1715_v20 = vpop.xlane.xlu0 %1714 }
 0xf74   :  { %4191 = vrsqrt.f32 %v1718_v19  ;;  %v1717_v21 = vmul.f32 0.03125, %v1715_v20 }
 0xf76   :  { %v1719_v22 = vadd.f32 1e-06, %v1717_v21 }
 0xf78   :  { %4193 = vrsqrt.f32 %v1719_v22 }
 0xf7e   :  { %v4192_v23 = vpop.eup %4191 }
 0xf7f   :  { %v1722_v24 = vmul.f32 %v4192_v23, %v1706_v13 }
 0xf81   :  { %v1730_v28 = vmul.f32 %v3504_v27, %v1722_v24 }
 0xf82   :  { %v4194_v0 = vpop.eup %4193 }
 0xf83   :  { %v1723_v29 = vmul.f32 %v4194_v0, %v1707_v15  ;;  %v1738_v32 = vadd.f32 %v3505_v30, %v1730_v28  ;;  %v4144_v0 = vld [vmem:[%s5184_s5 + $0x18] sm:$0xff]  }
 0xf85   :  { %v1731_v31 = vmul.f32 %v3504_v27, %v1723_v29  ;;  %v4143_v27 = vld [vmem:[%s5184_s5 + $0x10] sm:$0xff]  }
 0xf87   :  { %v1739_v33 = vadd.f32 %v3505_v30, %v1731_v31 }
 0xf89   :  { %v1740_v34 = vpack.c.bf16 %v1739_v33, %v1738_v32 }
 0xf8b   :  { %3871 = vmatmul.mubr.msk.bf16.vlgmr.msra.gmra.mrb[36].mxu0 %vm598_vm0, %v1740_v34 }
 0xf8c   :  { %3890 = vmatprep.mubr.msk.bf16.mxu0 %vm4270_vm1, %v4269_v40  ;;  %3887 = vmatpush3.bf16.msra.mxu0 %v4143_v27 }
 0xf8d   :  { %3888 = vmatprep.subr.bf16.mxu0 %v4269_v40 }
 0xf90   :  { %3889 = vmatpush3.bf16.msra.mxu0 %v4144_v0 }
 0xf91   :  { %3894 = vmatprep.subr.bf16.mxu0 %v4269_v40 }
0x105e   :  { %v1801_v41 = vpop.f32.mrb[36].mxu0 }
0x105f   :  { %v1802_v42 = vadd.f32 %v3506_v39, %v1801_v41  ;;  %v3872_v43 = vpop.f32.mrb[37].mxu0  ;;  %v3519_v41 = vld [vmem:[%s5183_s4 + $0x1] ss:$0 sm:$0xff]  ;;  %s5223_s4 = smov 112  }
0x1060   :  { %v1804_v44 = vpop.f32.mrb[38].mxu0 }
0x1061   :  { %v1810_v45 = vmul.f32 0.044715, %v1802_v42  ;;  %v1805_v46 = vadd.f32 %v3506_v39, %v1804_v44  ;;  %v3873_v48 = vpop.f32.mrb[39].mxu0  ;;  %v1808_v63 = vmul.f32 0.5, %v1802_v42 }
0x1063   :  { %v1812_v49 = vmul.f32 %v1810_v45, %v1802_v42  ;;  %v1811_v50 = vmul.f32 0.044715, %v1805_v46  ;;  %v1809_v2 = vmul.f32 0.5, %v1805_v46 }
0x1065   :  { %v1814_v53 = vmul.f32 %v1812_v49, %v1802_v42  ;;  %v1813_v54 = vmul.f32 %v1811_v50, %v1805_v46 }
0x1067   :  { %v1816_v56 = vadd.f32 %v1814_v53, %v1802_v42  ;;  %v1815_v57 = vmul.f32 %v1813_v54, %v1805_v46 }
0x1069   :  { %v1818_v58 = vmul.f32 0.7978846, %v1816_v56  ;;  %v1817_v60 = vadd.f32 %v1815_v57, %v1805_v46  ;;  %v3525_v46 = vld [vmem:[%s5185_s6 + $0x1] ss:$0 sm:$0xff]  ;;  %s5224_s6 = smov 48  }
0x106b   :  { %4195 = vtanh.f32 %v1818_v58  ;;  %v1819_v59 = vmul.f32 0.7978846, %v1817_v60 }
0x106d   :  { %4197 = vtanh.f32 %v1819_v59 }
0x1075   :  { %v4196_v55 = vpop.eup %4195 }
0x1076   :  { %v1822_v61 = vadd.f32 1.0, %v4196_v55 }
0x1077   :  { %v4198_v62 = vpop.eup %4197 }
0x1078   :  { %v1823_v4 = vadd.f32 1.0, %v4198_v62  ;;  %v1824_v6 = vmul.f32 %v1822_v61, %v1808_v63 }
0x107a   :  { %v1825_v7 = vmul.f32 %v1823_v4, %v1809_v2 }
0x107c   :  { %v1826_v10 = vpack.c.bf16 %v1825_v7, %v1824_v6 }
0x107e   :  { %3883 = vmatmul.mubr.msk.bf16.vlgmr.msra.gmra.mrb[48].mxu1 %vm1859_vm7, %v1826_v10 }
0x107f   :  { %3902 = vmatprep.mubr.msk.bf16.mxu1 %vm4270_vm1, %v4269_v40 }
0x1151   :  { %v1897_v12 = vpop.f32.mrb[48].mxu1 }
0x1152   :  { %v1904_v13 = vadd.f32 %v1897_v12, %v4808_v1  ;;  %v3884_v14 = vpop.f32.mrb[49].mxu1 }
0x1153   :  { %v1900_v15 = vpop.f32.mrb[50].mxu1 }
0x1154   :  { %v4864_v26 = vadd.f32 %v3515_v25, %v1904_v13  ;;  %v1905_v3 = vadd.f32 %v1900_v15, %v4811_v5  ;;  %v3885_v16 = vpop.f32.mrb[51].mxu1 }
0x1156   :  { %v4867_v47 = vadd.f32 %v3515_v25, %v1905_v3  ;;  %v1919_v51 = vsel %vm598_vm0, %v4864_v26, 0.0 }
0x1157   :  { %1920 = vadd.xlane.f32.xlu1 %v1919_v51 }
0x1158   :  { %v1922_v52 = vsel %vm598_vm0, %v4867_v47, 0.0 }
0x1159   :  { %1923 = vadd.xlane.f32.xlu0 %v1922_v52 }
0x11e4   :  { %v1921_v17 = vpop.xlane.xlu1 %1920 }
0x11e5   :  { %v1925_v18 = vmul.f32 0.03125, %v1921_v17 }
0x11e6   :  { %v1924_v1 = vpop.xlane.xlu0 %1923 }
0x11e7   :  { %v1927_v19 = vsub.f32 %v4864_v26, %v1925_v18  ;;  %v1926_v20 = vmul.f32 0.03125, %v1924_v1 }
0x11e9   :  { %v1928_v21 = vsub.f32 %v4867_v47, %v1926_v20  ;;  %v1929_v5 = vmul.f32 %v1927_v19, %v1927_v19 }
0x11eb   :  { %v1931_v22 = vsel %vm598_vm0, %v1929_v5, 0.0  ;;  %v1930_v23 = vmul.f32 %v1928_v21, %v1928_v21 }
0x11ec   :  { %1932 = vadd.xlane.f32.xlu1 %v1931_v22 }
0x11ed   :  { %v1934_v24 = vsel %vm598_vm0, %v1930_v23, 0.0 }
0x11ee   :  { %1935 = vadd.xlane.f32.xlu0 %v1934_v24 }
0x1279   :  { %v1933_v28 = vpop.xlane.xlu1 %1932 }
0x127a   :  { %v1937_v29 = vmul.f32 0.03125, %v1933_v28 }
0x127b   :  { %v1936_v30 = vpop.xlane.xlu0 %1935 }
0x127c   :  { %v1939_v31 = vadd.f32 1e-06, %v1937_v29  ;;  %v1938_v32 = vmul.f32 0.03125, %v1936_v30 }
0x127e   :  { %4199 = vrsqrt.f32 %v1939_v31  ;;  %v1940_v33 = vadd.f32 1e-06, %v1938_v32 }
0x1280   :  { %4201 = vrsqrt.f32 %v1940_v33 }
0x1288   :  { %v4200_v34 = vpop.eup %4199 }
0x1289   :  { %v1943_v36 = vmul.f32 %v4200_v34, %v1927_v19 }
0x128a   :  { %v4202_v37 = vpop.eup %4201 }
0x128b   :  { %v1951_v38 = vmul.f32 %v3518_v35, %v1943_v36  ;;  %v1944_v39 = vmul.f32 %v4202_v37, %v1928_v21 }
0x128d   :  { %v1952_v42 = vmul.f32 %v3518_v35, %v1944_v39  ;;  %v1959_v43 = vadd.f32 %v3519_v41, %v1951_v38 }
0x128f   :  { %v1960_v44 = vadd.f32 %v3519_v41, %v1952_v42 }
0x1291   :  { %v1961_v45 = vpack.c.bf16 %v1960_v44, %v1959_v43 }
0x1293   :  { %3891 = vmatmul.mubr.msk.bf16.vlgmr.msra.gmra.mrb[40].mxu0 %vm598_vm0, %v1961_v45 }
0x1294   :  { %3896 = vmatprep.mubr.msk.bf16.mxu0 %vm4270_vm1, %v4269_v40 }
0x1366   :  { %v2024_v48 = vpop.f32.mrb[40].mxu0 }
0x1367   :  { %v2025_v49 = vadd.f32 %v3525_v46, %v2024_v48  ;;  %v3892_v50 = vpop.f32.mrb[41].mxu0 }
0x1368   :  { %v2027_v53 = vpop.f32.mrb[42].mxu0 }
0x1369   :  { %v4897_v54 = vpack.c.bf16 %v2025_v49, %v2025_v49  ;;  %v2028_v56 = vadd.f32 %v3525_v46, %v2027_v53  ;;  %v3893_v57 = vpop.f32.mrb[43].mxu0 }
0x136b   :  { %v4899_v58 = vpack.c.bf16 %v2028_v56, %v2028_v56  ;;  %2034 = vrot.lane.b32.xlu1 %v4897_v54, %s4271_s28 }
0x136d   :  { %2083 = vrot.lane.b32.xlu0 %v4899_v58, %s4271_s28  ;;  %s5226_s28 = smov 104  }
0x13dd   :  { %v2035_v60 = vpop.permute.xlu1 %2034 }
0x13de   :  { %v2040_v59 = vsel %vm715_vm2, %v2035_v60, 0 }
0x13df   :  { %3895 = vmatpush3.bf16.xpose.msra.mxu0 %v2040_v59  ;;  %v2084_v55 = vpop.permute.xlu0 %2083 }
0x13e0   :  { %v2089_v61 = vsel %vm715_vm2, %v2084_v55, 0  ;;  %3906 = vmatprep.subr.bf16.mxu0 %v4269_v40 }
0x13e1   :  { %3901 = vmatpush3.bf16.xpose.msra.mxu1 %v2089_v61 }
0x13e2   :  { %3912 = vmatprep.subr.bf16.mxu1 %v4269_v40 }
0x13e6   :  { %3897 = vmatmul.mubr.msk.bf16.vlgmr.msra.gmra.mrb[44].mxu0 %vm715_vm2, %v4897_v54 }
0x13e7   :  { %3908 = vmatprep.mubr.msk.bf16.mxu0 %vm4270_vm1, %v4269_v40 }
0x13e8   :  { %3903 = vmatmul.mubr.msk.bf16.vlgmr.msra.gmra.mrb[52].mxu1 %vm715_vm2, %v4899_v58 }
0x13e9   :  { %3914 = vmatprep.mubr.msk.bf16.mxu1 %vm4270_vm1, %v4269_v40 }
0x14b9   :  { %v2076_v62 = vpop.f32.mrb[44].mxu0 }
0x14ba   :  { %v2077_v63 = vadd.f32 %v2076_v62, %v4633_v11  ;;  %v3898_v2 = vpop.f32.mrb[45].mxu0 }
0x14bb   :  { %v2079_v4 = vpop.f32.mrb[46].mxu0  ;;  %v2125_v6 = vpop.f32.mrb[52].mxu1 }
0x14bc   :  { %v2126_v7 = vadd.f32 %v2125_v6, %v4633_v11  ;;  %v3899_v10 = vpop.f32.mrb[47].mxu0  ;;  %v3904_v12 = vpop.f32.mrb[53].mxu1  ;;  %v2131_v25 = vsel %vm715_vm2, %v2077_v63, -inf }
0x14bd   :  { %v2128_v13 = vpop.f32.mrb[54].mxu1  ;;  %2132 = vmax.xlane.f32.xlu1 %v2131_v25 }
0x14be   :  { %v3905_v14 = vpop.f32.mrb[55].mxu1  ;;  %v2134_v15 = vsel %vm715_vm2, %v2126_v7, -inf }
0x14bf   :  { %2135 = vmax.xlane.f32.xlu0 %v2134_v15 }
0x14ce   :  { %2155 = vrot.lane.b32.xlu1 %v4897_v54, %s4273_s20 }
0x154a   :  { %v2133_v3 = vpop.xlane.xlu1 %2132 }
0x154b   :  { %v2137_v16 = vsub.f32 %v2077_v63, %v2133_v3 }
0x154c   :  { %v2136_v51 = vpop.xlane.xlu0 %2135 }
0x154d   :  { %v2139_v52 = vmul.f32 1.442695, %v2137_v16  ;;  %v2138_v17 = vsub.f32 %v2126_v7, %v2136_v51 }
0x154e   :  { %v2156_v18 = vpop.permute.xlu1 %2155 }
0x154f   :  { %4203 = vpow2.f32 %v2139_v52  ;;  %v2141_v1 = vmul.f32 1.442695, %v2138_v17  ;;  %v2161_v19 = vsel %vm840_vm4, %v2156_v18, 0 }
0x1550   :  { %3907 = vmatpush3.bf16.msra.mxu0 %v2161_v19 }
0x1551   :  { %4205 = vpow2.f32 %v2141_v1  ;;  %3918 = vmatprep.subr.bf16.mxu0 %v4269_v40 }
0x1559   :  { %v4204_v20 = vpop.eup %4203 }
0x155a   :  { %v2143_v21 = vsel %vm715_vm2, %v4204_v20, 0.0 }
0x155b   :  { %v4206_v5 = vpop.eup %4205  ;;  %2144 = vadd.xlane.f32.xlu1 %v2143_v21 }
0x155c   :  { %v2146_v22 = vsel %vm715_vm2, %v4206_v5, 0.0 }
0x155d   :  { %2147 = vadd.xlane.f32.xlu0 %v2146_v22 }
0x156c   :  { %2253 = vrot.lane.b32.xlu1 %v4897_v54, %s4274_s26 }
0x1570   :  { %2303 = vrot.lane.b32.xlu1 %v4899_v58, %s4274_s26  ;;  %s5228_s26 = smov 8  }
0x1573   :  { %2203 = vrot.lane.b32.xlu0 %v4899_v58, %s4273_s20  ;;  %s5227_s20 = smov 40  }
0x1574   :  { %2251 = vrot.lane.b32.xlu1 %v4897_v54, %s4275_s29 }
0x1577   :  { %2301 = vrot.lane.b32.xlu0 %v4899_v58, %s4275_s29  ;;  %s5229_s29 = smov 16  }
0x15e8   :  { %v2145_v23 = vpop.xlane.xlu1 %2144 }
0x15e9   :  { %4207 = vrcp.f32 %v2145_v23 }
0x15ea   :  { %v2148_v24 = vpop.xlane.xlu0 %2147 }
0x15eb   :  { %4209 = vrcp.f32 %v2148_v24 }
0x15ec   :  { %v2254_v28 = vpop.permute.xlu1 %2253 }
0x15ed   :  { %v2259_v35 = vsel %vm715_vm2, %v2254_v28, 0 }
0x15ee   :  { %v2204_v27 = vpop.permute.xlu0 %2203 }
0x15ef   :  { %v2209_v0 = vsel %vm840_vm4, %v2204_v27, 0 }
0x15f0   :  { %3913 = vmatpush3.bf16.msra.mxu1 %v2209_v0  ;;  %v2304_v34 = vpop.permute.xlu1 %2303 }
0x15f1   :  { %3924 = vmatprep.subr.bf16.mxu1 %v4269_v40  ;;  %v2309_v37 = vsel %vm715_vm2, %v2304_v34, 0 }
0x15f2   :  { %v2302_v39 = vpop.permute.xlu0 %2301 }
0x15f3   :  { %v4208_v29 = vpop.eup %4207 }
0x15f4   :  { %v2151_v30 = vmul.f32 %v4208_v29, %v4204_v20  ;;  %v2252_v38 = vpop.permute.xlu1 %2251 }
0x15f5   :  { %v4210_v31 = vpop.eup %4209 }
0x15f6   :  { %v2152_v32 = vmul.f32 %v4210_v31, %v4206_v5  ;;  %v2153_v33 = vpack.c.bf16 %v2151_v30, %v2151_v30 }
0x15f8   :  { %3909 = vmatmul.mubr.msk.bf16.vlgmr.msra.gmra.mrb[48].mxu0 %vm715_vm2, %v2153_v33  ;;  %v2154_v36 = vpack.c.bf16 %v2152_v32, %v2152_v32 }
0x15f9   :  { %3919 = vmatpush3.bf16.xpose.msra.mxu0 %v2259_v35  ;;  %3920 = vmatprep.mubr.msk.bf16.mxu0 %vm4270_vm1, %v4269_v40 }
0x15fa   :  { %3915 = vmatmul.mubr.msk.bf16.vlgmr.msra.gmra.mrb[56].mxu1 %vm715_vm2, %v2154_v36  ;;  %3930 = vmatprep.subr.bf16.mxu0 %v4269_v40 }
0x15fb   :  { %3925 = vmatpush3.bf16.xpose.msra.mxu1 %v2309_v37  ;;  %3926 = vmatprep.mubr.msk.bf16.mxu1 %vm4270_vm1, %v4269_v40 }
0x15fc   :  { %3936 = vmatprep.subr.bf16.mxu1 %v4269_v40 }
0x1600   :  { %3921 = vmatmul.mubr.msk.bf16.vlgmr.msra.gmra.mrb[52].mxu0 %vm715_vm2, %v2252_v38 }
0x1601   :  { %3932 = vmatprep.mubr.msk.bf16.mxu0 %vm4270_vm1, %v4269_v40 }
0x1602   :  { %3927 = vmatmul.mubr.msk.bf16.vlgmr.msra.gmra.mrb[60].mxu1 %vm715_vm2, %v2302_v39 }
0x1603   :  { %3938 = vmatprep.mubr.msk.bf16.mxu1 %vm4270_vm1, %v4269_v40 }
0x16cb   :  { %v4955_v41 = vpop.f32.mrb[48].mxu0 }
0x16cc   :  { %v3910_v42 = vpop.f32.mrb[49].mxu0 }
0x16cd   :  { %v2200_v43 = vpop.f32.mrb[50].mxu0  ;;  %v4957_v44 = vpop.f32.mrb[56].mxu1 }
0x16ce   :  { %v3911_v45 = vpop.f32.mrb[51].mxu0  ;;  %v3916_v46 = vpop.f32.mrb[57].mxu1 }
0x16cf   :  { %v2248_v48 = vpop.f32.mrb[58].mxu1 }
0x16d0   :  { %v3917_v49 = vpop.f32.mrb[59].mxu1 }
0x16d3   :  { %v2295_v50 = vpop.f32.mrb[52].mxu0 }
0x16d4   :  { %v2296_v53 = vadd.f32 %v2295_v50, %v4633_v11  ;;  %v3922_v56 = vpop.f32.mrb[53].mxu0 }
0x16d5   :  { %v2298_v57 = vpop.f32.mrb[54].mxu0  ;;  %v2345_v60 = vpop.f32.mrb[60].mxu1 }
0x16d6   :  { %v2346_v59 = vadd.f32 %v2345_v60, %v4633_v11  ;;  %v3923_v55 = vpop.f32.mrb[55].mxu0  ;;  %v3928_v61 = vpop.f32.mrb[61].mxu1  ;;  %v2351_v62 = vsel %vm715_vm2, %v2296_v53, -inf }
0x16d7   :  { %v2348_v63 = vpop.f32.mrb[62].mxu1  ;;  %2352 = vmax.xlane.f32.xlu1 %v2351_v62 }
0x16d8   :  { %v3929_v2 = vpop.f32.mrb[63].mxu1  ;;  %v2354_v4 = vsel %vm715_vm2, %v2346_v59, -inf }
0x16d9   :  { %2355 = vmax.xlane.f32.xlu0 %v2354_v4 }
0x16e8   :  { %2375 = vrot.lane.b32.xlu1 %v4897_v54, %s4276_s0 }
0x16ec   :  { %2473 = vrot.lane.b32.xlu1 %v4897_v54, %s4277_s30 }
0x16f0   :  { %2523 = vrot.lane.b32.xlu1 %v4899_v58, %s4277_s30 }
0x16f4   :  { %2471 = vrot.lane.b32.xlu1 %v4897_v54, %s5223_s4 }
0x1764   :  { %v2353_v6 = vpop.xlane.xlu1 %2352 }
0x1765   :  { %v2357_v7 = vsub.f32 %v2296_v53, %v2353_v6 }
0x1766   :  { %v2356_v10 = vpop.xlane.xlu0 %2355 }
0x1767   :  { %v2359_v12 = vmul.f32 1.442695, %v2357_v7  ;;  %v2358_v25 = vsub.f32 %v2346_v59, %v2356_v10 }
0x1768   :  { %v2376_v13 = vpop.permute.xlu1 %2375 }
0x1769   :  { %4211 = vpow2.f32 %v2359_v12  ;;  %v2361_v14 = vmul.f32 1.442695, %v2358_v25  ;;  %v2381_v15 = vsel %vm840_vm4, %v2376_v13, 0 }
0x176a   :  { %3931 = vmatpush3.bf16.msra.mxu0 %v2381_v15 }
0x176b   :  { %4213 = vpow2.f32 %v2361_v14  ;;  %3942 = vmatprep.subr.bf16.mxu0 %v4269_v40 }
0x176c   :  { %v2474_v21 = vpop.permute.xlu1 %2473 }
0x176d   :  { %v2479_v24 = vsel %vm715_vm2, %v2474_v21, 0 }
0x1770   :  { %v2524_v0 = vpop.permute.xlu1 %2523 }
0x1771   :  { %v2529_v29 = vsel %vm715_vm2, %v2524_v0, 0 }
0x1773   :  { %v4212_v3 = vpop.eup %4211 }
0x1774   :  { %v2363_v16 = vsel %vm715_vm2, %v4212_v3, 0.0  ;;  %v2472_v30 = vpop.permute.xlu1 %2471 }
0x1775   :  { %v4214_v51 = vpop.eup %4213  ;;  %2364 = vadd.xlane.f32.xlu0 %v2363_v16 }
0x1776   :  { %v2366_v52 = vsel %vm715_vm2, %v4214_v51, 0.0 }
0x1779   :  { %2367 = vadd.xlane.f32.xlu0 %v2366_v52 }
0x178f   :  { %2423 = vrot.lane.b32.xlu0 %v4899_v58, %s4276_s0 }
0x1793   :  { %2521 = vrot.lane.b32.xlu0 %v4899_v58, %s5223_s4 }
0x1802   :  { %v2365_v17 = vpop.xlane.xlu0 %2364 }
0x1803   :  { %4215 = vrcp.f32 %v2365_v17 }
0x1806   :  { %v2368_v18 = vpop.xlane.xlu0 %2367 }
0x1807   :  { %4217 = vrcp.f32 %v2368_v18 }
0x180a   :  { %v2424_v1 = vpop.permute.xlu0 %2423 }
0x180b   :  { %v2429_v19 = vsel %vm840_vm4, %v2424_v1, 0 }
0x180c   :  { %3937 = vmatpush3.bf16.msra.mxu1 %v2429_v19 }
0x180d   :  { %v4216_v20 = vpop.eup %4215  ;;  %3948 = vmatprep.subr.bf16.mxu1 %v4269_v40 }
0x180e   :  { %v2371_v5 = vmul.f32 %v4216_v20, %v4212_v3  ;;  %v2522_v31 = vpop.permute.xlu0 %2521 }
0x1810   :  { %v2373_v22 = vpack.c.bf16 %v2371_v5, %v2371_v5 }
0x1811   :  { %v4218_v23 = vpop.eup %4217 }
0x1812   :  { %v2372_v27 = vmul.f32 %v4218_v23, %v4214_v51  ;;  %3933 = vmatmul.mubr.msk.bf16.vlgmr.msra.gmra.mrb[56].mxu0 %vm715_vm2, %v2373_v22 }
0x1813   :  { %3943 = vmatpush3.bf16.xpose.msra.mxu0 %v2479_v24  ;;  %3944 = vmatprep.mubr.msk.bf16.mxu0 %vm4270_vm1, %v4269_v40 }
0x1814   :  { %v2374_v28 = vpack.c.bf16 %v2372_v27, %v2372_v27  ;;  %3954 = vmatprep.subr.bf16.mxu0 %v4269_v40 }
0x1816   :  { %3939 = vmatmul.mubr.msk.bf16.vlgmr.msra.gmra.mrb[64].mxu1 %vm715_vm2, %v2374_v28 }
0x1817   :  { %3949 = vmatpush3.bf16.xpose.msra.mxu1 %v2529_v29  ;;  %3950 = vmatprep.mubr.msk.bf16.mxu1 %vm4270_vm1, %v4269_v40 }
0x1818   :  { %3960 = vmatprep.subr.bf16.mxu1 %v4269_v40 }
0x181a   :  { %3945 = vmatmul.mubr.msk.bf16.vlgmr.msra.gmra.mrb[60].mxu0 %vm715_vm2, %v2472_v30 }
0x181b   :  { %3956 = vmatprep.mubr.msk.bf16.mxu0 %vm4270_vm1, %v4269_v40 }
0x181e   :  { %3951 = vmatmul.mubr.msk.bf16.vlgmr.msra.gmra.mrb[68].mxu1 %vm715_vm2, %v2522_v31 }
0x181f   :  { %3962 = vmatprep.mubr.msk.bf16.mxu1 %vm4270_vm1, %v4269_v40 }
0x18e5   :  { %v4997_v32 = vpop.f32.mrb[56].mxu0 }
0x18e6   :  { %v3934_v33 = vpop.f32.mrb[57].mxu0 }
0x18e7   :  { %v2420_v34 = vpop.f32.mrb[58].mxu0 }
0x18e8   :  { %v3935_v35 = vpop.f32.mrb[59].mxu0 }
0x18e9   :  { %v4999_v36 = vpop.f32.mrb[64].mxu1 }
0x18ea   :  { %v4070_v37 = vpack.i.bf16 %v4999_v36, %v4997_v32  ;;  %v3940_v38 = vpop.f32.mrb[65].mxu1 }
0x18eb   :  { %v2468_v39 = vpop.f32.mrb[66].mxu1 }
0x18ec   :  { %v3941_v42 = vpop.f32.mrb[67].mxu1 }
0x18ed   :  { %v2515_v43 = vpop.f32.mrb[60].mxu0 }
0x18ee   :  { %v2516_v45 = vadd.f32 %v2515_v43, %v4633_v11  ;;  %v3946_v46 = vpop.f32.mrb[61].mxu0 }
0x18ef   :  { %v2518_v48 = vpop.f32.mrb[62].mxu0 }
0x18f0   :  { %v3947_v49 = vpop.f32.mrb[63].mxu0  ;;  %v2571_v50 = vsel %vm715_vm2, %v2516_v45, -inf }
0x18f1   :  { %v2565_v53 = vpop.f32.mrb[68].mxu1  ;;  %2572 = vmax.xlane.f32.xlu1 %v2571_v50 }
0x18f2   :  { %v2566_v56 = vadd.f32 %v2565_v53, %v4633_v11  ;;  %v3952_v57 = vpop.f32.mrb[69].mxu1 }
0x18f3   :  { %v2568_v60 = vpop.f32.mrb[70].mxu1 }
0x18f4   :  { %v3953_v59 = vpop.f32.mrb[71].mxu1  ;;  %v2574_v55 = vsel %vm715_vm2, %v2566_v56, -inf }
0x18f5   :  { %2575 = vmax.xlane.f32.xlu0 %v2574_v55 }
0x1902   :  { %2595 = vrot.lane.b32.xlu1 %v4897_v54, %s5224_s6 }
0x1906   :  { %2693 = vrot.lane.b32.xlu1 %v4897_v54, %s5225_s23 }
0x190a   :  { %2743 = vrot.lane.b32.xlu1 %v4899_v58, %s5225_s23 }
0x190e   :  { %2691 = vrot.lane.b32.xlu1 %v4897_v54, %s5226_s28 }
0x197e   :  { %v2573_v61 = vpop.xlane.xlu1 %2572 }
0x197f   :  { %v2577_v62 = vsub.f32 %v2516_v45, %v2573_v61 }
0x1981   :  { %v2579_v63 = vmul.f32 1.442695, %v2577_v62 }
0x1982   :  { %v2576_v2 = vpop.xlane.xlu0 %2575  ;;  %v2596_v4 = vpop.permute.xlu1 %2595 }
0x1983   :  { %4219 = vpow2.f32 %v2579_v63  ;;  %v2578_v6 = vsub.f32 %v2566_v56, %v2576_v2  ;;  %v2601_v7 = vsel %vm840_vm4, %v2596_v4, 0 }
0x1984   :  { %3955 = vmatpush3.bf16.msra.mxu0 %v2601_v7 }
0x1985   :  { %v2581_v10 = vmul.f32 1.442695, %v2578_v6  ;;  %3966 = vmatprep.subr.bf16.mxu0 %v4269_v40 }
0x1986   :  { %v2694_v17 = vpop.permute.xlu1 %2693 }
0x1987   :  { %4221 = vpow2.f32 %v2581_v10  ;;  %v2699_v20 = vsel %vm715_vm2, %v2694_v17, 0 }
0x198a   :  { %v2744_v5 = vpop.permute.xlu1 %2743 }
0x198b   :  { %v2749_v23 = vsel %vm715_vm2, %v2744_v5, 0 }
0x198d   :  { %v4220_v12 = vpop.eup %4219 }
0x198e   :  { %v2583_v25 = vsel %vm715_vm2, %v4220_v12, 0.0  ;;  %v2692_v24 = vpop.permute.xlu1 %2691 }
0x198f   :  { %2584 = vadd.xlane.f32.xlu0 %v2583_v25 }
0x1991   :  { %v4222_v13 = vpop.eup %4221 }
0x1992   :  { %v2586_v14 = vsel %vm715_vm2, %v4222_v13, 0.0 }
0x1993   :  { %2587 = vadd.xlane.f32.xlu0 %v2586_v14 }
0x19a9   :  { %2643 = vrot.lane.b32.xlu0 %v4899_v58, %s5224_s6 }
0x19ad   :  { %2741 = vrot.lane.b32.xlu0 %v4899_v58, %s5226_s28 }
0x1a1c   :  { %v2585_v15 = vpop.xlane.xlu0 %2584 }
0x1a1d   :  { %4223 = vrcp.f32 %v2585_v15 }
0x1a20   :  { %v2588_v3 = vpop.xlane.xlu0 %2587 }
0x1a21   :  { %4225 = vrcp.f32 %v2588_v3 }
0x1a24   :  { %v2644_v16 = vpop.permute.xlu0 %2643 }
0x1a25   :  { %v2649_v51 = vsel %vm840_vm4, %v2644_v16, 0  ;;  %v4145_v16 = vld [vmem:[%s5186_s7 + $0x10] sm:$0xff]  }
0x1a26   :  { %3961 = vmatpush3.bf16.msra.mxu1 %v2649_v51  ;;  %v4146_v51 = vld [vmem:[%s5186_s7 + $0x18] sm:$0xff]  }
0x1a27   :  { %v4224_v52 = vpop.eup %4223  ;;  %3972 = vmatprep.subr.bf16.mxu1 %v4269_v40 }
0x1a28   :  { %v2591_v18 = vmul.f32 %v4224_v52, %v4220_v12  ;;  %v2742_v27 = vpop.permute.xlu0 %2741 }
0x1a2a   :  { %v2593_v1 = vpack.c.bf16 %v2591_v18, %v2591_v18 }
0x1a2b   :  { %v4226_v19 = vpop.eup %4225 }
0x1a2c   :  { %v2592_v21 = vmul.f32 %v4226_v19, %v4222_v13  ;;  %3957 = vmatmul.mubr.msk.bf16.vlgmr.msra.gmra.mrb[64].mxu0 %vm715_vm2, %v2593_v1 }
0x1a2d   :  { %3967 = vmatpush3.bf16.xpose.msra.mxu0 %v2699_v20  ;;  %3968 = vmatprep.mubr.msk.bf16.mxu0 %vm4270_vm1, %v4269_v40 }
0x1a2e   :  { %v2594_v22 = vpack.c.bf16 %v2592_v21, %v2592_v21  ;;  %3978 = vmatprep.subr.bf16.mxu0 %v4269_v40 }
0x1a30   :  { %3963 = vmatmul.mubr.msk.bf16.vlgmr.msra.gmra.mrb[72].mxu1 %vm715_vm2, %v2594_v22 }
0x1a31   :  { %3973 = vmatpush3.bf16.xpose.msra.mxu1 %v2749_v23  ;;  %3974 = vmatprep.mubr.msk.bf16.mxu1 %vm4270_vm1, %v4269_v40 }
0x1a32   :  { %3984 = vmatprep.subr.bf16.mxu1 %v4269_v40 }
0x1a34   :  { %3969 = vmatmul.mubr.msk.bf16.vlgmr.msra.gmra.mrb[68].mxu0 %vm715_vm2, %v2692_v24 }
0x1a35   :  { %3980 = vmatprep.mubr.msk.bf16.mxu0 %vm4270_vm1, %v4269_v40 }
0x1a38   :  { %3975 = vmatmul.mubr.msk.bf16.vlgmr.msra.gmra.mrb[76].mxu1 %vm715_vm2, %v2742_v27 }
0x1a39   :  { %3986 = vmatprep.mubr.msk.bf16.mxu1 %vm4270_vm1, %v4269_v40 }
0x1aff   :  { %v2637_v0 = vpop.f32.mrb[64].mxu0 }
0x1b00   :  { %v3958_v28 = vpop.f32.mrb[65].mxu0 }
0x1b01   :  { %v2640_v29 = vpop.f32.mrb[66].mxu0 }
0x1b02   :  { %v3959_v30 = vpop.f32.mrb[67].mxu0 }
0x1b03   :  { %v2685_v31 = vpop.f32.mrb[72].mxu1 }
0x1b04   :  { %v4075_v33 = vpack.i.bf16 %v2685_v31, %v2637_v0  ;;  %v3964_v34 = vpop.f32.mrb[73].mxu1 }
0x1b05   :  { %v2688_v35 = vpop.f32.mrb[74].mxu1 }
0x1b06   :  { %v3965_v38 = vpop.f32.mrb[75].mxu1 }
0x1b07   :  { %v2735_v39 = vpop.f32.mrb[68].mxu0 }
0x1b08   :  { %v2736_v42 = vadd.f32 %v2735_v39, %v4633_v11  ;;  %v3970_v43 = vpop.f32.mrb[69].mxu0 }
0x1b09   :  { %v2738_v45 = vpop.f32.mrb[70].mxu0 }
0x1b0a   :  { %v3971_v46 = vpop.f32.mrb[71].mxu0  ;;  %v2791_v48 = vsel %vm715_vm2, %v2736_v42, -inf }
0x1b0b   :  { %v2785_v49 = vpop.f32.mrb[76].mxu1  ;;  %2792 = vmax.xlane.f32.xlu1 %v2791_v48 }
0x1b0c   :  { %v2786_v50 = vadd.f32 %v2785_v49, %v4633_v11  ;;  %v3976_v53 = vpop.f32.mrb[77].mxu1 }
0x1b0d   :  { %v2788_v56 = vpop.f32.mrb[78].mxu1 }
0x1b0e   :  { %v3977_v57 = vpop.f32.mrb[79].mxu1  ;;  %v2794_v60 = vsel %vm715_vm2, %v2786_v50, -inf }
0x1b0f   :  { %2795 = vmax.xlane.f32.xlu0 %v2794_v60 }
0x1b1c   :  { %2815 = vrot.lane.b32.xlu1 %v4897_v54, %s5227_s20 }
0x1b20   :  { %4071 = vrot.lane.b32.xlu1 %v4070_v37, %s5228_s26 }
0x1b24   :  { %4076 = vrot.lane.b32.xlu1 %v4075_v33, %s5229_s29 }
0x1b98   :  { %v2793_v59 = vpop.xlane.xlu1 %2792 }
0x1b99   :  { %v2797_v55 = vsub.f32 %v2736_v42, %v2793_v59 }
0x1b9b   :  { %v2799_v61 = vmul.f32 1.442695, %v2797_v55 }
0x1b9c   :  { %v2796_v11 = vpop.xlane.xlu0 %2795  ;;  %v2816_v62 = vpop.permute.xlu1 %2815 }
0x1b9d   :  { %4227 = vpow2.f32 %v2799_v61  ;;  %v2798_v63 = vsub.f32 %v2786_v50, %v2796_v11  ;;  %v2821_v2 = vsel %vm840_vm4, %v2816_v62, 0 }
0x1b9e   :  { %3979 = vmatpush3.bf16.msra.mxu0 %v2821_v2 }
0x1b9f   :  { %v2801_v4 = vmul.f32 1.442695, %v2798_v63  ;;  %3990 = vmatprep.subr.bf16.mxu0 %v4269_v40 }
0x1ba0   :  { %v4072_v23 = vpop.permute.xlu1 %4071 }
0x1ba1   :  { %4229 = vpow2.f32 %v2801_v4  ;;  %v4074_v27 = vunpack.i.h.bf16 %v4072_v23  ;;  %v4073_v0 = vunpack.i.l.bf16 %v4072_v23 }
0x1ba3   :  { %v2936_v31 = vsel %vm715_vm2, %v4957_v44, %v4074_v27  ;;  %v2935_v33 = vsel %vm715_vm2, %v4955_v41, %v4073_v0  ;;  %v3553_v41 = vld [vmem:[%s5187_s8 + $0x1] ss:$0 sm:$0xff] }
0x1ba4   :  { %v4077_v24 = vpop.permute.xlu1 %4076 }
0x1ba5   :  { %v4079_v28 = vunpack.i.h.bf16 %v4077_v24  ;;  %v4078_v29 = vunpack.i.l.bf16 %v4077_v24 }
0x1ba7   :  { %v4228_v54 = vpop.eup %4227  ;;  %v2937_v38 = vsel %vm1618_vm5, %v2935_v33, %v4078_v29  ;;  %v2938_v39 = vsel %vm1618_vm5, %v2936_v31, %v4079_v28 }
0x1ba8   :  { %v2803_v32 = vsel %vm715_vm2, %v4228_v54, 0.0 }
0x1ba9   :  { %2804 = vadd.xlane.f32.xlu0 %v2803_v32  ;;  %v4147_v32 = vld [vmem:[%s5190_s11 + $0x10] sm:$0xff]  }
0x1bab   :  { %v4230_v36 = vpop.eup %4229 }
0x1bac   :  { %v2806_v37 = vsel %vm715_vm2, %v4230_v36, 0.0 }
0x1bad   :  { %2807 = vadd.xlane.f32.xlu0 %v2806_v37 }
0x1bc3   :  { %2863 = vrot.lane.b32.xlu0 %v4899_v58, %s5227_s20 }
0x1c36   :  { %v2805_v6 = vpop.xlane.xlu0 %2804 }
0x1c37   :  { %4231 = vrcp.f32 %v2805_v6 }
0x1c3a   :  { %v2808_v7 = vpop.xlane.xlu0 %2807 }
0x1c3b   :  { %4233 = vrcp.f32 %v2808_v7 }
0x1c3e   :  { %v2864_v10 = vpop.permute.xlu0 %2863 }
0x1c3f   :  { %v2869_v12 = vsel %vm840_vm4, %v2864_v10, 0 }
0x1c40   :  { %3985 = vmatpush3.bf16.msra.mxu1 %v2869_v12 }
0x1c41   :  { %v4232_v25 = vpop.eup %4231  ;;  %3998 = vmatprep.subr.bf16.mxu1 %v4269_v40 }
0x1c42   :  { %v2811_v13 = vmul.f32 %v4232_v25, %v4228_v54 }
0x1c44   :  { %v2813_v14 = vpack.c.bf16 %v2811_v13, %v2811_v13 }
0x1c45   :  { %v4234_v15 = vpop.eup %4233 }
0x1c46   :  { %v2812_v3 = vmul.f32 %v4234_v15, %v4230_v36  ;;  %3981 = vmatmul.mubr.msk.bf16.vlgmr.msra.gmra.mrb[72].mxu0 %vm715_vm2, %v2813_v14  ;;  %v4148_v36 = vld [vmem:[%s5190_s11 + $0x18] sm:$0xff]   ;;  %v3556_v15 = vld [vmem:[%s5188_s9 + $0x1] ss:$0 sm:$0xff] }
0x1c47   :  { %3994 = vmatprep.mubr.msk.bf16.mxu0 %vm4270_vm1, %v4269_v40  ;;  %3991 = vmatpush3.bf16.msra.mxu0 %v4145_v16 }
0x1c48   :  { %v2814_v58 = vpack.c.bf16 %v2812_v3, %v2812_v3  ;;  %3992 = vmatprep.subr.bf16.mxu0 %v4269_v40 }
0x1c4a   :  { %3987 = vmatmul.mubr.msk.bf16.vlgmr.msra.gmra.mrb[80].mxu1 %vm715_vm2, %v2814_v58 }
0x1c4b   :  { %4002 = vmatprep.mubr.msk.bf16.mxu1 %vm4270_vm1, %v4269_v40  ;;  %3993 = vmatpush3.bf16.msra.mxu0 %v4146_v51  ;;  %v3557_v51 = vld [vmem:[%s5189_s10 + $0x1] ss:$0 sm:$0xff] }
0x1c4c   :  { %4006 = vmatprep.subr.bf16.mxu0 %v4269_v40  ;;  %3999 = vmatpush3.bf16.msra.mxu1 %v4147_v32 }
0x1c4d   :  { %4000 = vmatprep.subr.bf16.mxu1 %v4269_v40 }
0x1c50   :  { %4001 = vmatpush3.bf16.msra.mxu1 %v4148_v36 }
0x1d19   :  { %v2857_v52 = vpop.f32.mrb[72].mxu0 }
0x1d1a   :  { %v3982_v17 = vpop.f32.mrb[73].mxu0 }
0x1d1b   :  { %v2860_v18 = vpop.f32.mrb[74].mxu0 }
0x1d1c   :  { %v3983_v1 = vpop.f32.mrb[75].mxu0 }
0x1d1d   :  { %v2905_v19 = vpop.f32.mrb[80].mxu1 }
0x1d1e   :  { %v4080_v20 = vpack.i.bf16 %v2905_v19, %v2857_v52  ;;  %v3988_v21 = vpop.f32.mrb[81].mxu1  ;;  %v4149_v19 = vld [vmem:[%s5192_s13 + $0x20] sm:$0xff]  }
0x1d1f   :  { %v2908_v5 = vpop.f32.mrb[82].mxu1  ;;  %v4151_v21 = vld [vmem:[%s5192_s13 + $0x30] sm:$0xff]  }
0x1d20   :  { %v3989_v22 = vpop.f32.mrb[83].mxu1  ;;  %4081 = vrot.lane.b32.xlu1 %v4080_v20, %s5230_s25  ;;  %v4150_v20 = vld [vmem:[%s5192_s13 + $0x28] sm:$0xff]   ;;  %v4152_v5 = vld [vmem:[%s5192_s13 + $0x38] sm:$0xff]  }
0x1d21   :  { %v3563_v22 = vld [vmem:[%s5191_s12 + $0x1] ss:$0 sm:$0xff] }
0x1d92   :  { %v4082_v30 = vpop.permute.xlu1 %4081 }
0x1d93   :  { %v4084_v34 = vunpack.i.h.bf16 %v4082_v30  ;;  %v4083_v35 = vunpack.i.l.bf16 %v4082_v30 }
0x1d95   :  { %v2940_v42 = vsel %vm1621_vm6, %v2938_v39, %v4084_v34  ;;  %v2939_v43 = vsel %vm1621_vm6, %v2937_v38, %v4083_v35 }
0x1d96   :  { %v2941_v45 = vpack.c.bf16 %v2940_v42, %v2939_v43 }
0x1d98   :  { %3995 = vmatmul.mubr.msk.bf16.vlgmr.msra.gmra.mrb[76].mxu0 %vm598_vm0, %v2941_v45 }
0x1d99   :  { %4014 = vmatprep.mubr.msk.bf16.mxu0 %vm4270_vm1, %v4269_v40  ;;  %4007 = vmatpush3.bf16.msra.mxu0 %v4149_v19 }
0x1d9a   :  { %4008 = vmatprep.subr.bf16.mxu0 %v4269_v40 }
0x1d9d   :  { %4009 = vmatpush3.bf16.msra.mxu0 %v4150_v20 }
0x1d9e   :  { %4010 = vmatprep.subr.bf16.mxu0 %v4269_v40 }
0x1da1   :  { %4011 = vmatpush3.bf16.msra.mxu0 %v4151_v21 }
0x1da2   :  { %4012 = vmatprep.subr.bf16.mxu0 %v4269_v40 }
0x1da5   :  { %4013 = vmatpush3.bf16.msra.mxu0 %v4152_v5 }
0x1e6b   :  { %v2996_v44 = vpop.f32.mrb[76].mxu0 }
0x1e6c   :  { %v3003_v46 = vadd.f32 %v2996_v44, %v4864_v26  ;;  %v3996_v48 = vpop.f32.mrb[77].mxu0 }
0x1e6d   :  { %v2999_v49 = vpop.f32.mrb[78].mxu0 }
0x1e6e   :  { %v5090_v50 = vadd.f32 %v3553_v41, %v3003_v46  ;;  %v3004_v53 = vadd.f32 %v2999_v49, %v4867_v47  ;;  %v3997_v56 = vpop.f32.mrb[79].mxu0 }
0x1e70   :  { %v5093_v57 = vadd.f32 %v3553_v41, %v3004_v53  ;;  %v3019_v60 = vsel %vm598_vm0, %v5090_v50, 0.0 }
0x1e71   :  { %3020 = vadd.xlane.f32.xlu0 %v3019_v60 }
0x1e72   :  { %v3022_v59 = vsel %vm598_vm0, %v5093_v57, 0.0 }
0x1e73   :  { %3023 = vadd.xlane.f32.xlu1 %v3022_v59 }
0x1efe   :  { %v3021_v55 = vpop.xlane.xlu0 %3020 }
0x1eff   :  { %v3025_v61 = vmul.f32 0.03125, %v3021_v55  ;;  %v4286_v55 = vmov 0.0|0.0  }
0x1f00   :  { %v3024_v26 = vpop.xlane.xlu1 %3023  ;;  %4033 = vmatprep.subr.bf16.mxu1 %v4286_v55 }
0x1f01   :  { %v3027_v11 = vsub.f32 %v5090_v50, %v3025_v61  ;;  %v3026_v62 = vmul.f32 0.03125, %v3024_v26  ;;  %v3240_v61 = vshrl.u32 %v64_v8, 7 }
0x1f03   :  { %v3028_v63 = vsub.f32 %v5093_v57, %v3026_v62  ;;  %v3029_v47 = vmul.f32 %v3027_v11, %v3027_v11 }
0x1f05   :  { %v3031_v2 = vsel %vm598_vm0, %v3029_v47, 0.0  ;;  %v3030_v4 = vmul.f32 %v3028_v63, %v3028_v63 }
0x1f06   :  { %3032 = vadd.xlane.f32.xlu0 %v3031_v2  ;;  %v3241_v2 = vmul.u32 8, %v3240_v61 }
0x1f07   :  { %v3034_v54 = vsel %vm598_vm0, %v3030_v4, 0.0 }
0x1f08   :  { %vm3242_vm8 = vcmp.eq.s32.totalorder %v4630_v9, %v3241_v2 }
0x1f09   :  { %v3582_v8 = vsel %vm3242_vm8, 1.0, %v4269_v40 }
0x1f0a   :  { %3035 = vadd.xlane.f32.xlu0 %v3034_v54 }
0x1f93   :  { %v3033_v37 = vpop.xlane.xlu0 %3032 }
0x1f94   :  { %v3037_v6 = vmul.f32 0.03125, %v3033_v37 }
0x1f96   :  { %v3039_v7 = vadd.f32 1e-06, %v3037_v6 }
0x1f97   :  { %v3036_v10 = vpop.xlane.xlu0 %3035 }
0x1f98   :  { %4235 = vrsqrt.f32 %v3039_v7  ;;  %v3038_v12 = vmul.f32 0.03125, %v3036_v10 }
0x1f9a   :  { %v3040_v25 = vadd.f32 1e-06, %v3038_v12 }
0x1f9c   :  { %4237 = vrsqrt.f32 %v3040_v25 }
0x1fa2   :  { %v4236_v13 = vpop.eup %4235 }
0x1fa3   :  { %v3043_v14 = vmul.f32 %v4236_v13, %v3027_v11  ;;  %v4153_v13 = vld [vmem:[%s5196_s17] sm:$0xff]  }
0x1fa5   :  { %v3051_v58 = vmul.f32 %v3556_v15, %v3043_v14  ;;  %v4154_v14 = vld [vmem:[%s5196_s17 + $0x8] sm:$0xff]  }
0x1fa6   :  { %v4238_v3 = vpop.eup %4237 }
0x1fa7   :  { %v3044_v16 = vmul.f32 %v4238_v3, %v3028_v63  ;;  %v3059_v17 = vadd.f32 %v3557_v51, %v3051_v58  ;;  %v3581_v63 = vld [vmem:[%s5193_s14 + $0x1] ss:$0 sm:$0xff] }
0x1fa9   :  { %v3052_v52 = vmul.f32 %v3556_v15, %v3044_v16 }
0x1fab   :  { %v3060_v18 = vadd.f32 %v3557_v51, %v3052_v52  ;;  %v3584_v51 = vld [vmem:[%s5194_s15] ss:$0 sm:$0xff]  ;;  %s4245_s15 = scalar_lea.vmem %s3423_s1, 32 }
0x1fac   :  { %p4246_p0 = scmp.ne.s32.totalorder %s3423_s1, %s4245_s15  ;;  %p4251_p2 = scmp.lt.s32.totalorder %s4245_s15, %s4245_s15 }
0x1fad   :  { %v3061_v1 = vpack.c.bf16 %v3060_v18, %v3059_v17  ;;  %v3585_v17 = vld [vmem:[%s5195_s16] ss:$0 sm:$0xff] }
0x1fae   :  { %p4252_p3 = por %p4251_p2, %p4250_p1 }
0x1faf   :  { %4003 = vmatmul.mubr.msk.bf16.vlgmr.msra.gmra.mrb[84].mxu1 %vm598_vm0, %v3061_v1 }
0x1fb0   :  { %4022 = vmatprep.mubr.msk.f32.mxu1 %vm4270_vm1, %v4269_v40  ;;  %p4253_p4 = pnand %p4252_p3, %p4246_p0 }
0x2082   :  { %v3124_v23 = vpop.f32.mrb[84].mxu1 }
0x2083   :  { %v3125_v24 = vadd.f32 %v3563_v22, %v3124_v23  ;;  %v4004_v27 = vpop.f32.mrb[85].mxu1 }
0x2084   :  { %v3127_v0 = vpop.f32.mrb[86].mxu1 }
0x2085   :  { %v3133_v28 = vmul.f32 0.044715, %v3125_v24  ;;  %v3128_v29 = vadd.f32 %v3563_v22, %v3127_v0  ;;  %v4005_v30 = vpop.f32.mrb[87].mxu1  ;;  %v3131_v48 = vmul.f32 0.5, %v3125_v24 }
0x2087   :  { %v3135_v31 = vmul.f32 %v3133_v28, %v3125_v24  ;;  %v3134_v33 = vmul.f32 0.044715, %v3128_v29  ;;  %v3132_v49 = vmul.f32 0.5, %v3128_v29 }
0x2089   :  { %v3137_v34 = vmul.f32 %v3135_v31, %v3125_v24  ;;  %v3136_v35 = vmul.f32 %v3134_v33, %v3128_v29 }
0x208b   :  { %v3139_v38 = vadd.f32 %v3137_v34, %v3125_v24  ;;  %v3138_v39 = vmul.f32 %v3136_v35, %v3128_v29 }
0x208d   :  { %v3141_v42 = vmul.f32 0.7978846, %v3139_v38  ;;  %v3140_v43 = vadd.f32 %v3138_v39, %v3128_v29 }
0x208f   :  { %4239 = vtanh.f32 %v3141_v42  ;;  %v3142_v45 = vmul.f32 0.7978846, %v3140_v43 }
0x2091   :  { %4241 = vtanh.f32 %v3142_v45 }
0x2099   :  { %v4240_v44 = vpop.eup %4239 }
0x209a   :  { %v3145_v41 = vadd.f32 1.0, %v4240_v44 }
0x209b   :  { %v4242_v46 = vpop.eup %4241 }
0x209c   :  { %v3146_v53 = vadd.f32 1.0, %v4242_v46  ;;  %v3147_v56 = vmul.f32 %v3145_v41, %v3131_v48 }
0x209e   :  { %v3148_v60 = vmul.f32 %v3146_v53, %v3132_v49 }
0x20a0   :  { %v3149_v59 = vpack.c.bf16 %v3148_v60, %v3147_v56 }
0x20a2   :  { %4015 = vmatmul.mubr.msk.bf16.vlgmr.msra.gmra.mrb[80].mxu0 %vm1859_vm7, %v3149_v59 }
0x2175   :  { %v3220_v26 = vpop.f32.mrb[80].mxu0 }
0x2176   :  { %v3227_v11 = vadd.f32 %v3220_v26, %v5090_v50  ;;  %v4016_v62 = vpop.f32.mrb[81].mxu0 }
0x2177   :  { %v3223_v47 = vpop.f32.mrb[82].mxu0 }
0x2178   :  { %v3228_v4 = vadd.f32 %v3223_v47, %v5093_v57  ;;  %v4017_v54 = vpop.f32.mrb[83].mxu0  ;;  %v3237_v32 = vadd.f32 %v3581_v63, %v3227_v11 }
0x217a   :  { %v3238_v36 = vadd.f32 %v3581_v63, %v3228_v4 }
0x217c   :  { %v4034_v37 = vpack.c.bf16 %v3238_v36, %v3237_v32 }
0x217e   :  { %4035 = vmatpush3.bf16.msra.mxu1 %v4034_v37 }
0x217f   :  { %4025 = vmatprep.subr.bf16.mxu1 %v4269_v40 }
0x2181   :  { %4023 = vmatmul.mubr.msk.f32.vlgmr.msra.gmra.mrb[88].mxu1 %vm1618_vm5, %v3582_v8 }
0x2182   :  { %4029 = vmatprep.mubr.msk.bf16.mxu1 %vm4270_vm1, %v4269_v40  ;;  %4026 = vmatpush3.bf16.msra.mxu1 %v4153_v13 }
0x2183   :  { %4027 = vmatprep.subr.bf16.mxu1 %v4269_v40  ;;  %v3586_v40 = vld [vmem:[%s5197_s18] ss:$0 sm:$0xff] }
0x2186   :  { %4028 = vmatpush3.bf16.msra.mxu1 %v4154_v14 }
0x2254   :  { %v3314_v50 = vpop.f32.mrb[88].mxu1 }
0x2255   :  { %v3321_v6 = vsel %vm3320_vm9, %v3314_v50, 0.0  ;;  %v4024_v57 = vpop.f32.mrb[89].mxu1 }
0x2256   :  { %3322 = vadd.xlane.f32.xlu0 %v3321_v6 }
0x22e3   :  { %v3323_v7 = vpop.xlane.xlu0 %3322 }
0x22e4   :  { %v3324_v10 = vmul.f32 0.03125, %v3323_v7 }
0x22e6   :  { %v3325_v12 = vsub.f32 %v3314_v50, %v3324_v10 }
0x22e8   :  { %v3326_v9 = vmul.f32 %v3325_v12, %v3325_v12 }
0x22ea   :  { %v3327_v25 = vsel %vm3320_vm9, %v3326_v9, 0.0 }
0x22eb   :  { %3328 = vadd.xlane.f32.xlu1 %v3327_v25 }
0x2378   :  { %v3329_v15 = vpop.xlane.xlu1 %3328 }
0x2379   :  { %v3330_v3 = vmul.f32 0.03125, %v3329_v15 }
0x237b   :  { %v3331_v58 = vadd.f32 1e-06, %v3330_v3 }
0x237d   :  { %4243 = vrsqrt.f32 %v3331_v58 }
0x2387   :  { %v4244_v16 = vpop.eup %4243 }
0x2388   :  { %v3333_v52 = vmul.f32 %v4244_v16, %v3325_v12 }
0x238a   :  { %v3340_v18 = vmul.f32 %v3584_v51, %v3333_v52 }
0x238c   :  { %v3347_v1 = vadd.f32 %v3585_v17, %v3340_v18 }
0x238e   :  { %v3348_v19 = vpack.c.bf16 %v3347_v1, %v3347_v1 }
0x2390   :  { %4030 = vmatmul.mubr.msk.bf16.vlgmr.msra.gmra.mrb[92].mxu1 %vm598_vm0, %v3348_v19 }
0x2463   :  { %v3409_v20 = vpop.f32.mrb[92].mxu1 }
0x2464   :  { %v3410_v21 = vadd.f32 %v3586_v40, %v3409_v20  ;;  %v4031_v5 = vpop.f32.mrb[93].mxu1 }
0x2465   :  { %v3412_v22 = vpop.f32.mrb[94].mxu1 }
0x2466   :  { %3415 = vst [vmem:[#allocation2] sm:$0x3] %v3410_v21  ;;  %v4032_v23 = vpop.f32.mrb[95].mxu1 }
0x2467   :  { %4256 = shalt.err (!%p4253_p4)
}
0x2468   :  { %s4257_s18 = scalar_lea.hbm %s5198_s19, 32 }
0x2469   :  { %p4258_p5 = scmp.ne.s32.totalorder %s5198_s19, %s4257_s18  ;;  %p4261_p6 = scmp.lt.u32.totalorder %s4257_s18, %s5198_s19 }
0x246b   :  { %p4263_p7 = pnand %p4261_p6, %p4258_p5 }
0x246d   :  { %4266 = shalt.err (!%p4263_p7)
}
0x246e   :  { %3425 = dma.vmem_to_hbm [thread:$0]  %s3423_s1, 32, %s5198_s19, [#allocation3]  }
0x246f   :  { %4267 = dma.done.wait [#allocation3], 32  }
0x2470   :  { %4268 = vsyncadd [#allocation3], 4294967264 }
0x2471   :  { %3429 = vsyncpa [#allocation3], 1 }

</bundles_post_ra>
